<compile_context>
chip_gen: v6e
topology: v6e:2x2x1
jax: 0.10.0
libtpu: 0.0.40
codegen_flags: <defaults>
</compile_context>

<pallas_src>
import functools

import jax
import jax.numpy as jnp
from jax.experimental import pallas as pl
from jax.experimental.pallas import tpu as pltpu


# ----------------------------------------------------------------------------------
# Kernel
# ----------------------------------------------------------------------------------

def _layernorm(x, gamma, beta, eps=1e-5):
    mean = jnp.mean(x, axis=-1, keepdims=True)
    var = jnp.mean(jnp.square(x - mean), axis=-1, keepdims=True)
    return (x - mean) * jax.lax.rsqrt(var + eps) * gamma + beta


def _stt_block_kernel(num_heads, L, S, E, self_attn, flat_out, compute_dtype, *refs):
    """One fused STT_Block step on a (bb, L, E) batch block."""
    if self_attn:
        tgt_ref, w_ref, w2_ref, bias_ref, vec_ref, out_ref = refs
    else:
        tgt_ref, src_ref, w_ref, w2_ref, bias_ref, vec_ref, out_ref = refs

    H = num_heads
    D = E // H
    B = tgt_ref.shape[0]
    S_eff = L if self_attn else S

    # Packed parameters (one DMA per slab).
    w_all = w_ref[...]                     # (E, 8E) bf16: [Wq^T*scale|Wk^T|Wv^T|Wo^T|W1^T]
    wo = w_all[:, 3 * E:4 * E]             # (E, E)
    w1 = w_all[:, 4 * E:8 * E]             # (E, 4E)
    w2 = w2_ref[...]                       # (4E, E)
    biases = bias_ref[...]                 # (2, 4E) f32: row0 = [bq*scale|bk|bv|0], row1 = b1
    b1 = biases[1:2, :]
    vecs = vec_ref[...]                    # (8, E) f32
    bo, b2 = vecs[0:1], vecs[1:2]
    g1, be1, g2, be2 = vecs[2:3], vecs[3:4], vecs[4:5], vecs[5:6]

    tgt = tgt_ref[...].reshape(B * L, E)   # (B*L, E) f32

    # Projections on the flattened (bb*L, E) slab: bf16 MXU operands, f32 accumulation.
    # The 1/sqrt(D) attention scale is pre-folded into the Q columns / Q bias.
    if self_attn:
        qkv = jnp.dot(tgt.astype(compute_dtype), w_all[:, :3 * E],
                      preferred_element_type=jnp.float32) + biases[0:1, :3 * E]
        q = qkv[:, :E]
        kv = qkv[:, E:3 * E]
    else:
        src = src_ref[...].reshape(B * S, E)
        q = jnp.dot(tgt.astype(compute_dtype), w_all[:, :E],
                    preferred_element_type=jnp.float32) + biases[0:1, :E]
        kv = jnp.dot(src.astype(compute_dtype), w_all[:, E:3 * E],
                     preferred_element_type=jnp.float32) + biases[0:1, E:3 * E]

    q_b = q.reshape(B, L, E).astype(compute_dtype)
    kv_b = kv.reshape(B, S_eff, 2 * E).astype(compute_dtype)

    # Attention: heads unrolled (H is small); each contraction is a single batched
    # einsum over the bb batch items.  The output projection is folded into the loop
    # so head outputs never need a lane-wise concatenate.
    attn = None
    for h in range(H):
        qh = q_b[:, :, h * D:(h + 1) * D]              # (B, L, D)
        kh = kv_b[:, :, h * D:(h + 1) * D]             # (B, S, D)
        vh = kv_b[:, :, E + h * D:E + (h + 1) * D]     # (B, S, D)
        s = jnp.einsum('bld,bsd->bls', qh, kh,
                       preferred_element_type=jnp.float32)          # (B, L, S) f32
        s = s - jnp.max(s, axis=-1, keepdims=True)
        p = jnp.exp(s)
        p = p * pl.reciprocal(jnp.sum(p, axis=-1, keepdims=True), approx=True)
        o_h = jnp.einsum('bls,bsd->bld', p.astype(compute_dtype), vh,
                         preferred_element_type=jnp.float32)        # (B, L, D) f32
        contrib = jnp.dot(o_h.reshape(B * L, D).astype(compute_dtype),
                          wo[h * D:(h + 1) * D, :],
                          preferred_element_type=jnp.float32)       # (B*L, E)
        attn = contrib if attn is None else attn + contrib
    attn = attn + bo

    # Residual + LayerNorm 1 (f32 elementwise; v5e has no bf16 VPU/EUP path).
    x = _layernorm(attn + tgt, g1, be1)

    # FFN: Linear(E, 4E) -> ReLU -> Linear(4E, E).
    h1 = jnp.dot(x.astype(compute_dtype), w1, preferred_element_type=jnp.float32) + b1
    h1 = jnp.maximum(h1, 0.0)
    ff = jnp.dot(h1.astype(compute_dtype), w2, preferred_element_type=jnp.float32) + b2

    y = _layernorm(x + ff, g2, be2)                                  # (B*L, E) f32

    if flat_out:
        # Lane-dense store: one relayout instead of B*L masked 32/128-lane stores.
        out_ref[...] = y.reshape(B, L * E)
    else:
        out_ref[...] = y.reshape(B, L, E)


# ----------------------------------------------------------------------------------
# Wrapper: generation-aware tiling, packed params, cached jitted pallas_calls
# ----------------------------------------------------------------------------------

@functools.lru_cache(maxsize=1)
def _tpu_target():
    """(two_tensorcores_per_chip, vmem_limit_bytes, mxu_rows) for the current backend."""
    kind = ""
    try:
        kind = jax.devices()[0].device_kind.lower()
    except Exception:
        pass
    two_tc = ("v7" in kind) or ("tpu7" in kind)
    mxu_rows = 128 if "v5" in kind else 256
    # v7x has 64 MiB VMEM per TensorCore -> stay well below; v5e/v6e have 128 MiB.
    vmem_limit = (48 if two_tc else 100) * 1024 * 1024
    try:  # refine with the Pallas hardware query when available
        cap = int(pltpu.get_tpu_info().vmem_capacity_bytes)
        vmem_limit = min(vmem_limit, (cap * 3) // 4)
    except Exception:
        pass
    return two_tc, vmem_limit, mxu_rows


def _vmem_bytes_per_item(L, S, E, H, self_attn):
    """Rough per-batch-item VMEM footprint (double-buffered blocks + live f32 temps)."""
    s = L if self_attn else S
    io = 2 * 4 * (L * E + (0 if self_attn else S * E) + L * E)
    live = 4 * (L * 3 * E + s * 2 * E + 2 * H * L * s + L * 4 * E + 4 * L * E)
    return io + live


def _pick_batch_block(n, rows_per_item, bytes_per_item, vmem_budget, two_tc,
                      rows_target=256, rows_cap=512):
    """Largest divisor bb of n with bb*rows <= rows_cap (bounds the static per-batch
    attention unroll), bb*bytes <= vmem_budget, and bb % 8 == 0 or bb == n (keeps the
    lane-dense output block tileable); prefer bb*rows >= rows_target (fill MXU rows),
    and on 2-TensorCore chips (v7x) prefer a grid of >= 2 steps once steps are full."""
    cap = max(1, min(rows_cap // max(rows_per_item, 1),
                     vmem_budget // max(bytes_per_item, 1)))
    cands = [d for d in range(1, n + 1)
             if n % d == 0 and d <= cap and (d == n or d % 8 == 0)]
    if not cands:
        cands = [d for d in range(1, n + 1) if n % d == 0 and d <= cap] or [1]
    full = [d for d in cands if d * rows_per_item >= rows_target]
    if two_tc:
        split = [d for d in full if n // d >= 2]
        if split:
            return max(split)
    return max(full) if full else max(cands)


def _rep_spec(shape):
    zeros = (0,) * len(shape)
    return pl.BlockSpec(shape, lambda b, _z=zeros: _z)


def _pack_block_params(params, E, head_dim, compute_dtype):
    """Pack STT_Block parameters into 4 arrays (fewer replicated DMA streams)."""
    f32 = jnp.float32
    scale = 1.0 / float(head_dim) ** 0.5
    w_in = params["in_proj_weight"].astype(f32)     # (3E, E)
    b_in = params["in_proj_bias"].astype(f32)       # (3E,)

    w_packed = jnp.concatenate(
        [(w_in[:E] * scale).T, w_in[E:2 * E].T, w_in[2 * E:].T,
         params["out_proj_weight"].astype(f32).T,
         params["ff_w1"].astype(f32).T], axis=1).astype(compute_dtype)   # (E, 8E)
    w2 = params["ff_w2"].astype(f32).T.astype(compute_dtype)             # (4E, E)

    biases = jnp.zeros((2, 4 * E), f32)
    biases = biases.at[0, :E].set(b_in[:E] * scale)          # bq (scaled)
    biases = biases.at[0, E:3 * E].set(b_in[E:])             # bk | bv
    biases = biases.at[1].set(params["ff_b1"].astype(f32))   # b1

    vecs = jnp.zeros((8, E), f32)
    for i, name in enumerate(["out_proj_bias", "ff_b2", "ln1_gamma", "ln1_beta",
                              "ln2_gamma", "ln2_beta"]):
        vecs = vecs.at[i].set(params[name].astype(f32))
    return w_packed, w2, biases, vecs


_CALL_CACHE = {}     # (config) -> jitted pallas_call
_FLAT_OUT_OK = {}    # (bb, L, S, E, self_attn) -> bool (lane-dense output supported?)


def _build_block_call(N, L, S, E, H, bb, self_attn, flat_out, compute_dtype, vmem_limit):
    key = (N, L, S, E, H, bb, self_attn, flat_out, jnp.dtype(compute_dtype).name,
           vmem_limit)
    fn = _CALL_CACHE.get(key)
    if fn is not None:
        return fn

    kernel = functools.partial(_stt_block_kernel, H, L, S, E, self_attn, flat_out,
                               compute_dtype)
    in_specs = [pl.BlockSpec((bb, L, E), lambda b: (b, 0, 0))]
    if not self_attn:
        in_specs.append(pl.BlockSpec((bb, S, E), lambda b: (b, 0, 0)))
    in_specs += [_rep_spec((E, 8 * E)), _rep_spec((4 * E, E)),
                 _rep_spec((2, 4 * E)), _rep_spec((8, E))]
    if flat_out:
        out_shape = jax.ShapeDtypeStruct((N, L * E), jnp.float32)
        out_spec = pl.BlockSpec((bb, L * E), lambda b: (b, 0))
    else:
        out_shape = jax.ShapeDtypeStruct((N, L, E), jnp.float32)
        out_spec = pl.BlockSpec((bb, L, E), lambda b: (b, 0, 0))

    fn = jax.jit(pl.pallas_call(
        kernel,
        out_shape=out_shape,
        grid=(N // bb,),
        in_specs=in_specs,
        out_specs=out_spec,
        compiler_params=pltpu.CompilerParams(
            dimension_semantics=("parallel",),
            vmem_limit_bytes=vmem_limit)))
    _CALL_CACHE[key] = fn
    return fn


def stt_block_forward(tgt, src, params, num_heads, compute_dtype=jnp.bfloat16,
                      self_attn=None):
    """STT_Block forward. tgt: (N, L, E), src: (N, S, E) -- batch-major."""
    if self_attn is None:
        self_attn = tgt is src
    N, L, E = tgt.shape
    S = src.shape[1]
    H = num_heads
    assert E % H == 0, "embed_dim must be divisible by num_heads"
    D = E // H

    w_packed, w2, biases, vecs = _pack_block_params(params, E, D, compute_dtype)
    two_tc, vmem_limit, mxu_rows = _tpu_target()
    bb = _pick_batch_block(N, L, _vmem_bytes_per_item(L, S, E, H, self_attn),
                           vmem_limit // 2, two_tc, rows_target=mxu_rows)

    operands = [tgt.astype(jnp.float32)]
    if not self_attn:
        operands.append(src.astype(jnp.float32))
    operands += [w_packed, w2, biases, vecs]

    # Prefer the lane-dense (N, L*E) output layout; fall back to (N, L, E) blocks if the
    # in-kernel relayout does not lower on this toolchain (decided once per config).
    fkey = (bb, L, S, E, self_attn)
    if _FLAT_OUT_OK.get(fkey, True):
        fn = _build_block_call(N, L, S, E, H, bb, self_attn, True, compute_dtype,
                               vmem_limit)
        if fkey in _FLAT_OUT_OK:
            return fn(*operands).reshape(N, L, E)
        try:
            out = jax.block_until_ready(fn(*operands))
            _FLAT_OUT_OK[fkey] = True
            return out.reshape(N, L, E)
        except Exception:
            _FLAT_OUT_OK[fkey] = False
    fn = _build_block_call(N, L, S, E, H, bb, self_attn, False, compute_dtype,
                           vmem_limit)
    return fn(*operands)


# ----------------------------------------------------------------------------------
# Pure-JAX reference (mirrors the PyTorch forward) and the layer / trunk composition
# ----------------------------------------------------------------------------------

def stt_block_reference(tgt, src, params, num_heads):
    N, L, E = tgt.shape
    D = E // num_heads
    w, b = params["in_proj_weight"], params["in_proj_bias"]
    q = tgt @ w[:E].T + b[:E]
    k = src @ w[E:2 * E].T + b[E:2 * E]
    v = src @ w[2 * E:].T + b[2 * E:]

    def heads(x):
        return x.reshape(N, x.shape[1], num_heads, D).transpose(0, 2, 1, 3)

    qh, kh, vh = heads(q), heads(k), heads(v)
    s = jnp.einsum('nhld,nhsd->nhls', qh, kh) / jnp.sqrt(jnp.float32(D))
    p = jax.nn.softmax(s, axis=-1)
    o = jnp.einsum('nhls,nhsd->nhld', p, vh).transpose(0, 2, 1, 3).reshape(N, L, E)
    o = o @ params["out_proj_weight"].T + params["out_proj_bias"]

    def ln(x, g, bt):
        m = x.mean(-1, keepdims=True)
        var = ((x - m) ** 2).mean(-1, keepdims=True)
        return (x - m) / jnp.sqrt(var + 1e-5) * g + bt

    x = ln(o + tgt, params["ln1_gamma"], params["ln1_beta"])
    h1 = jnp.maximum(x @ params["ff_w1"].T + params["ff_b1"], 0.0)
    ff = h1 @ params["ff_w2"].T + params["ff_b2"]
    return ln(x + ff, params["ln2_gamma"], params["ln2_beta"])


def stt_layer_forward(x, layer_params, num_heads, block_fn=stt_block_forward):
    """STT_Layer forward on batch-major x: (B, N, T, C)."""
    B, N, T, C = x.shape
    # TODO(synk): the two HBM transposes below could be folded into the consuming
    # pallas_call's BlockSpec index_map (grid over (b, t) slabs) to avoid the
    # materialized relayouts between the four block calls.
    x_temp = x.reshape(B * N, T, C)                                   # batch (b,n), seq T
    x_spatio = jnp.transpose(x, (0, 2, 1, 3)).reshape(B * T, N, C)    # batch (b,t), seq N
    x_temp = block_fn(x_temp, x_temp, layer_params["spatio_attention"], num_heads)
    x_spatio = block_fn(x_spatio, x_spatio, layer_params["temporal_attention"], num_heads)
    x_spatio_feat = (x_spatio.reshape(B, T, N, C).transpose(0, 2, 1, 3)
                     .reshape(B * N, T, C))
    x_temp_out = block_fn(x_temp, x_spatio_feat,
                          layer_params["temporal_cross_attention"], num_heads)
    x_temp_feat = (x_temp.reshape(B, N, T, C).transpose(0, 2, 1, 3)
                   .reshape(B * T, N, C))
    x_spatio_out = block_fn(x_spatio, x_temp_feat,
                            layer_params["spatio_cross_attention"], num_heads)
    x_spatio_out = x_spatio_out.reshape(B, T, N, C).transpose(0, 2, 1, 3)  # (B, N, T, C)
    x_temp_out = x_temp_out.reshape(B, N, T, C)
    return x_temp_out + x_spatio_out


def sttloc_forward(x, params, num_heads):
    """STTLoc trunk: input projection -> STT layers -> mean over N -> (B, C, T)."""
    x = x @ params["input_projection_w"].T + params["input_projection_b"]
    for lp in params["layers"]:
        x = stt_layer_forward(x, lp, num_heads)
    feats = jnp.transpose(x.mean(axis=1), (0, 2, 1))   # (B, C, T)
    # TODO(synk): PtTransformerClsHead / PtTransformerRegHead are not defined in the
    # provided spec, so the three sigmoid heatmap heads are omitted here.
    return feats


# ----------------------------------------------------------------------------------
# Parameter constructors + self-test
# ----------------------------------------------------------------------------------

def make_block_params(key, embed_dim, scale=0.1):
    E = embed_dim
    ks = jax.random.split(key, 8)
    return {
        "in_proj_weight": scale * jax.random.normal(ks[0], (3 * E, E), jnp.float32),
        "in_proj_bias": scale * jax.random.normal(ks[1], (3 * E,), jnp.float32),
        "out_proj_weight": scale * jax.random.normal(ks[2], (E, E), jnp.float32),
        "out_proj_bias": scale * jax.random.normal(ks[3], (E,), jnp.float32),
        "ff_w1": scale * jax.random.normal(ks[4], (4 * E, E), jnp.float32),
        "ff_b1": scale * jax.random.normal(ks[5], (4 * E,), jnp.float32),
        "ff_w2": scale * jax.random.normal(ks[6], (E, 4 * E), jnp.float32),
        "ff_b2": scale * jax.random.normal(ks[7], (E,), jnp.float32),
        "ln1_gamma": jnp.ones((E,), jnp.float32),
        "ln1_beta": jnp.zeros((E,), jnp.float32),
        "ln2_gamma": jnp.ones((E,), jnp.float32),
        "ln2_beta": jnp.zeros((E,), jnp.float32),
    }


def make_layer_params(key, embed_dim):
    names = ["spatio_attention", "temporal_attention",
             "temporal_cross_attention", "spatio_cross_attention"]
    ks = jax.random.split(key, len(names))
    return {n: make_block_params(k, embed_dim) for n, k in zip(names, ks)}


if __name__ == "__main__":
    embed_dim, num_heads = 32, 4
    key = jax.random.PRNGKey(0)
    k_blk, k_tgt, k_src, k_layer, k_x, k_in, k_proj = jax.random.split(key, 7)

    # --- STT_Block, cross-attention path: Pallas kernel vs pure-JAX reference ---
    Nb, L, S = 8, 8, 8
    blk_params = make_block_params(k_blk, embed_dim)
    tgt = jax.random.normal(k_tgt, (Nb, L, embed_dim), jnp.float32)
    src = jax.random.normal(k_src, (Nb, S, embed_dim), jnp.float32)
    out = jax.block_until_ready(stt_block_forward(tgt, src, blk_params, num_heads))
    ref = stt_block_reference(tgt, src, blk_params, num_heads)
    err = float(jnp.max(jnp.abs(out - ref)))
    assert out.shape == (Nb, L, embed_dim)
    assert err < 7.5e-2, f"STT_Block (cross) mismatch vs reference: max abs err = {err}"

    # --- STT_Block, fused-QKV self-attention path ---
    out_s = jax.block_until_ready(stt_block_forward(tgt, tgt, blk_params, num_heads))
    ref_s = stt_block_reference(tgt, tgt, blk_params, num_heads)
    err_s = float(jnp.max(jnp.abs(out_s - ref_s)))
    assert err_s < 7.5e-2, f"STT_Block (self) mismatch vs reference: max abs err = {err_s}"

    # --- STT_Layer: composition of four Pallas block calls vs reference ---
    B, Nn, T = 2, 8, 8
    layer_params = make_layer_params(k_layer, embed_dim)
    x = jax.random.normal(k_x, (B, Nn, T, embed_dim), jnp.float32)
    y = jax.block_until_ready(stt_layer_forward(x, layer_params, num_heads))
    y_ref = stt_layer_forward(x, layer_params, num_heads, block_fn=stt_block_reference)
    err_l = float(jnp.max(jnp.abs(y - y_ref)))
    assert y.shape == (B, Nn, T, embed_dim)
    assert err_l < 1.5e-1, f"STT_Layer mismatch vs reference: max abs err = {err_l}"

    # --- STTLoc trunk (input projection + 1 STT layer + pooling) ---
    input_dim = 16
    sttloc_params = {
        "input_projection_w": 0.1 * jax.random.normal(k_proj, (embed_dim, input_dim),
                                                      jnp.float32),
        "input_projection_b": 0.1 * jax.random.normal(k_in, (embed_dim,), jnp.float32),
        "layers": [layer_params],
    }
    x_raw = jax.random.normal(k_in, (B, Nn, T, input_dim), jnp.float32)
    feats = jax.block_until_ready(sttloc_forward(x_raw, sttloc_params, num_heads))
    assert feats.shape == (B, embed_dim, T)

    print("KERNEL_OK")
</pallas_src>

<mosaic_0001>
module attributes {stable_mosaic.version = 11 : i64} {
  func.func @_stt_block_kernel(%arg0: i32, %arg1: memref<8x8x32xf32, #tpu.memory_space<vmem>>, %arg2: memref<8x8x32xf32, #tpu.memory_space<vmem>>, %arg3: memref<32x256xbf16, #tpu.memory_space<vmem>>, %arg4: memref<128x32xbf16, #tpu.memory_space<vmem>>, %arg5: memref<2x128xf32, #tpu.memory_space<vmem>>, %arg6: memref<8x32xf32, #tpu.memory_space<vmem>>, %arg7: memref<8x256xf32, #tpu.memory_space<vmem>>) attributes {dimension_semantics = [#tpu.dimension_semantics<parallel>], iteration_bounds = array<i64: 1>, scalar_prefetch = 0 : i64, scratch_operands = 0 : i64, tpu.core_type = #tpu.core_type<tc>, window_params = [{transform_indices = @transform_0, window_bounds = array<i64: 8, 8, 32>}, {transform_indices = @transform_1, window_bounds = array<i64: 8, 8, 32>}, {pipeline_mode = #tpu.pipeline_mode<synchronous>, transform_indices = @transform_2, window_bounds = array<i64: 32, 256>}, {pipeline_mode = #tpu.pipeline_mode<synchronous>, transform_indices = @transform_3, window_bounds = array<i64: 128, 32>}, {pipeline_mode = #tpu.pipeline_mode<synchronous>, transform_indices = @transform_4, window_bounds = array<i64: 2, 128>}, {pipeline_mode = #tpu.pipeline_mode<synchronous>, transform_indices = @transform_5, window_bounds = array<i64: 8, 32>}, {transform_indices = @transform_6, window_bounds = array<i64: 8, 256>}]} {
    %c0 = arith.constant 0 : index
    %c0_0 = arith.constant 0 : index
    %0 = vector.load %arg3[%c0, %c0_0] : memref<32x256xbf16, #tpu.memory_space<vmem>>, vector<32x256xbf16>
    %1 = vector.extract_strided_slice %0 {offsets = [0, 96], sizes = [32, 32], strides = [1, 1]} : vector<32x256xbf16> to vector<32x32xbf16>
    %2 = vector.extract_strided_slice %0 {offsets = [0, 128], sizes = [32, 128], strides = [1, 1]} : vector<32x256xbf16> to vector<32x128xbf16>
    %c0_1 = arith.constant 0 : index
    %c0_2 = arith.constant 0 : index
    %3 = vector.load %arg4[%c0_1, %c0_2] : memref<128x32xbf16, #tpu.memory_space<vmem>>, vector<128x32xbf16>
    %c0_3 = arith.constant 0 : index
    %c0_4 = arith.constant 0 : index
    %4 = vector.load %arg5[%c0_3, %c0_4] : memref<2x128xf32, #tpu.memory_space<vmem>>, vector<2x128xf32>
    %5 = vector.extract_strided_slice %4 {offsets = [1, 0], sizes = [1, 128], strides = [1, 1]} : vector<2x128xf32> to vector<1x128xf32>
    %c0_5 = arith.constant 0 : index
    %c0_6 = arith.constant 0 : index
    %6 = vector.load %arg6[%c0_5, %c0_6] : memref<8x32xf32, #tpu.memory_space<vmem>>, vector<8x32xf32>
    %7 = vector.extract_strided_slice %6 {offsets = [0, 0], sizes = [1, 32], strides = [1, 1]} : vector<8x32xf32> to vector<1x32xf32>
    %8 = vector.extract_strided_slice %6 {offsets = [1, 0], sizes = [1, 32], strides = [1, 1]} : vector<8x32xf32> to vector<1x32xf32>
    %9 = vector.extract_strided_slice %6 {offsets = [2, 0], sizes = [1, 32], strides = [1, 1]} : vector<8x32xf32> to vector<1x32xf32>
    %10 = vector.extract_strided_slice %6 {offsets = [3, 0], sizes = [1, 32], strides = [1, 1]} : vector<8x32xf32> to vector<1x32xf32>
    %11 = vector.extract_strided_slice %6 {offsets = [4, 0], sizes = [1, 32], strides = [1, 1]} : vector<8x32xf32> to vector<1x32xf32>
    %12 = vector.extract_strided_slice %6 {offsets = [5, 0], sizes = [1, 32], strides = [1, 1]} : vector<8x32xf32> to vector<1x32xf32>
    %c0_7 = arith.constant 0 : index
    %c0_8 = arith.constant 0 : index
    %c0_9 = arith.constant 0 : index
    %13 = vector.load %arg1[%c0_7, %c0_8, %c0_9] : memref<8x8x32xf32, #tpu.memory_space<vmem>>, vector<8x8x32xf32>
    %14 = vector.shape_cast %13 : vector<8x8x32xf32> to vector<64x32xf32>
    %c0_10 = arith.constant 0 : index
    %c0_11 = arith.constant 0 : index
    %c0_12 = arith.constant 0 : index
    %15 = vector.load %arg2[%c0_10, %c0_11, %c0_12] : memref<8x8x32xf32, #tpu.memory_space<vmem>>, vector<8x8x32xf32>
    %16 = vector.shape_cast %15 : vector<8x8x32xf32> to vector<64x32xf32>
    %17 = arith.truncf %14 : vector<64x32xf32> to vector<64x32xbf16>
    %18 = vector.extract_strided_slice %0 {offsets = [0, 0], sizes = [32, 32], strides = [1, 1]} : vector<32x256xbf16> to vector<32x32xbf16>
    %cst = arith.constant dense<0.000000e+00> : vector<64x32xf32>
    %19 = tpu.matmul %17, %18, %cst {dimension_numbers = #tpu.dot_dimension_numbers<[1], [0], [0], [1], [0, 0, 1, 1], [], []>} : vector<64x32xbf16>, vector<32x32xbf16>, vector<64x32xf32> -> vector<64x32xf32>
    %20 = vector.extract_strided_slice %4 {offsets = [0, 0], sizes = [1, 32], strides = [1, 1]} : vector<2x128xf32> to vector<1x32xf32>
    %21 = vector.broadcast %20 : vector<1x32xf32> to vector<64x32xf32>
    %22 = arith.addf %19, %21 : vector<64x32xf32>
    %23 = arith.truncf %16 : vector<64x32xf32> to vector<64x32xbf16>
    %24 = vector.extract_strided_slice %0 {offsets = [0, 32], sizes = [32, 64], strides = [1, 1]} : vector<32x256xbf16> to vector<32x64xbf16>
    %cst_13 = arith.constant dense<0.000000e+00> : vector<64x64xf32>
    %25 = tpu.matmul %23, %24, %cst_13 {dimension_numbers = #tpu.dot_dimension_numbers<[1], [0], [0], [1], [0, 0, 1, 1], [], []>} : vector<64x32xbf16>, vector<32x64xbf16>, vector<64x64xf32> -> vector<64x64xf32>
    %26 = vector.extract_strided_slice %4 {offsets = [0, 32], sizes = [1, 64], strides = [1, 1]} : vector<2x128xf32> to vector<1x64xf32>
    %27 = vector.broadcast %26 : vector<1x64xf32> to vector<64x64xf32>
    %28 = arith.addf %25, %27 : vector<64x64xf32>
    %29 = vector.shape_cast %22 : vector<64x32xf32> to vector<8x8x32xf32>
    %30 = arith.truncf %29 : vector<8x8x32xf32> to vector<8x8x32xbf16>
    %31 = vector.shape_cast %28 : vector<64x64xf32> to vector<8x8x64xf32>
    %32 = arith.truncf %31 : vector<8x8x64xf32> to vector<8x8x64xbf16>
    %33 = vector.extract_strided_slice %30 {offsets = [0, 0, 0], sizes = [8, 8, 8], strides = [1, 1, 1]} : vector<8x8x32xbf16> to vector<8x8x8xbf16>
    %34 = vector.extract_strided_slice %32 {offsets = [0, 0, 0], sizes = [8, 8, 8], strides = [1, 1, 1]} : vector<8x8x64xbf16> to vector<8x8x8xbf16>
    %35 = vector.extract_strided_slice %32 {offsets = [0, 0, 32], sizes = [8, 8, 8], strides = [1, 1, 1]} : vector<8x8x64xbf16> to vector<8x8x8xbf16>
    "tpu.trace_start"() <{level = 10 : i32, message = "bld,bsd->bls"}> : () -> ()
    %cst_14 = arith.constant dense<0.000000e+00> : vector<8x8x8xf32>
    %36 = tpu.matmul %33, %34, %cst_14 {dimension_numbers = #tpu.dot_dimension_numbers<[2], [2], [1], [1], [0, 0, 0, 1, 1, 1], [0], [0]>} : vector<8x8x8xbf16>, vector<8x8x8xbf16>, vector<8x8x8xf32> -> vector<8x8x8xf32>
    "tpu.trace_stop"() : () -> ()
    %cst_15 = arith.constant dense<0xFF800000> : vector<8x8xf32>
    %37 = vector.multi_reduction <maximumf>, %36, %cst_15 [2] : vector<8x8x8xf32> to vector<8x8xf32>
    %38 = vector.shape_cast %37 : vector<8x8xf32> to vector<8x8x1xf32>
    %39 = vector.broadcast %38 : vector<8x8x1xf32> to vector<8x8x8xf32>
    %40 = arith.subf %36, %39 : vector<8x8x8xf32>
    %41 = math.exp %40 : vector<8x8x8xf32>
    %cst_16 = arith.constant dense<0.000000e+00> : vector<8x8xf32>
    %42 = vector.multi_reduction <add>, %41, %cst_16 [2] : vector<8x8x8xf32> to vector<8x8xf32>
    %43 = vector.shape_cast %42 : vector<8x8xf32> to vector<8x8x1xf32>
    %44 = tpu.reciprocal %43 {approx = true} : vector<8x8x1xf32> -> vector<8x8x1xf32>
    %45 = vector.broadcast %44 : vector<8x8x1xf32> to vector<8x8x8xf32>
    %46 = arith.mulf %41, %45 : vector<8x8x8xf32>
    %47 = arith.truncf %46 : vector<8x8x8xf32> to vector<8x8x8xbf16>
    "tpu.trace_start"() <{level = 10 : i32, message = "bls,bsd->bld"}> : () -> ()
    %cst_17 = arith.constant dense<0.000000e+00> : vector<8x8x8xf32>
    %48 = tpu.matmul %47, %35, %cst_17 {dimension_numbers = #tpu.dot_dimension_numbers<[2], [1], [1], [2], [0, 0, 0, 1, 1, 2], [0], [0]>} : vector<8x8x8xbf16>, vector<8x8x8xbf16>, vector<8x8x8xf32> -> vector<8x8x8xf32>
    "tpu.trace_stop"() : () -> ()
    %49 = vector.shape_cast %48 : vector<8x8x8xf32> to vector<64x8xf32>
    %50 = arith.truncf %49 : vector<64x8xf32> to vector<64x8xbf16>
    %51 = vector.extract_strided_slice %1 {offsets = [0, 0], sizes = [8, 32], strides = [1, 1]} : vector<32x32xbf16> to vector<8x32xbf16>
    %cst_18 = arith.constant dense<0.000000e+00> : vector<64x32xf32>
    %52 = tpu.matmul %50, %51, %cst_18 {dimension_numbers = #tpu.dot_dimension_numbers<[1], [0], [0], [1], [0, 0, 1, 1], [], []>} : vector<64x8xbf16>, vector<8x32xbf16>, vector<64x32xf32> -> vector<64x32xf32>
    %53 = vector.extract_strided_slice %30 {offsets = [0, 0, 8], sizes = [8, 8, 8], strides = [1, 1, 1]} : vector<8x8x32xbf16> to vector<8x8x8xbf16>
    %54 = vector.extract_strided_slice %32 {offsets = [0, 0, 8], sizes = [8, 8, 8], strides = [1, 1, 1]} : vector<8x8x64xbf16> to vector<8x8x8xbf16>
    %55 = vector.extract_strided_slice %32 {offsets = [0, 0, 40], sizes = [8, 8, 8], strides = [1, 1, 1]} : vector<8x8x64xbf16> to vector<8x8x8xbf16>
    "tpu.trace_start"() <{level = 10 : i32, message = "bld,bsd->bls"}> : () -> ()
    %cst_19 = arith.constant dense<0.000000e+00> : vector<8x8x8xf32>
    %56 = tpu.matmul %53, %54, %cst_19 {dimension_numbers = #tpu.dot_dimension_numbers<[2], [2], [1], [1], [0, 0, 0, 1, 1, 1], [0], [0]>} : vector<8x8x8xbf16>, vector<8x8x8xbf16>, vector<8x8x8xf32> -> vector<8x8x8xf32>
    "tpu.trace_stop"() : () -> ()
    %cst_20 = arith.constant dense<0xFF800000> : vector<8x8xf32>
    %57 = vector.multi_reduction <maximumf>, %56, %cst_20 [2] : vector<8x8x8xf32> to vector<8x8xf32>
    %58 = vector.shape_cast %57 : vector<8x8xf32> to vector<8x8x1xf32>
    %59 = vector.broadcast %58 : vector<8x8x1xf32> to vector<8x8x8xf32>
    %60 = arith.subf %56, %59 : vector<8x8x8xf32>
    %61 = math.exp %60 : vector<8x8x8xf32>
    %cst_21 = arith.constant dense<0.000000e+00> : vector<8x8xf32>
    %62 = vector.multi_reduction <add>, %61, %cst_21 [2] : vector<8x8x8xf32> to vector<8x8xf32>
    %63 = vector.shape_cast %62 : vector<8x8xf32> to vector<8x8x1xf32>
    %64 = tpu.reciprocal %63 {approx = true} : vector<8x8x1xf32> -> vector<8x8x1xf32>
    %65 = vector.broadcast %64 : vector<8x8x1xf32> to vector<8x8x8xf32>
    %66 = arith.mulf %61, %65 : vector<8x8x8xf32>
    %67 = arith.truncf %66 : vector<8x8x8xf32> to vector<8x8x8xbf16>
    "tpu.trace_start"() <{level = 10 : i32, message = "bls,bsd->bld"}> : () -> ()
    %cst_22 = arith.constant dense<0.000000e+00> : vector<8x8x8xf32>
    %68 = tpu.matmul %67, %55, %cst_22 {dimension_numbers = #tpu.dot_dimension_numbers<[2], [1], [1], [2], [0, 0, 0, 1, 1, 2], [0], [0]>} : vector<8x8x8xbf16>, vector<8x8x8xbf16>, vector<8x8x8xf32> -> vector<8x8x8xf32>
    "tpu.trace_stop"() : () -> ()
    %69 = vector.shape_cast %68 : vector<8x8x8xf32> to vector<64x8xf32>
    %70 = arith.truncf %69 : vector<64x8xf32> to vector<64x8xbf16>
    %71 = vector.extract_strided_slice %1 {offsets = [8, 0], sizes = [8, 32], strides = [1, 1]} : vector<32x32xbf16> to vector<8x32xbf16>
    %cst_23 = arith.constant dense<0.000000e+00> : vector<64x32xf32>
    %72 = tpu.matmul %70, %71, %cst_23 {dimension_numbers = #tpu.dot_dimension_numbers<[1], [0], [0], [1], [0, 0, 1, 1], [], []>} : vector<64x8xbf16>, vector<8x32xbf16>, vector<64x32xf32> -> vector<64x32xf32>
    %73 = arith.addf %52, %72 : vector<64x32xf32>
    %74 = vector.extract_strided_slice %30 {offsets = [0, 0, 16], sizes = [8, 8, 8], strides = [1, 1, 1]} : vector<8x8x32xbf16> to vector<8x8x8xbf16>
    %75 = vector.extract_strided_slice %32 {offsets = [0, 0, 16], sizes = [8, 8, 8], strides = [1, 1, 1]} : vector<8x8x64xbf16> to vector<8x8x8xbf16>
    %76 = vector.extract_strided_slice %32 {offsets = [0, 0, 48], sizes = [8, 8, 8], strides = [1, 1, 1]} : vector<8x8x64xbf16> to vector<8x8x8xbf16>
    "tpu.trace_start"() <{level = 10 : i32, message = "bld,bsd->bls"}> : () -> ()
    %cst_24 = arith.constant dense<0.000000e+00> : vector<8x8x8xf32>
    %77 = tpu.matmul %74, %75, %cst_24 {dimension_numbers = #tpu.dot_dimension_numbers<[2], [2], [1], [1], [0, 0, 0, 1, 1, 1], [0], [0]>} : vector<8x8x8xbf16>, vector<8x8x8xbf16>, vector<8x8x8xf32> -> vector<8x8x8xf32>
    "tpu.trace_stop"() : () -> ()
    %cst_25 = arith.constant dense<0xFF800000> : vector<8x8xf32>
    %78 = vector.multi_reduction <maximumf>, %77, %cst_25 [2] : vector<8x8x8xf32> to vector<8x8xf32>
    %79 = vector.shape_cast %78 : vector<8x8xf32> to vector<8x8x1xf32>
    %80 = vector.broadcast %79 : vector<8x8x1xf32> to vector<8x8x8xf32>
    %81 = arith.subf %77, %80 : vector<8x8x8xf32>
    %82 = math.exp %81 : vector<8x8x8xf32>
    %cst_26 = arith.constant dense<0.000000e+00> : vector<8x8xf32>
    %83 = vector.multi_reduction <add>, %82, %cst_26 [2] : vector<8x8x8xf32> to vector<8x8xf32>
    %84 = vector.shape_cast %83 : vector<8x8xf32> to vector<8x8x1xf32>
    %85 = tpu.reciprocal %84 {approx = true} : vector<8x8x1xf32> -> vector<8x8x1xf32>
    %86 = vector.broadcast %85 : vector<8x8x1xf32> to vector<8x8x8xf32>
    %87 = arith.mulf %82, %86 : vector<8x8x8xf32>
    %88 = arith.truncf %87 : vector<8x8x8xf32> to vector<8x8x8xbf16>
    "tpu.trace_start"() <{level = 10 : i32, message = "bls,bsd->bld"}> : () -> ()
    %cst_27 = arith.constant dense<0.000000e+00> : vector<8x8x8xf32>
    %89 = tpu.matmul %88, %76, %cst_27 {dimension_numbers = #tpu.dot_dimension_numbers<[2], [1], [1], [2], [0, 0, 0, 1, 1, 2], [0], [0]>} : vector<8x8x8xbf16>, vector<8x8x8xbf16>, vector<8x8x8xf32> -> vector<8x8x8xf32>
    "tpu.trace_stop"() : () -> ()
    %90 = vector.shape_cast %89 : vector<8x8x8xf32> to vector<64x8xf32>
    %91 = arith.truncf %90 : vector<64x8xf32> to vector<64x8xbf16>
    %92 = vector.extract_strided_slice %1 {offsets = [16, 0], sizes = [8, 32], strides = [1, 1]} : vector<32x32xbf16> to vector<8x32xbf16>
    %cst_28 = arith.constant dense<0.000000e+00> : vector<64x32xf32>
    %93 = tpu.matmul %91, %92, %cst_28 {dimension_numbers = #tpu.dot_dimension_numbers<[1], [0], [0], [1], [0, 0, 1, 1], [], []>} : vector<64x8xbf16>, vector<8x32xbf16>, vector<64x32xf32> -> vector<64x32xf32>
    %94 = arith.addf %73, %93 : vector<64x32xf32>
    %95 = vector.extract_strided_slice %30 {offsets = [0, 0, 24], sizes = [8, 8, 8], strides = [1, 1, 1]} : vector<8x8x32xbf16> to vector<8x8x8xbf16>
    %96 = vector.extract_strided_slice %32 {offsets = [0, 0, 24], sizes = [8, 8, 8], strides = [1, 1, 1]} : vector<8x8x64xbf16> to vector<8x8x8xbf16>
    %97 = vector.extract_strided_slice %32 {offsets = [0, 0, 56], sizes = [8, 8, 8], strides = [1, 1, 1]} : vector<8x8x64xbf16> to vector<8x8x8xbf16>
    "tpu.trace_start"() <{level = 10 : i32, message = "bld,bsd->bls"}> : () -> ()
    %cst_29 = arith.constant dense<0.000000e+00> : vector<8x8x8xf32>
    %98 = tpu.matmul %95, %96, %cst_29 {dimension_numbers = #tpu.dot_dimension_numbers<[2], [2], [1], [1], [0, 0, 0, 1, 1, 1], [0], [0]>} : vector<8x8x8xbf16>, vector<8x8x8xbf16>, vector<8x8x8xf32> -> vector<8x8x8xf32>
    "tpu.trace_stop"() : () -> ()
    %cst_30 = arith.constant dense<0xFF800000> : vector<8x8xf32>
    %99 = vector.multi_reduction <maximumf>, %98, %cst_30 [2] : vector<8x8x8xf32> to vector<8x8xf32>
    %100 = vector.shape_cast %99 : vector<8x8xf32> to vector<8x8x1xf32>
    %101 = vector.broadcast %100 : vector<8x8x1xf32> to vector<8x8x8xf32>
    %102 = arith.subf %98, %101 : vector<8x8x8xf32>
    %103 = math.exp %102 : vector<8x8x8xf32>
    %cst_31 = arith.constant dense<0.000000e+00> : vector<8x8xf32>
    %104 = vector.multi_reduction <add>, %103, %cst_31 [2] : vector<8x8x8xf32> to vector<8x8xf32>
    %105 = vector.shape_cast %104 : vector<8x8xf32> to vector<8x8x1xf32>
    %106 = tpu.reciprocal %105 {approx = true} : vector<8x8x1xf32> -> vector<8x8x1xf32>
    %107 = vector.broadcast %106 : vector<8x8x1xf32> to vector<8x8x8xf32>
    %108 = arith.mulf %103, %107 : vector<8x8x8xf32>
    %109 = arith.truncf %108 : vector<8x8x8xf32> to vector<8x8x8xbf16>
    "tpu.trace_start"() <{level = 10 : i32, message = "bls,bsd->bld"}> : () -> ()
    %cst_32 = arith.constant dense<0.000000e+00> : vector<8x8x8xf32>
    %110 = tpu.matmul %109, %97, %cst_32 {dimension_numbers = #tpu.dot_dimension_numbers<[2], [1], [1], [2], [0, 0, 0, 1, 1, 2], [0], [0]>} : vector<8x8x8xbf16>, vector<8x8x8xbf16>, vector<8x8x8xf32> -> vector<8x8x8xf32>
    "tpu.trace_stop"() : () -> ()
    %111 = vector.shape_cast %110 : vector<8x8x8xf32> to vector<64x8xf32>
    %112 = arith.truncf %111 : vector<64x8xf32> to vector<64x8xbf16>
    %113 = vector.extract_strided_slice %1 {offsets = [24, 0], sizes = [8, 32], strides = [1, 1]} : vector<32x32xbf16> to vector<8x32xbf16>
    %cst_33 = arith.constant dense<0.000000e+00> : vector<64x32xf32>
    %114 = tpu.matmul %112, %113, %cst_33 {dimension_numbers = #tpu.dot_dimension_numbers<[1], [0], [0], [1], [0, 0, 1, 1], [], []>} : vector<64x8xbf16>, vector<8x32xbf16>, vector<64x32xf32> -> vector<64x32xf32>
    %115 = arith.addf %94, %114 : vector<64x32xf32>
    %116 = vector.broadcast %7 : vector<1x32xf32> to vector<64x32xf32>
    %117 = arith.addf %115, %116 : vector<64x32xf32>
    %118 = arith.addf %117, %14 : vector<64x32xf32>
    %cst_34 = arith.constant dense<0.000000e+00> : vector<64xf32>
    %119 = vector.multi_reduction <add>, %118, %cst_34 [1] : vector<64x32xf32> to vector<64xf32>
    %120 = vector.shape_cast %119 : vector<64xf32> to vector<64x1xf32>
    %cst_35 = arith.constant 3.200000e+01 : f32
    %121 = vector.broadcast %cst_35 : f32 to vector<64x1xf32>
    %122 = arith.divf %120, %121 : vector<64x1xf32>
    %123 = vector.broadcast %122 : vector<64x1xf32> to vector<64x32xf32>
    %124 = arith.subf %118, %123 : vector<64x32xf32>
    %125 = arith.mulf %124, %124 : vector<64x32xf32>
    %cst_36 = arith.constant dense<0.000000e+00> : vector<64xf32>
    %126 = vector.multi_reduction <add>, %125, %cst_36 [1] : vector<64x32xf32> to vector<64xf32>
    %127 = vector.shape_cast %126 : vector<64xf32> to vector<64x1xf32>
    %cst_37 = arith.constant 3.200000e+01 : f32
    %128 = vector.broadcast %cst_37 : f32 to vector<64x1xf32>
    %129 = arith.divf %127, %128 : vector<64x1xf32>
    %130 = vector.broadcast %122 : vector<64x1xf32> to vector<64x32xf32>
    %131 = arith.subf %118, %130 : vector<64x32xf32>
    %cst_38 = arith.constant 9.99999974E-6 : f32
    %132 = vector.broadcast %cst_38 : f32 to vector<64x1xf32>
    %133 = arith.addf %129, %132 : vector<64x1xf32>
    %134 = math.rsqrt %133 : vector<64x1xf32>
    %135 = vector.broadcast %134 : vector<64x1xf32> to vector<64x32xf32>
    %136 = arith.mulf %131, %135 : vector<64x32xf32>
    %137 = vector.broadcast %9 : vector<1x32xf32> to vector<64x32xf32>
    %138 = arith.mulf %136, %137 : vector<64x32xf32>
    %139 = vector.broadcast %10 : vector<1x32xf32> to vector<64x32xf32>
    %140 = arith.addf %138, %139 : vector<64x32xf32>
    %141 = arith.truncf %140 : vector<64x32xf32> to vector<64x32xbf16>
    %cst_39 = arith.constant dense<0.000000e+00> : vector<64x128xf32>
    %142 = tpu.matmul %141, %2, %cst_39 {dimension_numbers = #tpu.dot_dimension_numbers<[1], [0], [0], [1], [0, 0, 1, 1], [], []>} : vector<64x32xbf16>, vector<32x128xbf16>, vector<64x128xf32> -> vector<64x128xf32>
    %143 = vector.broadcast %5 : vector<1x128xf32> to vector<64x128xf32>
    %144 = arith.addf %142, %143 : vector<64x128xf32>
    %cst_40 = arith.constant 0.000000e+00 : f32
    %145 = vector.broadcast %cst_40 : f32 to vector<64x128xf32>
    %146 = arith.maximumf %144, %145 : vector<64x128xf32>
    %147 = arith.truncf %146 : vector<64x128xf32> to vector<64x128xbf16>
    %cst_41 = arith.constant dense<0.000000e+00> : vector<64x32xf32>
    %148 = tpu.matmul %147, %3, %cst_41 {dimension_numbers = #tpu.dot_dimension_numbers<[1], [0], [0], [1], [0, 0, 1, 1], [], []>} : vector<64x128xbf16>, vector<128x32xbf16>, vector<64x32xf32> -> vector<64x32xf32>
    %149 = vector.broadcast %8 : vector<1x32xf32> to vector<64x32xf32>
    %150 = arith.addf %148, %149 : vector<64x32xf32>
    %151 = arith.addf %140, %150 : vector<64x32xf32>
    %cst_42 = arith.constant dense<0.000000e+00> : vector<64xf32>
    %152 = vector.multi_reduction <add>, %151, %cst_42 [1] : vector<64x32xf32> to vector<64xf32>
    %153 = vector.shape_cast %152 : vector<64xf32> to vector<64x1xf32>
    %cst_43 = arith.constant 3.200000e+01 : f32
    %154 = vector.broadcast %cst_43 : f32 to vector<64x1xf32>
    %155 = arith.divf %153, %154 : vector<64x1xf32>
    %156 = vector.broadcast %155 : vector<64x1xf32> to vector<64x32xf32>
    %157 = arith.subf %151, %156 : vector<64x32xf32>
    %158 = arith.mulf %157, %157 : vector<64x32xf32>
    %cst_44 = arith.constant dense<0.000000e+00> : vector<64xf32>
    %159 = vector.multi_reduction <add>, %158, %cst_44 [1] : vector<64x32xf32> to vector<64xf32>
    %160 = vector.shape_cast %159 : vector<64xf32> to vector<64x1xf32>
    %cst_45 = arith.constant 3.200000e+01 : f32
    %161 = vector.broadcast %cst_45 : f32 to vector<64x1xf32>
    %162 = arith.divf %160, %161 : vector<64x1xf32>
    %163 = vector.broadcast %155 : vector<64x1xf32> to vector<64x32xf32>
    %164 = arith.subf %151, %163 : vector<64x32xf32>
    %cst_46 = arith.constant 9.99999974E-6 : f32
    %165 = vector.broadcast %cst_46 : f32 to vector<64x1xf32>
    %166 = arith.addf %162, %165 : vector<64x1xf32>
    %167 = math.rsqrt %166 : vector<64x1xf32>
    %168 = vector.broadcast %167 : vector<64x1xf32> to vector<64x32xf32>
    %169 = arith.mulf %164, %168 : vector<64x32xf32>
    %170 = vector.broadcast %11 : vector<1x32xf32> to vector<64x32xf32>
    %171 = arith.mulf %169, %170 : vector<64x32xf32>
    %172 = vector.broadcast %12 : vector<1x32xf32> to vector<64x32xf32>
    %173 = arith.addf %171, %172 : vector<64x32xf32>
    %174 = vector.shape_cast %173 : vector<64x32xf32> to vector<8x256xf32>
    %c0_47 = arith.constant 0 : index
    %c0_48 = arith.constant 0 : index
    %175 = vector.load %arg7[%c0_47, %c0_48] : memref<8x256xf32, #tpu.memory_space<vmem>>, vector<8x256xf32>
    tpu.vector_store %arg7[%c0_47, %c0_48], %174 {strides = array<i32>} : memref<8x256xf32, #tpu.memory_space<vmem>>, vector<8x256xf32>,
    return
  }
  func.func @transform_0(%arg0: i32) -> (i32, i32, i32) {
    %c0_i32 = arith.constant 0 : i32
    %c0_i32_0 = arith.constant 0 : i32
    %c0_i32_1 = arith.constant 0 : i32
    return %arg0, %c0_i32, %c0_i32_0 : i32, i32, i32
  }
  func.func @transform_1(%arg0: i32) -> (i32, i32, i32) {
    %c0_i32 = arith.constant 0 : i32
    %c0_i32_0 = arith.constant 0 : i32
    %c0_i32_1 = arith.constant 0 : i32
    return %arg0, %c0_i32, %c0_i32_0 : i32, i32, i32
  }
  func.func @transform_2(%arg0: i32) -> (i32, i32) {
    %c0_i32 = arith.constant 0 : i32
    %c0_i32_0 = arith.constant 0 : i32
    %c0_i32_1 = arith.constant 0 : i32
    return %c0_i32, %c0_i32_0 : i32, i32
  }
  func.func @transform_3(%arg0: i32) -> (i32, i32) {
    %c0_i32 = arith.constant 0 : i32
    %c0_i32_0 = arith.constant 0 : i32
    %c0_i32_1 = arith.constant 0 : i32
    return %c0_i32, %c0_i32_0 : i32, i32
  }
  func.func @transform_4(%arg0: i32) -> (i32, i32) {
    %c0_i32 = arith.constant 0 : i32
    %c0_i32_0 = arith.constant 0 : i32
    %c0_i32_1 = arith.constant 0 : i32
    return %c0_i32, %c0_i32_0 : i32, i32
  }
  func.func @transform_5(%arg0: i32) -> (i32, i32) {
    %c0_i32 = arith.constant 0 : i32
    %c0_i32_0 = arith.constant 0 : i32
    %c0_i32_1 = arith.constant 0 : i32
    return %c0_i32, %c0_i32_0 : i32, i32
  }
  func.func @transform_6(%arg0: i32) -> (i32, i32) {
    %c0_i32 = arith.constant 0 : i32
    %c0_i32_0 = arith.constant 0 : i32
    return %arg0, %c0_i32 : i32, i32
  }
}

module attributes {stable_mosaic.version = 11 : i64} {
  func.func @_stt_block_kernel(%arg0: i32, %arg1: memref<8x8x32xf32, #tpu.memory_space<vmem>>, %arg2: memref<8x8x32xf32, #tpu.memory_space<vmem>>, %arg3: memref<32x256xbf16, #tpu.memory_space<vmem>>, %arg4: memref<128x32xbf16, #tpu.memory_space<vmem>>, %arg5: memref<2x128xf32, #tpu.memory_space<vmem>>, %arg6: memref<8x32xf32, #tpu.memory_space<vmem>>, %arg7: memref<8x8x32xf32, #tpu.memory_space<vmem>>) attributes {dimension_semantics = [#tpu.dimension_semantics<parallel>], iteration_bounds = array<i64: 1>, scalar_prefetch = 0 : i64, scratch_operands = 0 : i64, tpu.core_type = #tpu.core_type<tc>, window_params = [{transform_indices = @transform_0, window_bounds = array<i64: 8, 8, 32>}, {transform_indices = @transform_1, window_bounds = array<i64: 8, 8, 32>}, {pipeline_mode = #tpu.pipeline_mode<synchronous>, transform_indices = @transform_2, window_bounds = array<i64: 32, 256>}, {pipeline_mode = #tpu.pipeline_mode<synchronous>, transform_indices = @transform_3, window_bounds = array<i64: 128, 32>}, {pipeline_mode = #tpu.pipeline_mode<synchronous>, transform_indices = @transform_4, window_bounds = array<i64: 2, 128>}, {pipeline_mode = #tpu.pipeline_mode<synchronous>, transform_indices = @transform_5, window_bounds = array<i64: 8, 32>}, {transform_indices = @transform_6, window_bounds = array<i64: 8, 8, 32>}]} {
    %c0 = arith.constant 0 : index
    %c0_0 = arith.constant 0 : index
    %0 = vector.load %arg3[%c0, %c0_0] : memref<32x256xbf16, #tpu.memory_space<vmem>>, vector<32x256xbf16>
    %1 = vector.extract_strided_slice %0 {offsets = [0, 96], sizes = [32, 32], strides = [1, 1]} : vector<32x256xbf16> to vector<32x32xbf16>
    %2 = vector.extract_strided_slice %0 {offsets = [0, 128], sizes = [32, 128], strides = [1, 1]} : vector<32x256xbf16> to vector<32x128xbf16>
    %c0_1 = arith.constant 0 : index
    %c0_2 = arith.constant 0 : index
    %3 = vector.load %arg4[%c0_1, %c0_2] : memref<128x32xbf16, #tpu.memory_space<vmem>>, vector<128x32xbf16>
    %c0_3 = arith.constant 0 : index
    %c0_4 = arith.constant 0 : index
    %4 = vector.load %arg5[%c0_3, %c0_4] : memref<2x128xf32, #tpu.memory_space<vmem>>, vector<2x128xf32>
    %5 = vector.extract_strided_slice %4 {offsets = [1, 0], sizes = [1, 128], strides = [1, 1]} : vector<2x128xf32> to vector<1x128xf32>
    %c0_5 = arith.constant 0 : index
    %c0_6 = arith.constant 0 : index
    %6 = vector.load %arg6[%c0_5, %c0_6] : memref<8x32xf32, #tpu.memory_space<vmem>>, vector<8x32xf32>
    %7 = vector.extract_strided_slice %6 {offsets = [0, 0], sizes = [1, 32], strides = [1, 1]} : vector<8x32xf32> to vector<1x32xf32>
    %8 = vector.extract_strided_slice %6 {offsets = [1, 0], sizes = [1, 32], strides = [1, 1]} : vector<8x32xf32> to vector<1x32xf32>
    %9 = vector.extract_strided_slice %6 {offsets = [2, 0], sizes = [1, 32], strides = [1, 1]} : vector<8x32xf32> to vector<1x32xf32>
    %10 = vector.extract_strided_slice %6 {offsets = [3, 0], sizes = [1, 32], strides = [1, 1]} : vector<8x32xf32> to vector<1x32xf32>
    %11 = vector.extract_strided_slice %6 {offsets = [4, 0], sizes = [1, 32], strides = [1, 1]} : vector<8x32xf32> to vector<1x32xf32>
    %12 = vector.extract_strided_slice %6 {offsets = [5, 0], sizes = [1, 32], strides = [1, 1]} : vector<8x32xf32> to vector<1x32xf32>
    %c0_7 = arith.constant 0 : index
    %c0_8 = arith.constant 0 : index
    %c0_9 = arith.constant 0 : index
    %13 = vector.load %arg1[%c0_7, %c0_8, %c0_9] : memref<8x8x32xf32, #tpu.memory_space<vmem>>, vector<8x8x32xf32>
    %14 = vector.shape_cast %13 : vector<8x8x32xf32> to vector<64x32xf32>
    %c0_10 = arith.constant 0 : index
    %c0_11 = arith.constant 0 : index
    %c0_12 = arith.constant 0 : index
    %15 = vector.load %arg2[%c0_10, %c0_11, %c0_12] : memref<8x8x32xf32, #tpu.memory_space<vmem>>, vector<8x8x32xf32>
    %16 = vector.shape_cast %15 : vector<8x8x32xf32> to vector<64x32xf32>
    %17 = arith.truncf %14 : vector<64x32xf32> to vector<64x32xbf16>
    %18 = vector.extract_strided_slice %0 {offsets = [0, 0], sizes = [32, 32], strides = [1, 1]} : vector<32x256xbf16> to vector<32x32xbf16>
    %cst = arith.constant dense<0.000000e+00> : vector<64x32xf32>
    %19 = tpu.matmul %17, %18, %cst {dimension_numbers = #tpu.dot_dimension_numbers<[1], [0], [0], [1], [0, 0, 1, 1], [], []>} : vector<64x32xbf16>, vector<32x32xbf16>, vector<64x32xf32> -> vector<64x32xf32>
    %20 = vector.extract_strided_slice %4 {offsets = [0, 0], sizes = [1, 32], strides = [1, 1]} : vector<2x128xf32> to vector<1x32xf32>
    %21 = vector.broadcast %20 : vector<1x32xf32> to vector<64x32xf32>
    %22 = arith.addf %19, %21 : vector<64x32xf32>
    %23 = arith.truncf %16 : vector<64x32xf32> to vector<64x32xbf16>
    %24 = vector.extract_strided_slice %0 {offsets = [0, 32], sizes = [32, 64], strides = [1, 1]} : vector<32x256xbf16> to vector<32x64xbf16>
    %cst_13 = arith.constant dense<0.000000e+00> : vector<64x64xf32>
    %25 = tpu.matmul %23, %24, %cst_13 {dimension_numbers = #tpu.dot_dimension_numbers<[1], [0], [0], [1], [0, 0, 1, 1], [], []>} : vector<64x32xbf16>, vector<32x64xbf16>, vector<64x64xf32> -> vector<64x64xf32>
    %26 = vector.extract_strided_slice %4 {offsets = [0, 32], sizes = [1, 64], strides = [1, 1]} : vector<2x128xf32> to vector<1x64xf32>
    %27 = vector.broadcast %26 : vector<1x64xf32> to vector<64x64xf32>
    %28 = arith.addf %25, %27 : vector<64x64xf32>
    %29 = vector.shape_cast %22 : vector<64x32xf32> to vector<8x8x32xf32>
    %30 = arith.truncf %29 : vector<8x8x32xf32> to vector<8x8x32xbf16>
    %31 = vector.shape_cast %28 : vector<64x64xf32> to vector<8x8x64xf32>
    %32 = arith.truncf %31 : vector<8x8x64xf32> to vector<8x8x64xbf16>
    %33 = vector.extract_strided_slice %30 {offsets = [0, 0, 0], sizes = [8, 8, 8], strides = [1, 1, 1]} : vector<8x8x32xbf16> to vector<8x8x8xbf16>
    %34 = vector.extract_strided_slice %32 {offsets = [0, 0, 0], sizes = [8, 8, 8], strides = [1, 1, 1]} : vector<8x8x64xbf16> to vector<8x8x8xbf16>
    %35 = vector.extract_strided_slice %32 {offsets = [0, 0, 32], sizes = [8, 8, 8], strides = [1, 1, 1]} : vector<8x8x64xbf16> to vector<8x8x8xbf16>
    "tpu.trace_start"() <{level = 10 : i32, message = "bld,bsd->bls"}> : () -> ()
    %cst_14 = arith.constant dense<0.000000e+00> : vector<8x8x8xf32>
    %36 = tpu.matmul %33, %34, %cst_14 {dimension_numbers = #tpu.dot_dimension_numbers<[2], [2], [1], [1], [0, 0, 0, 1, 1, 1], [0], [0]>} : vector<8x8x8xbf16>, vector<8x8x8xbf16>, vector<8x8x8xf32> -> vector<8x8x8xf32>
    "tpu.trace_stop"() : () -> ()
    %cst_15 = arith.constant dense<0xFF800000> : vector<8x8xf32>
    %37 = vector.multi_reduction <maximumf>, %36, %cst_15 [2] : vector<8x8x8xf32> to vector<8x8xf32>
    %38 = vector.shape_cast %37 : vector<8x8xf32> to vector<8x8x1xf32>
    %39 = vector.broadcast %38 : vector<8x8x1xf32> to vector<8x8x8xf32>
    %40 = arith.subf %36, %39 : vector<8x8x8xf32>
    %41 = math.exp %40 : vector<8x8x8xf32>
    %cst_16 = arith.constant dense<0.000000e+00> : vector<8x8xf32>
    %42 = vector.multi_reduction <add>, %41, %cst_16 [2] : vector<8x8x8xf32> to vector<8x8xf32>
    %43 = vector.shape_cast %42 : vector<8x8xf32> to vector<8x8x1xf32>
    %44 = tpu.reciprocal %43 {approx = true} : vector<8x8x1xf32> -> vector<8x8x1xf32>
    %45 = vector.broadcast %44 : vector<8x8x1xf32> to vector<8x8x8xf32>
    %46 = arith.mulf %41, %45 : vector<8x8x8xf32>
    %47 = arith.truncf %46 : vector<8x8x8xf32> to vector<8x8x8xbf16>
    "tpu.trace_start"() <{level = 10 : i32, message = "bls,bsd->bld"}> : () -> ()
    %cst_17 = arith.constant dense<0.000000e+00> : vector<8x8x8xf32>
    %48 = tpu.matmul %47, %35, %cst_17 {dimension_numbers = #tpu.dot_dimension_numbers<[2], [1], [1], [2], [0, 0, 0, 1, 1, 2], [0], [0]>} : vector<8x8x8xbf16>, vector<8x8x8xbf16>, vector<8x8x8xf32> -> vector<8x8x8xf32>
    "tpu.trace_stop"() : () -> ()
    %49 = vector.shape_cast %48 : vector<8x8x8xf32> to vector<64x8xf32>
    %50 = arith.truncf %49 : vector<64x8xf32> to vector<64x8xbf16>
    %51 = vector.extract_strided_slice %1 {offsets = [0, 0], sizes = [8, 32], strides = [1, 1]} : vector<32x32xbf16> to vector<8x32xbf16>
    %cst_18 = arith.constant dense<0.000000e+00> : vector<64x32xf32>
    %52 = tpu.matmul %50, %51, %cst_18 {dimension_numbers = #tpu.dot_dimension_numbers<[1], [0], [0], [1], [0, 0, 1, 1], [], []>} : vector<64x8xbf16>, vector<8x32xbf16>, vector<64x32xf32> -> vector<64x32xf32>
    %53 = vector.extract_strided_slice %30 {offsets = [0, 0, 8], sizes = [8, 8, 8], strides = [1, 1, 1]} : vector<8x8x32xbf16> to vector<8x8x8xbf16>
    %54 = vector.extract_strided_slice %32 {offsets = [0, 0, 8], sizes = [8, 8, 8], strides = [1, 1, 1]} : vector<8x8x64xbf16> to vector<8x8x8xbf16>
    %55 = vector.extract_strided_slice %32 {offsets = [0, 0, 40], sizes = [8, 8, 8], strides = [1, 1, 1]} : vector<8x8x64xbf16> to vector<8x8x8xbf16>
    "tpu.trace_start"() <{level = 10 : i32, message = "bld,bsd->bls"}> : () -> ()
    %cst_19 = arith.constant dense<0.000000e+00> : vector<8x8x8xf32>
    %56 = tpu.matmul %53, %54, %cst_19 {dimension_numbers = #tpu.dot_dimension_numbers<[2], [2], [1], [1], [0, 0, 0, 1, 1, 1], [0], [0]>} : vector<8x8x8xbf16>, vector<8x8x8xbf16>, vector<8x8x8xf32> -> vector<8x8x8xf32>
    "tpu.trace_stop"() : () -> ()
    %cst_20 = arith.constant dense<0xFF800000> : vector<8x8xf32>
    %57 = vector.multi_reduction <maximumf>, %56, %cst_20 [2] : vector<8x8x8xf32> to vector<8x8xf32>
    %58 = vector.shape_cast %57 : vector<8x8xf32> to vector<8x8x1xf32>
    %59 = vector.broadcast %58 : vector<8x8x1xf32> to vector<8x8x8xf32>
    %60 = arith.subf %56, %59 : vector<8x8x8xf32>
    %61 = math.exp %60 : vector<8x8x8xf32>
    %cst_21 = arith.constant dense<0.000000e+00> : vector<8x8xf32>
    %62 = vector.multi_reduction <add>, %61, %cst_21 [2] : vector<8x8x8xf32> to vector<8x8xf32>
    %63 = vector.shape_cast %62 : vector<8x8xf32> to vector<8x8x1xf32>
    %64 = tpu.reciprocal %63 {approx = true} : vector<8x8x1xf32> -> vector<8x8x1xf32>
    %65 = vector.broadcast %64 : vector<8x8x1xf32> to vector<8x8x8xf32>
    %66 = arith.mulf %61, %65 : vector<8x8x8xf32>
    %67 = arith.truncf %66 : vector<8x8x8xf32> to vector<8x8x8xbf16>
    "tpu.trace_start"() <{level = 10 : i32, message = "bls,bsd->bld"}> : () -> ()
    %cst_22 = arith.constant dense<0.000000e+00> : vector<8x8x8xf32>
    %68 = tpu.matmul %67, %55, %cst_22 {dimension_numbers = #tpu.dot_dimension_numbers<[2], [1], [1], [2], [0, 0, 0, 1, 1, 2], [0], [0]>} : vector<8x8x8xbf16>, vector<8x8x8xbf16>, vector<8x8x8xf32> -> vector<8x8x8xf32>
    "tpu.trace_stop"() : () -> ()
    %69 = vector.shape_cast %68 : vector<8x8x8xf32> to vector<64x8xf32>
    %70 = arith.truncf %69 : vector<64x8xf32> to vector<64x8xbf16>
    %71 = vector.extract_strided_slice %1 {offsets = [8, 0], sizes = [8, 32], strides = [1, 1]} : vector<32x32xbf16> to vector<8x32xbf16>
    %cst_23 = arith.constant dense<0.000000e+00> : vector<64x32xf32>
    %72 = tpu.matmul %70, %71, %cst_23 {dimension_numbers = #tpu.dot_dimension_numbers<[1], [0], [0], [1], [0, 0, 1, 1], [], []>} : vector<64x8xbf16>, vector<8x32xbf16>, vector<64x32xf32> -> vector<64x32xf32>
    %73 = arith.addf %52, %72 : vector<64x32xf32>
    %74 = vector.extract_strided_slice %30 {offsets = [0, 0, 16], sizes = [8, 8, 8], strides = [1, 1, 1]} : vector<8x8x32xbf16> to vector<8x8x8xbf16>
    %75 = vector.extract_strided_slice %32 {offsets = [0, 0, 16], sizes = [8, 8, 8], strides = [1, 1, 1]} : vector<8x8x64xbf16> to vector<8x8x8xbf16>
    %76 = vector.extract_strided_slice %32 {offsets = [0, 0, 48], sizes = [8, 8, 8], strides = [1, 1, 1]} : vector<8x8x64xbf16> to vector<8x8x8xbf16>
    "tpu.trace_start"() <{level = 10 : i32, message = "bld,bsd->bls"}> : () -> ()
    %cst_24 = arith.constant dense<0.000000e+00> : vector<8x8x8xf32>
    %77 = tpu.matmul %74, %75, %cst_24 {dimension_numbers = #tpu.dot_dimension_numbers<[2], [2], [1], [1], [0, 0, 0, 1, 1, 1], [0], [0]>} : vector<8x8x8xbf16>, vector<8x8x8xbf16>, vector<8x8x8xf32> -> vector<8x8x8xf32>
    "tpu.trace_stop"() : () -> ()
    %cst_25 = arith.constant dense<0xFF800000> : vector<8x8xf32>
    %78 = vector.multi_reduction <maximumf>, %77, %cst_25 [2] : vector<8x8x8xf32> to vector<8x8xf32>
    %79 = vector.shape_cast %78 : vector<8x8xf32> to vector<8x8x1xf32>
    %80 = vector.broadcast %79 : vector<8x8x1xf32> to vector<8x8x8xf32>
    %81 = arith.subf %77, %80 : vector<8x8x8xf32>
    %82 = math.exp %81 : vector<8x8x8xf32>
    %cst_26 = arith.constant dense<0.000000e+00> : vector<8x8xf32>
    %83 = vector.multi_reduction <add>, %82, %cst_26 [2] : vector<8x8x8xf32> to vector<8x8xf32>
    %84 = vector.shape_cast %83 : vector<8x8xf32> to vector<8x8x1xf32>
    %85 = tpu.reciprocal %84 {approx = true} : vector<8x8x1xf32> -> vector<8x8x1xf32>
    %86 = vector.broadcast %85 : vector<8x8x1xf32> to vector<8x8x8xf32>
    %87 = arith.mulf %82, %86 : vector<8x8x8xf32>
    %88 = arith.truncf %87 : vector<8x8x8xf32> to vector<8x8x8xbf16>
    "tpu.trace_start"() <{level = 10 : i32, message = "bls,bsd->bld"}> : () -> ()
    %cst_27 = arith.constant dense<0.000000e+00> : vector<8x8x8xf32>
    %89 = tpu.matmul %88, %76, %cst_27 {dimension_numbers = #tpu.dot_dimension_numbers<[2], [1], [1], [2], [0, 0, 0, 1, 1, 2], [0], [0]>} : vector<8x8x8xbf16>, vector<8x8x8xbf16>, vector<8x8x8xf32> -> vector<8x8x8xf32>
    "tpu.trace_stop"() : () -> ()
    %90 = vector.shape_cast %89 : vector<8x8x8xf32> to vector<64x8xf32>
    %91 = arith.truncf %90 : vector<64x8xf32> to vector<64x8xbf16>
    %92 = vector.extract_strided_slice %1 {offsets = [16, 0], sizes = [8, 32], strides = [1, 1]} : vector<32x32xbf16> to vector<8x32xbf16>
    %cst_28 = arith.constant dense<0.000000e+00> : vector<64x32xf32>
    %93 = tpu.matmul %91, %92, %cst_28 {dimension_numbers = #tpu.dot_dimension_numbers<[1], [0], [0], [1], [0, 0, 1, 1], [], []>} : vector<64x8xbf16>, vector<8x32xbf16>, vector<64x32xf32> -> vector<64x32xf32>
    %94 = arith.addf %73, %93 : vector<64x32xf32>
    %95 = vector.extract_strided_slice %30 {offsets = [0, 0, 24], sizes = [8, 8, 8], strides = [1, 1, 1]} : vector<8x8x32xbf16> to vector<8x8x8xbf16>
    %96 = vector.extract_strided_slice %32 {offsets = [0, 0, 24], sizes = [8, 8, 8], strides = [1, 1, 1]} : vector<8x8x64xbf16> to vector<8x8x8xbf16>
    %97 = vector.extract_strided_slice %32 {offsets = [0, 0, 56], sizes = [8, 8, 8], strides = [1, 1, 1]} : vector<8x8x64xbf16> to vector<8x8x8xbf16>
    "tpu.trace_start"() <{level = 10 : i32, message = "bld,bsd->bls"}> : () -> ()
    %cst_29 = arith.constant dense<0.000000e+00> : vector<8x8x8xf32>
    %98 = tpu.matmul %95, %96, %cst_29 {dimension_numbers = #tpu.dot_dimension_numbers<[2], [2], [1], [1], [0, 0, 0, 1, 1, 1], [0], [0]>} : vector<8x8x8xbf16>, vector<8x8x8xbf16>, vector<8x8x8xf32> -> vector<8x8x8xf32>
    "tpu.trace_stop"() : () -> ()
    %cst_30 = arith.constant dense<0xFF800000> : vector<8x8xf32>
    %99 = vector.multi_reduction <maximumf>, %98, %cst_30 [2] : vector<8x8x8xf32> to vector<8x8xf32>
    %100 = vector.shape_cast %99 : vector<8x8xf32> to vector<8x8x1xf32>
    %101 = vector.broadcast %100 : vector<8x8x1xf32> to vector<8x8x8xf32>
    %102 = arith.subf %98, %101 : vector<8x8x8xf32>
    %103 = math.exp %102 : vector<8x8x8xf32>
    %cst_31 = arith.constant dense<0.000000e+00> : vector<8x8xf32>
    %104 = vector.multi_reduction <add>, %103, %cst_31 [2] : vector<8x8x8xf32> to vector<8x8xf32>
    %105 = vector.shape_cast %104 : vector<8x8xf32> to vector<8x8x1xf32>
    %106 = tpu.reciprocal %105 {approx = true} : vector<8x8x1xf32> -> vector<8x8x1xf32>
    %107 = vector.broadcast %106 : vector<8x8x1xf32> to vector<8x8x8xf32>
    %108 = arith.mulf %103, %107 : vector<8x8x8xf32>
    %109 = arith.truncf %108 : vector<8x8x8xf32> to vector<8x8x8xbf16>
    "tpu.trace_start"() <{level = 10 : i32, message = "bls,bsd->bld"}> : () -> ()
    %cst_32 = arith.constant dense<0.000000e+00> : vector<8x8x8xf32>
    %110 = tpu.matmul %109, %97, %cst_32 {dimension_numbers = #tpu.dot_dimension_numbers<[2], [1], [1], [2], [0, 0, 0, 1, 1, 2], [0], [0]>} : vector<8x8x8xbf16>, vector<8x8x8xbf16>, vector<8x8x8xf32> -> vector<8x8x8xf32>
    "tpu.trace_stop"() : () -> ()
    %111 = vector.shape_cast %110 : vector<8x8x8xf32> to vector<64x8xf32>
    %112 = arith.truncf %111 : vector<64x8xf32> to vector<64x8xbf16>
    %113 = vector.extract_strided_slice %1 {offsets = [24, 0], sizes = [8, 32], strides = [1, 1]} : vector<32x32xbf16> to vector<8x32xbf16>
    %cst_33 = arith.constant dense<0.000000e+00> : vector<64x32xf32>
    %114 = tpu.matmul %112, %113, %cst_33 {dimension_numbers = #tpu.dot_dimension_numbers<[1], [0], [0], [1], [0, 0, 1, 1], [], []>} : vector<64x8xbf16>, vector<8x32xbf16>, vector<64x32xf32> -> vector<64x32xf32>
    %115 = arith.addf %94, %114 : vector<64x32xf32>
    %116 = vector.broadcast %7 : vector<1x32xf32> to vector<64x32xf32>
    %117 = arith.addf %115, %116 : vector<64x32xf32>
    %118 = arith.addf %117, %14 : vector<64x32xf32>
    %cst_34 = arith.constant dense<0.000000e+00> : vector<64xf32>
    %119 = vector.multi_reduction <add>, %118, %cst_34 [1] : vector<64x32xf32> to vector<64xf32>
    %120 = vector.shape_cast %119 : vector<64xf32> to vector<64x1xf32>
    %cst_35 = arith.constant 3.200000e+01 : f32
    %121 = vector.broadcast %cst_35 : f32 to vector<64x1xf32>
    %122 = arith.divf %120, %121 : vector<64x1xf32>
    %123 = vector.broadcast %122 : vector<64x1xf32> to vector<64x32xf32>
    %124 = arith.subf %118, %123 : vector<64x32xf32>
    %125 = arith.mulf %124, %124 : vector<64x32xf32>
    %cst_36 = arith.constant dense<0.000000e+00> : vector<64xf32>
    %126 = vector.multi_reduction <add>, %125, %cst_36 [1] : vector<64x32xf32> to vector<64xf32>
    %127 = vector.shape_cast %126 : vector<64xf32> to vector<64x1xf32>
    %cst_37 = arith.constant 3.200000e+01 : f32
    %128 = vector.broadcast %cst_37 : f32 to vector<64x1xf32>
    %129 = arith.divf %127, %128 : vector<64x1xf32>
    %130 = vector.broadcast %122 : vector<64x1xf32> to vector<64x32xf32>
    %131 = arith.subf %118, %130 : vector<64x32xf32>
    %cst_38 = arith.constant 9.99999974E-6 : f32
    %132 = vector.broadcast %cst_38 : f32 to vector<64x1xf32>
    %133 = arith.addf %129, %132 : vector<64x1xf32>
    %134 = math.rsqrt %133 : vector<64x1xf32>
    %135 = vector.broadcast %134 : vector<64x1xf32> to vector<64x32xf32>
    %136 = arith.mulf %131, %135 : vector<64x32xf32>
    %137 = vector.broadcast %9 : vector<1x32xf32> to vector<64x32xf32>
    %138 = arith.mulf %136, %137 : vector<64x32xf32>
    %139 = vector.broadcast %10 : vector<1x32xf32> to vector<64x32xf32>
    %140 = arith.addf %138, %139 : vector<64x32xf32>
    %141 = arith.truncf %140 : vector<64x32xf32> to vector<64x32xbf16>
    %cst_39 = arith.constant dense<0.000000e+00> : vector<64x128xf32>
    %142 = tpu.matmul %141, %2, %cst_39 {dimension_numbers = #tpu.dot_dimension_numbers<[1], [0], [0], [1], [0, 0, 1, 1], [], []>} : vector<64x32xbf16>, vector<32x128xbf16>, vector<64x128xf32> -> vector<64x128xf32>
    %143 = vector.broadcast %5 : vector<1x128xf32> to vector<64x128xf32>
    %144 = arith.addf %142, %143 : vector<64x128xf32>
    %cst_40 = arith.constant 0.000000e+00 : f32
    %145 = vector.broadcast %cst_40 : f32 to vector<64x128xf32>
    %146 = arith.maximumf %144, %145 : vector<64x128xf32>
    %147 = arith.truncf %146 : vector<64x128xf32> to vector<64x128xbf16>
    %cst_41 = arith.constant dense<0.000000e+00> : vector<64x32xf32>
    %148 = tpu.matmul %147, %3, %cst_41 {dimension_numbers = #tpu.dot_dimension_numbers<[1], [0], [0], [1], [0, 0, 1, 1], [], []>} : vector<64x128xbf16>, vector<128x32xbf16>, vector<64x32xf32> -> vector<64x32xf32>
    %149 = vector.broadcast %8 : vector<1x32xf32> to vector<64x32xf32>
    %150 = arith.addf %148, %149 : vector<64x32xf32>
    %151 = arith.addf %140, %150 : vector<64x32xf32>
    %cst_42 = arith.constant dense<0.000000e+00> : vector<64xf32>
    %152 = vector.multi_reduction <add>, %151, %cst_42 [1] : vector<64x32xf32> to vector<64xf32>
    %153 = vector.shape_cast %152 : vector<64xf32> to vector<64x1xf32>
    %cst_43 = arith.constant 3.200000e+01 : f32
    %154 = vector.broadcast %cst_43 : f32 to vector<64x1xf32>
    %155 = arith.divf %153, %154 : vector<64x1xf32>
    %156 = vector.broadcast %155 : vector<64x1xf32> to vector<64x32xf32>
    %157 = arith.subf %151, %156 : vector<64x32xf32>
    %158 = arith.mulf %157, %157 : vector<64x32xf32>
    %cst_44 = arith.constant dense<0.000000e+00> : vector<64xf32>
    %159 = vector.multi_reduction <add>, %158, %cst_44 [1] : vector<64x32xf32> to vector<64xf32>
    %160 = vector.shape_cast %159 : vector<64xf32> to vector<64x1xf32>
    %cst_45 = arith.constant 3.200000e+01 : f32
    %161 = vector.broadcast %cst_45 : f32 to vector<64x1xf32>
    %162 = arith.divf %160, %161 : vector<64x1xf32>
    %163 = vector.broadcast %155 : vector<64x1xf32> to vector<64x32xf32>
    %164 = arith.subf %151, %163 : vector<64x32xf32>
    %cst_46 = arith.constant 9.99999974E-6 : f32
    %165 = vector.broadcast %cst_46 : f32 to vector<64x1xf32>
    %166 = arith.addf %162, %165 : vector<64x1xf32>
    %167 = math.rsqrt %166 : vector<64x1xf32>
    %168 = vector.broadcast %167 : vector<64x1xf32> to vector<64x32xf32>
    %169 = arith.mulf %164, %168 : vector<64x32xf32>
    %170 = vector.broadcast %11 : vector<1x32xf32> to vector<64x32xf32>
    %171 = arith.mulf %169, %170 : vector<64x32xf32>
    %172 = vector.broadcast %12 : vector<1x32xf32> to vector<64x32xf32>
    %173 = arith.addf %171, %172 : vector<64x32xf32>
    %174 = vector.shape_cast %173 : vector<64x32xf32> to vector<8x8x32xf32>
    %c0_47 = arith.constant 0 : index
    %c0_48 = arith.constant 0 : index
    %c0_49 = arith.constant 0 : index
    %175 = vector.load %arg7[%c0_47, %c0_48, %c0_49] : memref<8x8x32xf32, #tpu.memory_space<vmem>>, vector<8x8x32xf32>
    tpu.vector_store %arg7[%c0_47, %c0_48, %c0_49], %174 {strides = array<i32>} : memref<8x8x32xf32, #tpu.memory_space<vmem>>, vector<8x8x32xf32>,
    return
  }
  func.func @transform_0(%arg0: i32) -> (i32, i32, i32) {
    %c0_i32 = arith.constant 0 : i32
    %c0_i32_0 = arith.constant 0 : i32
    %c0_i32_1 = arith.constant 0 : i32
    return %arg0, %c0_i32, %c0_i32_0 : i32, i32, i32
  }
  func.func @transform_1(%arg0: i32) -> (i32, i32, i32) {
    %c0_i32 = arith.constant 0 : i32
    %c0_i32_0 = arith.constant 0 : i32
    %c0_i32_1 = arith.constant 0 : i32
    return %arg0, %c0_i32, %c0_i32_0 : i32, i32, i32
  }
  func.func @transform_2(%arg0: i32) -> (i32, i32) {
    %c0_i32 = arith.constant 0 : i32
    %c0_i32_0 = arith.constant 0 : i32
    %c0_i32_1 = arith.constant 0 : i32
    return %c0_i32, %c0_i32_0 : i32, i32
  }
  func.func @transform_3(%arg0: i32) -> (i32, i32) {
    %c0_i32 = arith.constant 0 : i32
    %c0_i32_0 = arith.constant 0 : i32
    %c0_i32_1 = arith.constant 0 : i32
    return %c0_i32, %c0_i32_0 : i32, i32
  }
  func.func @transform_4(%arg0: i32) -> (i32, i32) {
    %c0_i32 = arith.constant 0 : i32
    %c0_i32_0 = arith.constant 0 : i32
    %c0_i32_1 = arith.constant 0 : i32
    return %c0_i32, %c0_i32_0 : i32, i32
  }
  func.func @transform_5(%arg0: i32) -> (i32, i32) {
    %c0_i32 = arith.constant 0 : i32
    %c0_i32_0 = arith.constant 0 : i32
    %c0_i32_1 = arith.constant 0 : i32
    return %c0_i32, %c0_i32_0 : i32, i32
  }
  func.func @transform_6(%arg0: i32) -> (i32, i32, i32) {
    %c0_i32 = arith.constant 0 : i32
    %c0_i32_0 = arith.constant 0 : i32
    %c0_i32_1 = arith.constant 0 : i32
    return %arg0, %c0_i32, %c0_i32_0 : i32, i32, i32
  }
}

</mosaic_0001>

<bundles_post_ra>
// kernel: tpu_custom_call.1
= control target key start
LH: loop header
LB: loop body
LE: loop exit
PB: predicated region body
PF: predicated region fallthrough
CT: control target
= control target key end

     0   :  { %11 = vsyncpa [#allocation3], 0  ;;  %s6964_s0 = inlined_call_operand.vmem [shape: f32[8,8,32], index: 0, kind: input, shape index: {}]   ;;  %s6965_s1 = inlined_call_operand.hbm [shape: f32[8,8,32], index: 1, kind: input, shape index: {}]   ;;  %s6966_s2 = inlined_call_operand.hbm [shape: bf16[32,256], index: 2, kind: input, shape index: {}]   ;;  %s6967_s3 = inlined_call_operand.vmem [shape: bf16[128,32], index: 3, kind: input, shape index: {}]   ;;  %s6968_s4 = inlined_call_operand.vmem [shape: f32[2,128], index: 4, kind: input, shape index: {}]   ;;  %s6969_s5 = inlined_call_operand.vmem [shape: f32[8,32], index: 5, kind: input, shape index: {}]   ;;  %s6970_s6 = inlined_call_operand.hbm [shape: f32[8,8,32], index: 6, kind: output, shape index: {}]  }
   0x1   :  { %12 = vsyncpa [#allocation6], 0 }
   0x2   :  { %13 = vsyncpa [#allocation4], 0  ;;  %s5746_s21 = smov [#allocation2]  }
   0x3   :  { %s21_s22 = sshll.u32 %s5746_s21, 4  ;;  %s22_s22 = int_to_ptr.vmem [resolvable:$true] %s21_s22 }
   0x4   :  { %s5688_s23 = scalar_lea.vmem %s22_s22, 1024  ;;  %p5693_p1 = scmp.lt.s32.totalorder %s22_s22, %s22_s22 }
   0x5   :  { %p5689_p0 = scmp.ne.s32.totalorder %s22_s22, %s5688_s23  ;;  %p5694_p2 = scmp.lt.s32.totalorder %s5688_s23, %s5688_s23 }
   0x7   :  { %p5695_p3 = por %p5694_p2, %p5693_p1 }
   0x9   :  { %p5696_p4 = pnand %p5695_p3, %p5689_p0 }
   0xb   :  { %5699 = shalt.err (!%p5696_p4)
}
   0xc   :  { %s5747_s24 = smov 128   ;;  %s5748_s25 = smov 8  }
   0xd   :  { %27 = dma.hbm_to_vmem [thread:$0]  %s6965_s1, 1024, %s22_s22, [#allocation3], %s5747_s24, %s5747_s24, %s5748_s25  }
   0xe   :  { %s5749_s28 = smov [#allocation5]  }
   0xf   :  { %s33_s29 = sshll.u32 %s5749_s28, 4  ;;  %s34_s29 = int_to_ptr.vmem [resolvable:$true] %s33_s29 }
  0x10   :  { %s5708_s30 = scalar_lea.vmem %s34_s29, 512  ;;  %p5713_p6 = scmp.lt.s32.totalorder %s34_s29, %s34_s29 }
  0x11   :  { %p5709_p5 = scmp.ne.s32.totalorder %s34_s29, %s5708_s30  ;;  %p5714_p7 = scmp.lt.s32.totalorder %s5708_s30, %s5708_s30 }
  0x13   :  { %p5715_p8 = por %p5714_p7, %p5713_p6 }
  0x15   :  { %p5716_p9 = pnand %p5715_p8, %p5709_p5 }
  0x17   :  { %5719 = shalt.err (!%p5716_p9)
}
  0x18   :  { %39 = dma.hbm_to_vmem [thread:$0]  %s6966_s2, 512, %s34_s29, [#allocation6], %s5747_s24, %s5747_s24, %s5748_s25  }
  0x19   :  { %5740 = dma.done.wait [#allocation3], 1024  }
  0x1a   :  { %5741 = vsyncadd [#allocation3], 4294966272 }
  0x1b   :  { %5742 = dma.done.wait [#allocation6], 512  }
  0x1c   :  { %5743 = vsyncadd [#allocation6], 4294966784  ;;  %v55_v0 = vld [vmem:[#allocation5 + $0x10] sm:$0xff]  ;;  %v56_v1 = vld [vmem:[#allocation5 + $0x18] sm:$0xff]  ;;  %vm111_vm0 = vcmask 261120   ;;  %s5750_s2 = smov 96   ;;  %v95_v13 = vlaneseq }
  0x1d   :  { %v53_v2 = vld [vmem:[#allocation5] sm:$0xff]  ;;  %v4700_v3 = vcombine.low %v55_v0, %v56_v1  ;;  %v54_v4 = vld [vmem:[#allocation5 + $0x8] sm:$0xff]  ;;  %v77_v9 = vld [vmem:[%s6964_s0 + $0x10] sm:$0xff]  ;;  %v5751_v37 = vmov 0.0   ;;  %vm5752_vm1 = vmmov 0   ;;  %vm296_vm2 = vcmask 64512  }
  0x1e   :  { %v75_v5 = vld [vmem:[%s6964_s0] sm:$0xff]  ;;  %v76_v6 = vld [vmem:[%s6964_s0 + $0x8] sm:$0xff]  ;;  %v4699_v8 = vcombine.low %v53_v2, %v54_v4  ;;  %v78_v10 = vld [vmem:[%s6964_s0 + $0x18] sm:$0xff]  ;;  %v5832_v17 = vshrl.u32 %v95_v13, 7  ;;  %5009 = vmatprep.subr.bf16.mxu0 %v5751_v37  ;;  %5011 = vmatprep.mubr.msk.bf16.mxu0 %vm5752_vm1, %v5751_v37  ;;  %vm767_vm3 = vcmask 1043456   ;;  %s5753_s28 = smov 120  }
  0x1f   :  { %v91_v7 = vpack.c.bf16 %v76_v6, %v75_v5  ;;  %195 = vrot.lane.b32.xlu0 %v4700_v3, %s5750_s2  ;;  %4985 = vmatprep.subr.bf16.mxu1 %v4700_v3  ;;  %v79_v11 = vld [vmem:[%s6964_s0 + $0x20] sm:$0xff]  ;;  %v80_v12 = vld [vmem:[%s6964_s0 + $0x28] sm:$0xff]  ;;  %v92_v14 = vpack.c.bf16 %v78_v10, %v77_v9  ;;  %v81_v18 = vld [vmem:[%s6964_s0 + $0x30] sm:$0xff]  ;;  %s5754_s29 = smov 88   ;;  %s5755_s30 = smov 32  }
  0x20   :  { %4986 = vmatpush3.bf16.msra.mxu1 %v4700_v3  ;;  %v73_v15 = vld [vmem:[%s6968_s4] sm:$0x3]  ;;  %v93_v16 = vpack.c.bf16 %v80_v12, %v79_v11  ;;  %v82_v19 = vld [vmem:[%s6964_s0 + $0x38] sm:$0xff]  ;;  %v97_v20 = vsub.s32 0, %v5832_v17  ;;  %v84_v23 = vld [vmem:[#allocation2 + $0x8] sm:$0xff]  ;;  %s5756_s7 = smov 112  }
  0x21   :  { %4989 = vmatprep.mubr.msk.bf16.mxu1 %vm111_vm0, %v91_v7  ;;  %4987 = vmatprep.subr.bf16.mxu1 %v4699_v8  ;;  %v83_v22 = vld [vmem:[#allocation2] sm:$0xff]  ;;  %v94_v24 = vpack.c.bf16 %v82_v19, %v81_v18  ;;  %v85_v27 = vld [vmem:[#allocation2 + $0x10] sm:$0xff]  ;;  %v86_v28 = vld [vmem:[#allocation2 + $0x18] sm:$0xff]  ;;  %s5757_s8 = smov 80   ;;  %s5758_s1 = smov 104  }
  0x22   :  { %v5845_v21 = vrot.slane %v73_v15, %v97_v20  ;;  %v189_v25 = vpack.c.bf16 %v84_v23, %v83_v22  ;;  %v87_v29 = vld [vmem:[#allocation2 + $0x20] sm:$0xff]  ;;  %v88_v30 = vld [vmem:[#allocation2 + $0x28] sm:$0xff]  ;;  %v190_v32 = vpack.c.bf16 %v86_v28, %v85_v27  ;;  %v89_v34 = vld [vmem:[#allocation2 + $0x30] sm:$0xff]  ;;  %s5759_s9 = smov 72  }
  0x23   :  { %193 = vrot.lane.b32.xlu0 %v4699_v8, %s5750_s2  ;;  %v191_v33 = vpack.c.bf16 %v88_v30, %v87_v29  ;;  %v90_v35 = vld [vmem:[#allocation2 + $0x38] sm:$0xff] }
  0x24   :  { %4988 = vmatpush3.bf16.msra.mxu1 %v4699_v8  ;;  %200 = vrot.lane.b32.xlu1 %v5845_v21, %s5750_s2  ;;  %v192_v36 = vpack.c.bf16 %v90_v35, %v89_v34 }
  0x27   :  { %4990 = vmatmul.mubr.msk.bf16.vlgmr.msra.gmra.mxu1 %vm111_vm0, %v92_v14 }
  0x28   :  { %4993 = vmatprep.mubr.msk.bf16.mxu1 %vm111_vm0, %v93_v16 }
  0x2f   :  { %4994 = vmatmul.mubr.msk.bf16.gmra.mxu1 %vm111_vm0, %v94_v24 }
  0x30   :  { %5001 = vmatprep.mubr.msk.bf16.mxu1 %vm111_vm0, %v189_v25 }
  0x91   :  { %v196_v26 = vpop.permute.xlu0 %195 }
  0x92   :  { %4997 = vmatprep.subr.bf16.mxu1 %v196_v26 }
  0x93   :  { %4998 = vmatpush3.bf16.msra.mxu1 %v196_v26 }
  0x95   :  { %v194_v31 = vpop.permute.xlu0 %193 }
  0x96   :  { %4999 = vmatprep.subr.bf16.mxu1 %v194_v31  ;;  %v201_v46 = vpop.permute.xlu1 %200 }
  0x97   :  { %5000 = vmatpush3.bf16.msra.mxu1 %v194_v31 }
  0x98   :  { %5015 = vmatprep.subr.bf16.mxu1 %v5751_v37 }
  0x9a   :  { %5002 = vmatmul.mubr.msk.bf16.vlgmr.msra.gmra.mxu1 %vm111_vm0, %v190_v32 }
  0x9b   :  { %5005 = vmatprep.mubr.msk.bf16.mxu1 %vm111_vm0, %v191_v33 }
  0xa2   :  { %5006 = vmatmul.mubr.msk.bf16.gmra.mxu1 %vm111_vm0, %v192_v36 }
  0xa3   :  { %5017 = vmatprep.mubr.msk.bf16.mxu1 %vm5752_vm1, %v5751_v37 }
  0xe7   :  { %v4991_v38 = vpop.f32.mrf.mxu1 }
  0xe8   :  { %v167_v7 = vadd.f32 %v4991_v38, %v5845_v21 }
  0xe9   :  { %v158_v39 = vpop.f32.mrf.mxu1 }
  0xea   :  { %v159_v59 = vadd.f32 %v158_v39, %v5845_v21  ;;  %v5912_v11 = vpack.c.bf16 %v167_v7, %v167_v7 }
  0xeb   :  { %v4992_v40 = vpop.f32.mrf.mxu1 }
  0xec   :  { %v5888_v2 = vpack.c.bf16 %v159_v59, %v159_v59  ;;  %v170_v12 = vadd.f32 %v4992_v40, %v5845_v21 }
  0xed   :  { %v161_v41 = vpop.f32.mrf.mxu1 }
  0xee   :  { %v162_v3 = vadd.f32 %v161_v41, %v5845_v21  ;;  %v5924_v16 = vpack.c.bf16 %v170_v12, %v170_v12 }
  0xef   :  { %v5860_v42 = vpop.f32.mrf.mxu1 }
  0xf0   :  { %v5903_v8 = vpack.c.bf16 %v162_v3, %v162_v3  ;;  %v183_v28 = vadd.f32 %v5860_v42, %v5845_v21 }
  0xf1   :  { %v174_v43 = vpop.f32.mrf.mxu1 }
  0xf2   :  { %v175_v18 = vadd.f32 %v174_v43, %v5845_v21  ;;  %v5960_v31 = vpack.c.bf16 %v183_v28, %v183_v28 }
  0xf3   :  { %v5862_v44 = vpop.f32.mrf.mxu1 }
  0xf4   :  { %v5936_v24 = vpack.c.bf16 %v175_v18, %v175_v18  ;;  %v186_v32 = vadd.f32 %v5862_v44, %v5845_v21 }
  0xf5   :  { %v5864_v45 = vpop.f32.mrf.mxu1 }
  0xf6   :  { %v178_v25 = vadd.f32 %v5864_v45, %v5845_v21  ;;  %v5969_v33 = vpack.c.bf16 %v186_v32, %v186_v32 }
  0xf8   :  { %v5951_v29 = vpack.c.bf16 %v178_v25, %v178_v25 }
 0x15a   :  { %v5003_v47 = vpop.f32.mrf.mxu1 }
 0x15b   :  { %v258_v48 = vadd.f32 %v5003_v47, %v201_v46 }
 0x15c   :  { %v249_v49 = vpop.f32.mrf.mxu1 }
 0x15d   :  { %v5866_v50 = vpack.c.bf16 %v258_v48, %v258_v48  ;;  %v250_v51 = vadd.f32 %v249_v49, %v201_v46 }
 0x15e   :  { %v5004_v52 = vpop.f32.mrf.mxu1 }
 0x15f   :  { %v5868_v53 = vpack.c.bf16 %v250_v51, %v250_v51  ;;  %v261_v54 = vadd.f32 %v5004_v52, %v201_v46  ;;  %861 = vrot.lane.b32.xlu1 %v5866_v50, %s5750_s2  ;;  %v393_v5 = vsel %vm296_vm2, %v5866_v50, 0 }
 0x160   :  { %v252_v55 = vpop.f32.mrf.mxu1 }
 0x161   :  { %v253_v56 = vadd.f32 %v252_v55, %v201_v46  ;;  %762 = vrot.lane.b32.xlu0 %v5868_v53, %s5750_s2  ;;  %v301_v57 = vsel %vm296_vm2, %v5868_v53, 0  ;;  %v5877_v60 = vpack.c.bf16 %v261_v54, %v261_v54 }
 0x162   :  { %v5007_v58 = vpop.f32.mrf.mxu1  ;;  %5010 = vmatpush3.bf16.xpose.msra.mxu0 %v301_v57 }
 0x163   :  { %v5879_v61 = vpack.c.bf16 %v253_v56, %v253_v56  ;;  %5021 = vmatprep.subr.bf16.mxu0 %v5751_v37  ;;  %v439_v10 = vsel %vm296_vm2, %v5877_v60, 0  ;;  %v274_v13 = vadd.f32 %v5007_v58, %v201_v46 }
 0x164   :  { %v265_v62 = vpop.f32.mrf.mxu1 }
 0x165   :  { %v266_v63 = vadd.f32 %v265_v62, %v201_v46  ;;  %812 = vrot.lane.b32.xlu1 %v5879_v61, %s5750_s2  ;;  %910 = vrot.lane.b32.xlu0 %v5877_v60, %s5750_s2  ;;  %v347_v0 = vsel %vm296_vm2, %v5879_v61, 0  ;;  %v5928_v19 = vpack.c.bf16 %v274_v13, %v274_v13 }
 0x166   :  { %v5008_v1 = vpop.f32.mrf.mxu1  ;;  %5016 = vmatpush3.bf16.xpose.msra.mxu1 %v347_v0 }
 0x167   :  { %v5891_v4 = vpack.c.bf16 %v266_v63, %v266_v63  ;;  %5027 = vmatprep.subr.bf16.mxu1 %v5751_v37  ;;  %v277_v22 = vadd.f32 %v5008_v1, %v201_v46  ;;  %v577_v27 = vsel %vm296_vm2, %v5928_v19, 0 }
 0x168   :  { %v268_v6 = vpop.f32.mrf.mxu1 }
 0x169   :  { %959 = vrot.lane.b32.xlu1 %v5891_v4, %s5750_s2  ;;  %5012 = vmatmul.mubr.msk.bf16.vlgmr.msra.gmra.mxu0 %vm296_vm2, %v5888_v2  ;;  %v269_v9 = vadd.f32 %v268_v6, %v201_v46  ;;  %v485_v15 = vsel %vm296_vm2, %v5891_v4, 0  ;;  %v5941_v26 = vpack.c.bf16 %v277_v22, %v277_v22 }
 0x16a   :  { %5022 = vmatpush3.bf16.xpose.msra.mxu0 %v393_v5  ;;  %5023 = vmatprep.mubr.msk.bf16.mxu0 %vm5752_vm1, %v5751_v37 }
 0x16b   :  { %5033 = vmatprep.subr.bf16.mxu0 %v5751_v37  ;;  %v5916_v14 = vpack.c.bf16 %v269_v9, %v269_v9  ;;  %v623_v30 = vsel %vm296_vm2, %v5941_v26, 0 }
 0x16d   :  { %5018 = vmatmul.mubr.msk.bf16.vlgmr.msra.gmra.mxu1 %vm296_vm2, %v5903_v8  ;;  %v531_v23 = vsel %vm296_vm2, %v5916_v14, 0 }
 0x16e   :  { %5028 = vmatpush3.bf16.xpose.msra.mxu1 %v439_v10  ;;  %5029 = vmatprep.mubr.msk.bf16.mxu1 %vm5752_vm1, %v5751_v37 }
 0x16f   :  { %5039 = vmatprep.subr.bf16.mxu1 %v5751_v37 }
 0x171   :  { %5024 = vmatmul.mubr.msk.bf16.vlgmr.msra.gmra.mxu0 %vm296_vm2, %v5912_v11 }
 0x172   :  { %5034 = vmatpush3.bf16.xpose.msra.mxu0 %v485_v15  ;;  %5035 = vmatprep.mubr.msk.bf16.mxu0 %vm5752_vm1, %v5751_v37 }
 0x173   :  { %5045 = vmatprep.subr.bf16.mxu0 %v5751_v37 }
 0x175   :  { %5030 = vmatmul.mubr.msk.bf16.vlgmr.msra.gmra.mxu1 %vm296_vm2, %v5924_v16 }
 0x176   :  { %5040 = vmatpush3.bf16.xpose.msra.mxu1 %v531_v23  ;;  %5041 = vmatprep.mubr.msk.bf16.mxu1 %vm5752_vm1, %v5751_v37 }
 0x177   :  { %5051 = vmatprep.subr.bf16.mxu1 %v5751_v37 }
 0x179   :  { %5036 = vmatmul.mubr.msk.bf16.vlgmr.msra.gmra.mxu0 %vm296_vm2, %v5936_v24 }
 0x17a   :  { %5046 = vmatpush3.bf16.xpose.msra.mxu0 %v577_v27  ;;  %5047 = vmatprep.mubr.msk.bf16.mxu0 %vm5752_vm1, %v5751_v37 }
 0x17b   :  { %5057 = vmatprep.subr.bf16.mxu0 %v5751_v37 }
 0x17d   :  { %5042 = vmatmul.mubr.msk.bf16.vlgmr.msra.gmra.mxu1 %vm296_vm2, %v5951_v29 }
 0x17e   :  { %5052 = vmatpush3.bf16.xpose.msra.mxu1 %v623_v30  ;;  %5053 = vmatprep.mubr.msk.bf16.mxu1 %vm5752_vm1, %v5751_v37 }
 0x17f   :  { %5063 = vmatprep.subr.bf16.mxu1 %v5751_v37 }
 0x181   :  { %5048 = vmatmul.mubr.msk.bf16.vlgmr.msra.gmra.mxu0 %vm296_vm2, %v5960_v31 }
 0x182   :  { %5059 = vmatprep.mubr.msk.bf16.mxu0 %vm5752_vm1, %v5751_v37 }
 0x185   :  { %5054 = vmatmul.mubr.msk.bf16.vlgmr.msra.gmra.mxu1 %vm296_vm2, %v5969_v33 }
 0x186   :  { %5065 = vmatprep.mubr.msk.bf16.mxu1 %vm5752_vm1, %v5751_v37 }
 0x1d1   :  { %v5975_v34 = vpop.permute.xlu1 %861 }
 0x1d3   :  { %v763_v21 = vpop.permute.xlu0 %762 }
 0x1d4   :  { %v769_v35 = vsel %vm767_vm3, %v763_v21, 0 }
 0x1d5   :  { %5058 = vmatpush3.bf16.msra.mxu0 %v769_v35 }
 0x1d6   :  { %5069 = vmatprep.subr.bf16.mxu0 %v5751_v37 }
 0x1d7   :  { %v813_v36 = vpop.permute.xlu1 %812  ;;  %v5998_v35 = vpop.permute.xlu0 %910 }
 0x1d8   :  { %v818_v38 = vsel %vm767_vm3, %v813_v36, 0 }
 0x1d9   :  { %5064 = vmatpush3.bf16.msra.mxu1 %v818_v38 }
 0x1da   :  { %5075 = vmatprep.subr.bf16.mxu1 %v5751_v37 }
 0x1db   :  { %v5996_v21 = vpop.permute.xlu1 %959 }
 0x229   :  { %v337_v39 = vpop.f32.mrf.mxu0 }
 0x22a   :  { %v665_v40 = vsel %vm296_vm2, %v337_v39, -inf }
 0x22b   :  { %666 = vmax.xlane.f32.xlu1 %v665_v40  ;;  %v5013_v41 = vpop.f32.mrf.mxu0 }
 0x22d   :  { %v340_v42 = vpop.f32.mrf.mxu0  ;;  %v383_v43 = vpop.f32.mrf.mxu1 }
 0x22e   :  { %v668_v44 = vsel %vm296_vm2, %v383_v43, -inf }
 0x22f   :  { %669 = vmax.xlane.f32.xlu0 %v668_v44  ;;  %v5014_v45 = vpop.f32.mrf.mxu0  ;;  %v5019_v46 = vpop.f32.mrf.mxu1 }
 0x231   :  { %v386_v47 = vpop.f32.mrf.mxu1  ;;  %v429_v48 = vpop.f32.mrf.mxu0 }
 0x232   :  { %v671_v49 = vsel %vm296_vm2, %v429_v48, -inf }
 0x233   :  { %v5020_v51 = vpop.f32.mrf.mxu1  ;;  %672 = vmax.xlane.f32.xlu0 %v671_v49  ;;  %v5025_v52 = vpop.f32.mrf.mxu0 }
 0x235   :  { %v432_v54 = vpop.f32.mrf.mxu0  ;;  %v475_v55 = vpop.f32.mrf.mxu1 }
 0x236   :  { %v674_v56 = vsel %vm296_vm2, %v475_v55, -inf }
 0x237   :  { %v5031_v57 = vpop.f32.mrf.mxu1  ;;  %675 = vmax.xlane.f32.xlu1 %v674_v56  ;;  %v5026_v58 = vpop.f32.mrf.mxu0 }
 0x239   :  { %v478_v59 = vpop.f32.mrf.mxu1  ;;  %v521_v62 = vpop.f32.mrf.mxu0 }
 0x23a   :  { %v677_v63 = vsel %vm296_vm2, %v521_v62, -inf }
 0x23b   :  { %v5032_v0 = vpop.f32.mrf.mxu1  ;;  %678 = vmax.xlane.f32.xlu0 %v677_v63  ;;  %v5037_v1 = vpop.f32.mrf.mxu0 }
 0x23d   :  { %v524_v3 = vpop.f32.mrf.mxu0  ;;  %v567_v5 = vpop.f32.mrf.mxu1 }
 0x23e   :  { %v680_v6 = vsel %vm296_vm2, %v567_v5, -inf }
 0x23f   :  { %v5043_v7 = vpop.f32.mrf.mxu1  ;;  %681 = vmax.xlane.f32.xlu1 %v680_v6  ;;  %v5038_v9 = vpop.f32.mrf.mxu0 }
 0x241   :  { %v570_v10 = vpop.f32.mrf.mxu1  ;;  %v5987_v12 = vpop.f32.mrf.mxu0 }
 0x242   :  { %v683_v13 = vsel %vm296_vm2, %v5987_v12, -inf }
 0x243   :  { %v5044_v15 = vpop.f32.mrf.mxu1  ;;  %684 = vmax.xlane.f32.xlu0 %v683_v13  ;;  %v5049_v18 = vpop.f32.mrf.mxu0 }
 0x245   :  { %v616_v22 = vpop.f32.mrf.mxu0  ;;  %v659_v23 = vpop.f32.mrf.mxu1 }
 0x246   :  { %v686_v25 = vsel %vm296_vm2, %v659_v23, -inf }
 0x247   :  { %v5055_v27 = vpop.f32.mrf.mxu1  ;;  %687 = vmax.xlane.f32.xlu1 %v686_v25  ;;  %v5050_v28 = vpop.f32.mrf.mxu0 }
 0x249   :  { %v662_v30 = vpop.f32.mrf.mxu1 }
 0x24b   :  { %v5056_v32 = vpop.f32.mrf.mxu1 }
 0x258   :  { %1057 = vrot.lane.b32.xlu1 %v5928_v19, %s5750_s2 }
 0x259   :  { %1008 = vrot.lane.b32.xlu0 %v5916_v14, %s5750_s2 }
 0x2b4   :  { %v667_v36 = vpop.xlane.xlu1 %666 }
 0x2b5   :  { %v689_v38 = vsub.f32 %v337_v39, %v667_v36 }
 0x2b7   :  { %v697_v40 = vmul.f32 1.442695, %v689_v38 }
 0x2b8   :  { %v670_v41 = vpop.xlane.xlu0 %669 }
 0x2b9   :  { %5504 = vpow2.f32 %v697_v40  ;;  %v690_v42 = vsub.f32 %v383_v43, %v670_v41 }
 0x2bb   :  { %v699_v44 = vmul.f32 1.442695, %v690_v42 }
 0x2bc   :  { %v673_v45 = vpop.xlane.xlu0 %672 }
 0x2bd   :  { %5506 = vpow2.f32 %v699_v44  ;;  %v691_v46 = vsub.f32 %v429_v48, %v673_v45 }
 0x2bf   :  { %v701_v47 = vmul.f32 1.442695, %v691_v46 }
 0x2c0   :  { %v676_v49 = vpop.xlane.xlu1 %675 }
 0x2c1   :  { %5508 = vpow2.f32 %v701_v47  ;;  %v692_v51 = vsub.f32 %v475_v55, %v676_v49  ;;  %v867_v49 = vsel %vm767_vm3, %v5975_v34, 0 }
 0x2c3   :  { %v703_v52 = vmul.f32 1.442695, %v692_v51 }
 0x2c4   :  { %v679_v54 = vpop.xlane.xlu0 %678 }
 0x2c5   :  { %5510 = vpow2.f32 %v703_v52  ;;  %v693_v56 = vsub.f32 %v521_v62, %v679_v54 }
 0x2c6   :  { %v6000_v57 = vpop.eup %5504 }
 0x2c7   :  { %v705_v58 = vmul.f32 1.442695, %v693_v56  ;;  %v713_v39 = vsel %vm296_vm2, %v6000_v57, 0.0 }
 0x2c8   :  { %v682_v59 = vpop.xlane.xlu1 %681  ;;  %714 = vadd.xlane.f32.xlu0 %v713_v39 }
 0x2c9   :  { %5512 = vpow2.f32 %v705_v58  ;;  %v694_v43 = vsub.f32 %v567_v5, %v682_v59  ;;  %v965_v59 = vsel %vm767_vm3, %v5996_v21, 0 }
 0x2ca   :  { %v6004_v63 = vpop.eup %5506 }
 0x2cb   :  { %v707_v48 = vmul.f32 1.442695, %v694_v43  ;;  %v716_v55 = vsel %vm296_vm2, %v6004_v63, 0.0 }
 0x2cc   :  { %717 = vadd.xlane.f32.xlu1 %v716_v55  ;;  %v685_v10 = vpop.xlane.xlu0 %684 }
 0x2cd   :  { %5514 = vpow2.f32 %v707_v48  ;;  %v695_v13 = vsub.f32 %v5987_v12, %v685_v10 }
 0x2ce   :  { %v6008_v0 = vpop.eup %5508 }
 0x2cf   :  { %v719_v62 = vsel %vm296_vm2, %v6008_v0, 0.0  ;;  %v709_v18 = vmul.f32 1.442695, %v695_v13 }
 0x2d0   :  { %720 = vadd.xlane.f32.xlu0 %v719_v62  ;;  %v688_v15 = vpop.xlane.xlu1 %687  ;;  %v1009_v12 = vpop.permute.xlu0 %1008 }
 0x2d1   :  { %v696_v22 = vsub.f32 %v659_v23, %v688_v15  ;;  %5516 = vpow2.f32 %v709_v18  ;;  %v1014_v48 = vsel %vm767_vm3, %v1009_v12, 0 }
 0x2d2   :  { %v6012_v1 = vpop.eup %5510 }
 0x2d3   :  { %v722_v3 = vsel %vm296_vm2, %v6012_v1, 0.0  ;;  %v711_v25 = vmul.f32 1.442695, %v696_v22 }
 0x2d4   :  { %723 = vadd.xlane.f32.xlu1 %v722_v3  ;;  %v1058_v23 = vpop.permute.xlu1 %1057 }
 0x2d5   :  { %5518 = vpow2.f32 %v711_v25  ;;  %v1063_v62 = vsel %vm767_vm3, %v1058_v23, 0 }
 0x2d6   :  { %v6016_v5 = vpop.eup %5512 }
 0x2d7   :  { %v725_v6 = vsel %vm296_vm2, %v6016_v5, 0.0 }
 0x2d8   :  { %726 = vadd.xlane.f32.xlu0 %v725_v6 }
 0x2da   :  { %v6020_v7 = vpop.eup %5514 }
 0x2db   :  { %v728_v9 = vsel %vm296_vm2, %v6020_v7, 0.0 }
 0x2dc   :  { %729 = vadd.xlane.f32.xlu1 %v728_v9 }
 0x2de   :  { %v6029_v27 = vpop.eup %5516 }
 0x2df   :  { %v731_v28 = vsel %vm296_vm2, %v6029_v27, 0.0 }
 0x2e2   :  { %v6033_v30 = vpop.eup %5518 }
 0x2e3   :  { %v734_v32 = vsel %vm296_vm2, %v6033_v30, 0.0 }
 0x2ed   :  { %1161 = vrot.lane.b32.xlu1 %v5868_v53, %s5753_s28 }
 0x2ee   :  { %1106 = vrot.lane.b32.xlu0 %v5941_v26, %s5750_s2 }
 0x30d   :  { %732 = vadd.xlane.f32.xlu0 %v731_v28 }
 0x311   :  { %735 = vadd.xlane.f32.xlu1 %v734_v32 }
 0x322   :  { %1159 = vrot.lane.b32.xlu1 %v5888_v2, %s5753_s28 }
 0x323   :  { %1212 = vrot.lane.b32.xlu0 %v5879_v61, %s5753_s28 }
 0x326   :  { %1263 = vrot.lane.b32.xlu1 %v5866_v50, %s5753_s28 }
 0x327   :  { %1210 = vrot.lane.b32.xlu0 %v5903_v8, %s5753_s28 }
 0x32a   :  { %1261 = vrot.lane.b32.xlu1 %v5912_v11, %s5753_s28 }
 0x32b   :  { %1314 = vrot.lane.b32.xlu0 %v5877_v60, %s5753_s28 }
 0x32e   :  { %1365 = vrot.lane.b32.xlu1 %v5891_v4, %s5753_s28 }
 0x32f   :  { %1312 = vrot.lane.b32.xlu0 %v5924_v16, %s5753_s28 }
 0x332   :  { %1363 = vrot.lane.b32.xlu1 %v5936_v24, %s5753_s28 }
 0x333   :  { %1416 = vrot.lane.b32.xlu0 %v5916_v14, %s5753_s28 }
 0x336   :  { %1467 = vrot.lane.b32.xlu1 %v5928_v19, %s5753_s28 }
 0x337   :  { %1414 = vrot.lane.b32.xlu0 %v5951_v29, %s5753_s28 }
 0x33a   :  { %1465 = vrot.lane.b32.xlu1 %v5960_v31, %s5753_s28 }
 0x33b   :  { %1518 = vrot.lane.b32.xlu0 %v5941_v26, %s5753_s28 }
 0x33e   :  { %1710 = vrot.lane.b32.xlu1 %v5879_v61, %s5754_s29 }
 0x33f   :  { %1516 = vrot.lane.b32.xlu0 %v5969_v33, %s5753_s28 }
 0x343   :  { %1662 = vrot.lane.b32.xlu0 %v5868_v53, %s5754_s29 }
 0x351   :  { %v715_v36 = vpop.xlane.xlu0 %714 }
 0x352   :  { %5520 = vrcp.f32 %v715_v36 }
 0x355   :  { %v718_v38 = vpop.xlane.xlu1 %717 }
 0x356   :  { %5522 = vrcp.f32 %v718_v38 }
 0x359   :  { %v721_v40 = vpop.xlane.xlu0 %720 }
 0x35a   :  { %5524 = vrcp.f32 %v721_v40 }
 0x35d   :  { %v724_v41 = vpop.xlane.xlu1 %723 }
 0x35e   :  { %5526 = vrcp.f32 %v724_v41 }
 0x35f   :  { %v5521_v42 = vpop.eup %5520 }
 0x360   :  { %v745_v44 = vmul.f32 %v5521_v42, %v6000_v57  ;;  %v916_v57 = vsel %vm767_vm3, %v5998_v35, 0 }
 0x361   :  { %v727_v45 = vpop.xlane.xlu0 %726 }
 0x362   :  { %5528 = vrcp.f32 %v727_v45  ;;  %v753_v46 = vpack.c.bf16 %v745_v44, %v745_v44 }
 0x363   :  { %v5523_v47 = vpop.eup %5522 }
 0x364   :  { %5060 = vmatmul.mubr.msk.bf16.vlgmr.msra.gmra.mxu0 %vm296_vm2, %v753_v46  ;;  %v746_v51 = vmul.f32 %v5523_v47, %v6004_v63 }
 0x365   :  { %5070 = vmatpush3.bf16.msra.mxu0 %v867_v49  ;;  %v730_v52 = vpop.xlane.xlu1 %729  ;;  %5071 = vmatprep.mubr.msk.bf16.mxu0 %vm5752_vm1, %v5751_v37  ;;  %v1107_v3 = vpop.permute.xlu0 %1106 }
 0x366   :  { %5530 = vrcp.f32 %v730_v52  ;;  %v754_v54 = vpack.c.bf16 %v746_v51, %v746_v51  ;;  %5081 = vmatprep.subr.bf16.mxu0 %v5751_v37  ;;  %v1112_v6 = vsel %vm767_vm3, %v1107_v3, 0 }
 0x367   :  { %v5525_v56 = vpop.eup %5524 }
 0x368   :  { %5066 = vmatmul.mubr.msk.bf16.vlgmr.msra.gmra.mxu1 %vm296_vm2, %v754_v54  ;;  %v747_v34 = vmul.f32 %v5525_v56, %v6008_v0 }
 0x369   :  { %5076 = vmatpush3.bf16.msra.mxu1 %v916_v57  ;;  %5077 = vmatprep.mubr.msk.bf16.mxu1 %vm5752_vm1, %v5751_v37  ;;  %v1162_v9 = vpop.permute.xlu1 %1161 }
 0x36a   :  { %v755_v58 = vpack.c.bf16 %v747_v34, %v747_v34  ;;  %5087 = vmatprep.subr.bf16.mxu1 %v5751_v37  ;;  %v1167_v38 = vsel %vm296_vm2, %v1162_v9, 0 }
 0x36b   :  { %v5527_v39 = vpop.eup %5526 }
 0x36c   :  { %5072 = vmatmul.mubr.msk.bf16.vlgmr.msra.gmra.mxu0 %vm296_vm2, %v755_v58  ;;  %v748_v43 = vmul.f32 %v5527_v39, %v6012_v1 }
 0x36d   :  { %5082 = vmatpush3.bf16.msra.mxu0 %v965_v59  ;;  %5083 = vmatprep.mubr.msk.bf16.mxu0 %vm5752_vm1, %v5751_v37 }
 0x36e   :  { %v756_v35 = vpack.c.bf16 %v748_v43, %v748_v43  ;;  %5093 = vmatprep.subr.bf16.mxu0 %v5751_v37 }
 0x36f   :  { %v5529_v63 = vpop.eup %5528 }
 0x370   :  { %5078 = vmatmul.mubr.msk.bf16.vlgmr.msra.gmra.mxu1 %vm296_vm2, %v756_v35  ;;  %v749_v55 = vmul.f32 %v5529_v63, %v6016_v5 }
 0x371   :  { %5088 = vmatpush3.bf16.msra.mxu1 %v1014_v48  ;;  %5089 = vmatprep.mubr.msk.bf16.mxu1 %vm5752_vm1, %v5751_v37 }
 0x372   :  { %v757_v21 = vpack.c.bf16 %v749_v55, %v749_v55  ;;  %5099 = vmatprep.subr.bf16.mxu1 %v5751_v37 }
 0x373   :  { %v5531_v0 = vpop.eup %5530 }
 0x374   :  { %5084 = vmatmul.mubr.msk.bf16.vlgmr.msra.gmra.mxu0 %vm296_vm2, %v757_v21  ;;  %v750_v1 = vmul.f32 %v5531_v0, %v6020_v7 }
 0x375   :  { %5094 = vmatpush3.bf16.msra.mxu0 %v1063_v62  ;;  %5095 = vmatprep.mubr.msk.bf16.mxu0 %vm5752_vm1, %v5751_v37 }
 0x376   :  { %v758_v5 = vpack.c.bf16 %v750_v1, %v750_v1  ;;  %5105 = vmatprep.subr.bf16.mxu0 %v5751_v37 }
 0x378   :  { %5090 = vmatmul.mubr.msk.bf16.vlgmr.msra.gmra.mxu1 %vm296_vm2, %v758_v5 }
 0x379   :  { %5100 = vmatpush3.bf16.msra.mxu1 %v1112_v6  ;;  %5101 = vmatprep.mubr.msk.bf16.mxu1 %vm5752_vm1, %v5751_v37 }
 0x37a   :  { %5111 = vmatprep.subr.bf16.mxu1 %v5751_v37 }
 0x396   :  { %v733_v7 = vpop.xlane.xlu0 %732 }
 0x397   :  { %5532 = vrcp.f32 %v733_v7 }
 0x39a   :  { %v736_v10 = vpop.xlane.xlu1 %735  ;;  %v1213_v13 = vpop.permute.xlu0 %1212 }
 0x39b   :  { %5534 = vrcp.f32 %v736_v10 }
 0x39e   :  { %v1211_v15 = vpop.permute.xlu0 %1210  ;;  %v1160_v18 = vpop.permute.xlu1 %1159 }
 0x3a2   :  { %v1315_v22 = vpop.permute.xlu0 %1314  ;;  %v1264_v32 = vpop.permute.xlu1 %1263 }
 0x3a3   :  { %v1320_v47 = vsel %vm296_vm2, %v1315_v22, 0 }
 0x3a4   :  { %v5533_v25 = vpop.eup %5532 }
 0x3a5   :  { %v751_v28 = vmul.f32 %v5533_v25, %v6029_v27  ;;  %v1218_v27 = vsel %vm296_vm2, %v1213_v13, 0 }
 0x3a6   :  { %v1313_v36 = vpop.permute.xlu0 %1312  ;;  %v1262_v42 = vpop.permute.xlu1 %1261 }
 0x3a7   :  { %v759_v12 = vpack.c.bf16 %v751_v28, %v751_v28 }
 0x3a8   :  { %v5535_v23 = vpop.eup %5534 }
 0x3a9   :  { %5096 = vmatmul.mubr.msk.bf16.vlgmr.msra.gmra.mxu0 %vm296_vm2, %v759_v12  ;;  %v752_v40 = vmul.f32 %v5535_v23, %v6033_v30  ;;  %v1269_v30 = vsel %vm296_vm2, %v1264_v32, 0 }
 0x3aa   :  { %5106 = vmatpush3.bf16.xpose.msra.mxu0 %v1167_v38  ;;  %5107 = vmatprep.mubr.msk.bf16.mxu0 %vm5752_vm1, %v5751_v37  ;;  %v1417_v44 = vpop.permute.xlu0 %1416  ;;  %v1366_v45 = vpop.permute.xlu1 %1365 }
 0x3ab   :  { %v760_v41 = vpack.c.bf16 %v752_v40, %v752_v40  ;;  %5117 = vmatprep.subr.bf16.mxu0 %v5751_v37  ;;  %v1371_v51 = vsel %vm296_vm2, %v1366_v45, 0  ;;  %v1422_v54 = vsel %vm296_vm2, %v1417_v44, 0 }
 0x3ad   :  { %5102 = vmatmul.mubr.msk.bf16.vlgmr.msra.gmra.mxu1 %vm296_vm2, %v760_v41 }
 0x3ae   :  { %5112 = vmatpush3.bf16.xpose.msra.mxu1 %v1218_v27  ;;  %5113 = vmatprep.mubr.msk.bf16.mxu1 %vm5752_vm1, %v5751_v37  ;;  %v1415_v46 = vpop.permute.xlu0 %1414  ;;  %v1364_v49 = vpop.permute.xlu1 %1363 }
 0x3af   :  { %5123 = vmatprep.subr.bf16.mxu1 %v5751_v37 }
 0x3b1   :  { %5108 = vmatmul.mubr.msk.bf16.vlgmr.msra.gmra.mxu0 %vm296_vm2, %v1160_v18 }
 0x3b2   :  { %5118 = vmatpush3.bf16.xpose.msra.mxu0 %v1269_v30  ;;  %5119 = vmatprep.mubr.msk.bf16.mxu0 %vm5752_vm1, %v5751_v37  ;;  %v1519_v52 = vpop.permute.xlu0 %1518  ;;  %v1468_v56 = vpop.permute.xlu1 %1467 }
 0x3b3   :  { %5129 = vmatprep.subr.bf16.mxu0 %v5751_v37  ;;  %v1473_v34 = vsel %vm296_vm2, %v1468_v56, 0  ;;  %v1524_v39 = vsel %vm296_vm2, %v1519_v52, 0 }
 0x3b5   :  { %5114 = vmatmul.mubr.msk.bf16.vlgmr.msra.gmra.mxu1 %vm296_vm2, %v1211_v15 }
 0x3b6   :  { %5124 = vmatpush3.bf16.xpose.msra.mxu1 %v1320_v47  ;;  %5125 = vmatprep.mubr.msk.bf16.mxu1 %vm5752_vm1, %v5751_v37  ;;  %v1517_v57 = vpop.permute.xlu0 %1516  ;;  %v1466_v58 = vpop.permute.xlu1 %1465 }
 0x3b7   :  { %5135 = vmatprep.subr.bf16.mxu1 %v5751_v37 }
 0x3b9   :  { %5120 = vmatmul.mubr.msk.bf16.vlgmr.msra.gmra.mxu0 %vm296_vm2, %v1262_v42 }
 0x3ba   :  { %5130 = vmatpush3.bf16.xpose.msra.mxu0 %v1371_v51  ;;  %5131 = vmatprep.mubr.msk.bf16.mxu0 %vm5752_vm1, %v5751_v37  ;;  %v1663_v59 = vpop.permute.xlu0 %1662  ;;  %v1711_v35 = vpop.permute.xlu1 %1710 }
 0x3bb   :  { %5141 = vmatprep.subr.bf16.mxu0 %v5751_v37  ;;  %v1668_v43 = vsel %vm767_vm3, %v1663_v59, 0  ;;  %v1716_v63 = vsel %vm767_vm3, %v1711_v35, 0 }
 0x3bd   :  { %5126 = vmatmul.mubr.msk.bf16.vlgmr.msra.gmra.mxu1 %vm296_vm2, %v1313_v36 }
 0x3be   :  { %5136 = vmatpush3.bf16.xpose.msra.mxu1 %v1422_v54  ;;  %5137 = vmatprep.mubr.msk.bf16.mxu1 %vm5752_vm1, %v5751_v37 }
 0x3bf   :  { %5147 = vmatprep.subr.bf16.mxu1 %v5751_v37 }
 0x3c1   :  { %5132 = vmatmul.mubr.msk.bf16.vlgmr.msra.gmra.mxu0 %vm296_vm2, %v1364_v49 }
 0x3c2   :  { %5142 = vmatpush3.bf16.xpose.msra.mxu0 %v1473_v34  ;;  %5143 = vmatprep.mubr.msk.bf16.mxu0 %vm5752_vm1, %v5751_v37 }
 0x3c3   :  { %5153 = vmatprep.subr.bf16.mxu0 %v5751_v37 }
 0x3c5   :  { %5138 = vmatmul.mubr.msk.bf16.vlgmr.msra.gmra.mxu1 %vm296_vm2, %v1415_v46 }
 0x3c6   :  { %5148 = vmatpush3.bf16.xpose.msra.mxu1 %v1524_v39  ;;  %5149 = vmatprep.mubr.msk.bf16.mxu1 %vm5752_vm1, %v5751_v37 }
 0x3c7   :  { %5159 = vmatprep.subr.bf16.mxu1 %v5751_v37 }
 0x3c9   :  { %5144 = vmatmul.mubr.msk.bf16.vlgmr.msra.gmra.mxu0 %vm296_vm2, %v1466_v58 }
 0x3ca   :  { %5154 = vmatpush3.bf16.msra.mxu0 %v1668_v43  ;;  %5155 = vmatprep.mubr.msk.bf16.mxu0 %vm5752_vm1, %v5751_v37 }
 0x3cb   :  { %5165 = vmatprep.subr.bf16.mxu0 %v5751_v37 }
 0x3cd   :  { %5150 = vmatmul.mubr.msk.bf16.vlgmr.msra.gmra.mxu1 %vm296_vm2, %v1517_v57 }
 0x3ce   :  { %5160 = vmatpush3.bf16.msra.mxu1 %v1716_v63  ;;  %5161 = vmatprep.mubr.msk.bf16.mxu1 %vm5752_vm1, %v5751_v37 }
 0x3cf   :  { %5171 = vmatprep.subr.bf16.mxu1 %v5751_v37 }
 0x424   :  { %v6162_v48 = vpop.f32.mrf.mxu0 }
 0x426   :  { %v5061_v55 = vpop.f32.mrf.mxu0 }
 0x428   :  { %v808_v21 = vpop.f32.mrf.mxu0  ;;  %v6164_v0 = vpop.f32.mrf.mxu1 }
 0x429   :  { %v1154_v62 = vpack.c.bf16 %v6164_v0, %v6162_v48 }
 0x42a   :  { %v5062_v1 = vpop.f32.mrf.mxu0  ;;  %v5067_v3 = vpop.f32.mrf.mxu1 }
 0x42c   :  { %v857_v5 = vpop.f32.mrf.mxu1  ;;  %v6168_v6 = vpop.f32.mrf.mxu0 }
 0x42e   :  { %v5068_v9 = vpop.f32.mrf.mxu1  ;;  %v5073_v7 = vpop.f32.mrf.mxu0 }
 0x430   :  { %v906_v10 = vpop.f32.mrf.mxu0  ;;  %v6170_v13 = vpop.f32.mrf.mxu1 }
 0x431   :  { %v1155_v15 = vpack.c.bf16 %v6170_v13, %v6168_v6 }
 0x432   :  { %v5074_v18 = vpop.f32.mrf.mxu0  ;;  %v5079_v22 = vpop.f32.mrf.mxu1 }
 0x434   :  { %v955_v25 = vpop.f32.mrf.mxu1  ;;  %v6174_v28 = vpop.f32.mrf.mxu0 }
 0x436   :  { %v5080_v32 = vpop.f32.mrf.mxu1  ;;  %v5085_v12 = vpop.f32.mrf.mxu0 }
 0x438   :  { %v1004_v23 = vpop.f32.mrf.mxu0  ;;  %v6176_v36 = vpop.f32.mrf.mxu1 }
 0x439   :  { %v1156_v38 = vpack.c.bf16 %v6176_v36, %v6174_v28 }
 0x43a   :  { %v5086_v40 = vpop.f32.mrf.mxu0  ;;  %v5091_v41 = vpop.f32.mrf.mxu1 }
 0x43c   :  { %v1053_v42 = vpop.f32.mrf.mxu1 }
 0x43e   :  { %v5092_v27 = vpop.f32.mrf.mxu1 }
 0x469   :  { %v6180_v44 = vpop.f32.mrf.mxu0 }
 0x46b   :  { %v5097_v30 = vpop.f32.mrf.mxu0 }
 0x46d   :  { %v1102_v45 = vpop.f32.mrf.mxu0  ;;  %v6182_v46 = vpop.f32.mrf.mxu1 }
 0x46e   :  { %v1157_v47 = vpack.c.bf16 %v6182_v46, %v6180_v44 }
 0x46f   :  { %v5098_v49 = vpop.f32.mrf.mxu0  ;;  %v5103_v51 = vpop.f32.mrf.mxu1 }
 0x471   :  { %v1151_v52 = vpop.f32.mrf.mxu1  ;;  %v1203_v54 = vpop.f32.mrf.mxu0 }
 0x472   :  { %v1566_v56 = vsel %vm296_vm2, %v1203_v54, -inf }
 0x473   :  { %v5104_v57 = vpop.f32.mrf.mxu1  ;;  %1567 = vmax.xlane.f32.xlu1 %v1566_v56  ;;  %v5109_v34 = vpop.f32.mrf.mxu0 }
 0x475   :  { %v1206_v58 = vpop.f32.mrf.mxu0  ;;  %v1254_v39 = vpop.f32.mrf.mxu1 }
 0x476   :  { %v1569_v59 = vsel %vm296_vm2, %v1254_v39, -inf }
 0x477   :  { %1570 = vmax.xlane.f32.xlu0 %v1569_v59  ;;  %v5110_v43 = vpop.f32.mrf.mxu0  ;;  %v5115_v35 = vpop.f32.mrf.mxu1 }
 0x479   :  { %v1257_v63 = vpop.f32.mrf.mxu1  ;;  %v1305_v55 = vpop.f32.mrf.mxu0 }
 0x47a   :  { %v1572_v21 = vsel %vm296_vm2, %v1305_v55, -inf }
 0x47b   :  { %v5116_v1 = vpop.f32.mrf.mxu1  ;;  %1573 = vmax.xlane.f32.xlu0 %v1572_v21  ;;  %v5121_v3 = vpop.f32.mrf.mxu0 }
 0x47d   :  { %v1308_v5 = vpop.f32.mrf.mxu0  ;;  %v1356_v9 = vpop.f32.mrf.mxu1 }
 0x47e   :  { %v1575_v7 = vsel %vm296_vm2, %v1356_v9, -inf }
 0x47f   :  { %v5127_v10 = vpop.f32.mrf.mxu1  ;;  %1576 = vmax.xlane.f32.xlu1 %v1575_v7  ;;  %v5122_v18 = vpop.f32.mrf.mxu0 }
 0x481   :  { %v1359_v22 = vpop.f32.mrf.mxu1  ;;  %v1407_v25 = vpop.f32.mrf.mxu0 }
 0x482   :  { %v1578_v32 = vsel %vm296_vm2, %v1407_v25, -inf }
 0x483   :  { %v5128_v12 = vpop.f32.mrf.mxu1  ;;  %1579 = vmax.xlane.f32.xlu0 %v1578_v32  ;;  %v5133_v23 = vpop.f32.mrf.mxu0 }
 0x485   :  { %v1410_v40 = vpop.f32.mrf.mxu0  ;;  %v1458_v41 = vpop.f32.mrf.mxu1 }
 0x486   :  { %v1581_v42 = vsel %vm296_vm2, %v1458_v41, -inf }
 0x487   :  { %v5139_v27 = vpop.f32.mrf.mxu1  ;;  %1582 = vmax.xlane.f32.xlu1 %v1581_v42  ;;  %v5134_v30 = vpop.f32.mrf.mxu0 }
 0x489   :  { %v1461_v45 = vpop.f32.mrf.mxu1  ;;  %v1509_v49 = vpop.f32.mrf.mxu0 }
 0x48a   :  { %v1584_v51 = vsel %vm296_vm2, %v1509_v49, -inf }
 0x48b   :  { %v5140_v52 = vpop.f32.mrf.mxu1  ;;  %1585 = vmax.xlane.f32.xlu0 %v1584_v51  ;;  %v5145_v56 = vpop.f32.mrf.mxu0 }
 0x48d   :  { %v1512_v57 = vpop.f32.mrf.mxu0  ;;  %v1560_v34 = vpop.f32.mrf.mxu1 }
 0x48e   :  { %v1587_v58 = vsel %vm296_vm2, %v1560_v34, -inf }
 0x48f   :  { %v5151_v59 = vpop.f32.mrf.mxu1  ;;  %1588 = vmax.xlane.f32.xlu1 %v1587_v58  ;;  %v5146_v43 = vpop.f32.mrf.mxu0 }
 0x491   :  { %v1563_v35 = vpop.f32.mrf.mxu1 }
 0x493   :  { %v5152_v63 = vpop.f32.mrf.mxu1 }
 0x4a0   :  { %1758 = vrot.lane.b32.xlu1 %v5866_v50, %s5754_s29 }
 0x4a1   :  { %1806 = vrot.lane.b32.xlu0 %v5877_v60, %s5754_s29 }
 0x4fc   :  { %v1568_v21 = vpop.xlane.xlu1 %1567 }
 0x4fd   :  { %v1590_v1 = vsub.f32 %v1203_v54, %v1568_v21 }
 0x4ff   :  { %v1598_v3 = vmul.f32 1.442695, %v1590_v1 }
 0x500   :  { %v1571_v5 = vpop.xlane.xlu0 %1570 }
 0x501   :  { %5536 = vpow2.f32 %v1598_v3  ;;  %v1591_v7 = vsub.f32 %v1254_v39, %v1571_v5 }
 0x503   :  { %v1600_v10 = vmul.f32 1.442695, %v1591_v7 }
 0x504   :  { %v1574_v18 = vpop.xlane.xlu0 %1573 }
 0x505   :  { %5538 = vpow2.f32 %v1600_v10  ;;  %v1592_v22 = vsub.f32 %v1305_v55, %v1574_v18 }
 0x507   :  { %v1602_v32 = vmul.f32 1.442695, %v1592_v22  ;;  %v5664_v22 = vld [vmem:[#allocation5 + $0x8] sm:$0xff] }
 0x508   :  { %v1577_v55 = vpop.xlane.xlu1 %1576 }
 0x509   :  { %5540 = vpow2.f32 %v1602_v32  ;;  %v1593_v27 = vsub.f32 %v1356_v9, %v1577_v55  ;;  %v4741_v32 = vcombine.low %v5664_v22, %v5664_v22 }
 0x50b   :  { %v1604_v52 = vmul.f32 1.442695, %v1593_v27 }
 0x50c   :  { %v1580_v30 = vpop.xlane.xlu0 %1579 }
 0x50d   :  { %v1594_v51 = vsub.f32 %v1407_v25, %v1580_v30  ;;  %5542 = vpow2.f32 %v1604_v52 }
 0x50e   :  { %v6198_v12 = vpop.eup %5536 }
 0x50f   :  { %v1614_v23 = vsel %vm296_vm2, %v6198_v12, 0.0  ;;  %v1606_v59 = vmul.f32 1.442695, %v1594_v51 }
 0x510   :  { %1615 = vadd.xlane.f32.xlu0 %v1614_v23  ;;  %v1583_v45 = vpop.xlane.xlu1 %1582  ;;  %v5665_v23 = vld [vmem:[#allocation5] sm:$0xff] }
 0x511   :  { %v1595_v56 = vsub.f32 %v1458_v41, %v1583_v45  ;;  %5544 = vpow2.f32 %v1606_v59 }
 0x512   :  { %v6202_v40 = vpop.eup %5538 }
 0x513   :  { %v1617_v54 = vsel %vm296_vm2, %v6202_v40, 0.0  ;;  %v1608_v35 = vmul.f32 1.442695, %v1595_v56 }
 0x514   :  { %1618 = vadd.xlane.f32.xlu1 %v1617_v54  ;;  %v1586_v57 = vpop.xlane.xlu0 %1585  ;;  %v4746_v54 = vcombine.low %v5665_v23, %v5665_v23 }
 0x515   :  { %v1596_v43 = vsub.f32 %v1509_v49, %v1586_v57  ;;  %5546 = vpow2.f32 %v1608_v35 }
 0x516   :  { %v6206_v42 = vpop.eup %5540 }
 0x517   :  { %v1620_v39 = vsel %vm296_vm2, %v6206_v42, 0.0  ;;  %v1610_v21 = vmul.f32 1.442695, %v1596_v43 }
 0x518   :  { %1621 = vadd.xlane.f32.xlu0 %v1620_v39  ;;  %v1589_v58 = vpop.xlane.xlu1 %1588  ;;  %v1807_v39 = vpop.permute.xlu0 %1806 }
 0x519   :  { %v1597_v63 = vsub.f32 %v1560_v34, %v1589_v58  ;;  %5548 = vpow2.f32 %v1610_v21 }
 0x51a   :  { %v6214_v3 = vpop.eup %5542 }
 0x51b   :  { %v1612_v1 = vmul.f32 1.442695, %v1597_v63  ;;  %v1623_v25 = vsel %vm296_vm2, %v6214_v3, 0.0  ;;  %v1812_v63 = vsel %vm767_vm3, %v1807_v39, 0 }
 0x51c   :  { %v1759_v55 = vpop.permute.xlu1 %1758 }
 0x51d   :  { %5550 = vpow2.f32 %v1612_v1  ;;  %v1764_v58 = vsel %vm767_vm3, %v1759_v55, 0 }
 0x51e   :  { %v6216_v9 = vpop.eup %5544 }
 0x51f   :  { %v1626_v5 = vsel %vm296_vm2, %v6216_v9, 0.0 }
 0x522   :  { %v6220_v41 = vpop.eup %5546 }
 0x523   :  { %v1629_v34 = vsel %vm296_vm2, %v6220_v41, 0.0 }
 0x525   :  { %1854 = vrot.lane.b32.xlu1 %v5891_v4, %s5754_s29 }
 0x526   :  { %v6222_v49 = vpop.eup %5548 }
 0x527   :  { %v1632_v18 = vsel %vm296_vm2, %v6222_v49, 0.0 }
 0x52a   :  { %v6228_v7 = vpop.eup %5550 }
 0x52b   :  { %v1635_v10 = vsel %vm296_vm2, %v6228_v7, 0.0 }
 0x52e   :  { %1902 = vrot.lane.b32.xlu0 %v5916_v14, %s5754_s29 }
 0x549   :  { %1624 = vadd.xlane.f32.xlu1 %v1623_v25 }
 0x54d   :  { %1630 = vadd.xlane.f32.xlu1 %v1629_v34  ;;  %1627 = vadd.xlane.f32.xlu0 %v1626_v5 }
 0x551   :  { %1636 = vadd.xlane.f32.xlu1 %v1635_v10  ;;  %1633 = vadd.xlane.f32.xlu0 %v1632_v18 }
 0x562   :  { %1950 = vrot.lane.b32.xlu1 %v5928_v19, %s5754_s29 }
 0x566   :  { %2051 = vrot.lane.b32.xlu1 %v4741_v32, %s5755_s30 }
 0x567   :  { %1998 = vrot.lane.b32.xlu0 %v5941_v26, %s5754_s29 }
 0x56a   :  { %2218 = vrot.lane.b32.xlu1 %v5868_v53, %s5756_s7 }
 0x56b   :  { %2134 = vrot.lane.b32.xlu0 %v4746_v54, %s5755_s30 }
 0x56e   :  { %2216 = vrot.lane.b32.xlu1 %v5888_v2, %s5756_s7 }
 0x56f   :  { %2268 = vrot.lane.b32.xlu0 %v5879_v61, %s5756_s7 }
 0x572   :  { %2318 = vrot.lane.b32.xlu1 %v5866_v50, %s5756_s7 }
 0x573   :  { %2266 = vrot.lane.b32.xlu0 %v5903_v8, %s5756_s7 }
 0x576   :  { %2316 = vrot.lane.b32.xlu1 %v5912_v11, %s5756_s7 }
 0x577   :  { %2368 = vrot.lane.b32.xlu0 %v5877_v60, %s5756_s7 }
 0x57a   :  { %2418 = vrot.lane.b32.xlu1 %v5891_v4, %s5756_s7 }
 0x57b   :  { %2366 = vrot.lane.b32.xlu0 %v5924_v16, %s5756_s7 }
 0x57e   :  { %2416 = vrot.lane.b32.xlu1 %v5936_v24, %s5756_s7 }
 0x57f   :  { %2468 = vrot.lane.b32.xlu0 %v5916_v14, %s5756_s7 }
 0x582   :  { %2518 = vrot.lane.b32.xlu1 %v5928_v19, %s5756_s7 }
 0x583   :  { %2466 = vrot.lane.b32.xlu0 %v5951_v29, %s5756_s7 }
 0x586   :  { %2516 = vrot.lane.b32.xlu1 %v5960_v31, %s5756_s7 }
 0x587   :  { %2568 = vrot.lane.b32.xlu0 %v5941_v26, %s5756_s7 }
 0x58b   :  { %2566 = vrot.lane.b32.xlu0 %v5969_v33, %s5756_s7 }
 0x599   :  { %v1616_v27 = vpop.xlane.xlu0 %1615 }
 0x59a   :  { %5552 = vrcp.f32 %v1616_v27 }
 0x59d   :  { %v1619_v30 = vpop.xlane.xlu1 %1618 }
 0x59e   :  { %5554 = vrcp.f32 %v1619_v30 }
 0x5a1   :  { %v1622_v45 = vpop.xlane.xlu0 %1621  ;;  %v1855_v21 = vpop.permute.xlu1 %1854 }
 0x5a2   :  { %5556 = vrcp.f32 %v1622_v45  ;;  %v1860_v1 = vsel %vm767_vm3, %v1855_v21, 0 }
 0x5a5   :  { %v1903_v25 = vpop.permute.xlu0 %1902 }
 0x5a6   :  { %v1908_v55 = vsel %vm767_vm3, %v1903_v25, 0 }
 0x5a7   :  { %v5553_v51 = vpop.eup %5552 }
 0x5a8   :  { %v1646_v52 = vmul.f32 %v5553_v51, %v6198_v12 }
 0x5aa   :  { %v1654_v56 = vpack.c.bf16 %v1646_v52, %v1646_v52 }
 0x5ab   :  { %v5555_v57 = vpop.eup %5554 }
 0x5ac   :  { %5156 = vmatmul.mubr.msk.bf16.vlgmr.msra.gmra.mxu0 %vm296_vm2, %v1654_v56  ;;  %v1647_v59 = vmul.f32 %v5555_v57, %v6202_v40 }
 0x5ad   :  { %5166 = vmatpush3.bf16.msra.mxu0 %v1764_v58  ;;  %5167 = vmatprep.mubr.msk.bf16.mxu0 %vm5752_vm1, %v5751_v37 }
 0x5ae   :  { %v1655_v43 = vpack.c.bf16 %v1647_v59, %v1647_v59  ;;  %5177 = vmatprep.subr.bf16.mxu0 %v5751_v37 }
 0x5af   :  { %v5557_v35 = vpop.eup %5556 }
 0x5b0   :  { %5162 = vmatmul.mubr.msk.bf16.vlgmr.msra.gmra.mxu1 %vm296_vm2, %v1655_v43  ;;  %v1648_v12 = vmul.f32 %v5557_v35, %v6206_v42 }
 0x5b1   :  { %5172 = vmatpush3.bf16.msra.mxu1 %v1812_v63  ;;  %5173 = vmatprep.mubr.msk.bf16.mxu1 %vm5752_vm1, %v5751_v37 }
 0x5b2   :  { %v1656_v40 = vpack.c.bf16 %v1648_v12, %v1648_v12  ;;  %5183 = vmatprep.subr.bf16.mxu1 %v5751_v37 }
 0x5b4   :  { %5168 = vmatmul.mubr.msk.bf16.vlgmr.msra.gmra.mxu0 %vm296_vm2, %v1656_v40 }
 0x5b5   :  { %5178 = vmatpush3.bf16.msra.mxu0 %v1860_v1  ;;  %5179 = vmatprep.mubr.msk.bf16.mxu0 %vm5752_vm1, %v5751_v37 }
 0x5b6   :  { %5189 = vmatprep.subr.bf16.mxu0 %v5751_v37 }
 0x5d2   :  { %v1625_v42 = vpop.xlane.xlu1 %1624 }
 0x5d3   :  { %5558 = vrcp.f32 %v1625_v42 }
 0x5d6   :  { %v1631_v34 = vpop.xlane.xlu1 %1630  ;;  %v1628_v5 = vpop.xlane.xlu0 %1627 }
 0x5d7   :  { %5560 = vrcp.f32 %v1631_v34 }
 0x5d8   :  { %5562 = vrcp.f32 %v1628_v5 }
 0x5da   :  { %v1634_v10 = vpop.xlane.xlu0 %1633  ;;  %v1637_v18 = vpop.xlane.xlu1 %1636 }
 0x5db   :  { %5564 = vrcp.f32 %v1634_v10 }
 0x5dc   :  { %5566 = vrcp.f32 %v1637_v18 }
 0x5de   :  { %v1951_v27 = vpop.permute.xlu1 %1950  ;;  %v1999_v51 = vpop.permute.xlu0 %1998 }
 0x5df   :  { %v1956_v56 = vsel %vm767_vm3, %v1951_v27, 0 }
 0x5e0   :  { %v5559_v22 = vpop.eup %5558 }
 0x5e1   :  { %v1649_v32 = vmul.f32 %v5559_v22, %v6214_v3 }
 0x5e2   :  { %v2052_v57 = vpop.permute.xlu1 %2051  ;;  %v2135_v43 = vpop.permute.xlu0 %2134 }
 0x5e3   :  { %v1657_v23 = vpack.c.bf16 %v1649_v32, %v1649_v32 }
 0x5e4   :  { %v5561_v54 = vpop.eup %5560 }
 0x5e5   :  { %v5563_v39 = vpop.eup %5562  ;;  %5174 = vmatmul.mubr.msk.bf16.vlgmr.msra.gmra.mxu1 %vm296_vm2, %v1657_v23  ;;  %v1651_v45 = vmul.f32 %v5561_v54, %v6220_v41  ;;  %v2004_v41 = vsel %vm767_vm3, %v1999_v51, 0 }
 0x5e6   :  { %5184 = vmatpush3.bf16.msra.mxu1 %v1908_v55  ;;  %v1650_v30 = vmul.f32 %v5563_v39, %v6216_v9  ;;  %5185 = vmatprep.mubr.msk.bf16.mxu1 %vm5752_vm1, %v5751_v37  ;;  %v2269_v21 = vpop.permute.xlu0 %2268  ;;  %v2219_v39 = vpop.permute.xlu1 %2218 }
 0x5e7   :  { %5195 = vmatprep.subr.bf16.mxu1 %v5751_v37  ;;  %v1659_v58 = vpack.c.bf16 %v1651_v45, %v1651_v45  ;;  %v2274_v1 = vsel %vm296_vm2, %v2269_v21, 0  ;;  %v2224_v45 = vsel %vm296_vm2, %v2219_v39, 0 }
 0x5e8   :  { %v1658_v3 = vpack.c.bf16 %v1650_v30, %v1650_v30  ;;  %v5565_v52 = vpop.eup %5564 }
 0x5e9   :  { %v5567_v9 = vpop.eup %5566  ;;  %v1652_v59 = vmul.f32 %v5565_v52, %v6222_v49  ;;  %v2149_v49 = vsel %vm767_vm3, %v2135_v43, 0 }
 0x5ea   :  { %5180 = vmatmul.mubr.msk.bf16.vlgmr.msra.gmra.mxu0 %vm296_vm2, %v1658_v3  ;;  %v1653_v35 = vmul.f32 %v5567_v9, %v6228_v7  ;;  %v2066_v7 = vsel %vm767_vm3, %v2052_v57, 0  ;;  %v2267_v40 = vpop.permute.xlu0 %2266 }
 0x5eb   :  { %5190 = vmatpush3.bf16.msra.mxu0 %v1956_v56  ;;  %5191 = vmatprep.mubr.msk.bf16.mxu0 %vm5752_vm1, %v5751_v37  ;;  %v1660_v63 = vpack.c.bf16 %v1652_v59, %v1652_v59  ;;  %v2217_v59 = vpop.permute.xlu1 %2216 }
 0x5ec   :  { %5469 = vmatprep.subr.msk.bf16.mxu0 %vm767_vm3, %v2052_v57  ;;  %v1661_v12 = vpack.c.bf16 %v1653_v35, %v1653_v35 }
 0x5ed   :  { %5186 = vmatmul.mubr.msk.bf16.vlgmr.msra.gmra.mxu1 %vm296_vm2, %v1659_v58 }
 0x5ee   :  { %5196 = vmatpush3.bf16.msra.mxu1 %v2004_v41  ;;  %5197 = vmatprep.mubr.msk.bf16.mxu1 %vm5752_vm1, %v5751_v37  ;;  %v2369_v48 = vpop.permute.xlu0 %2368 }
 0x5ef   :  { %5470 = vmatprep.subr.msk.bf16.mxu1 %vm767_vm3, %v2135_v43  ;;  %v2319_v21 = vpop.permute.xlu1 %2318 }
 0x5f2   :  { %5192 = vmatmul.mubr.msk.bf16.vlgmr.msra.gmra.mxu0 %vm296_vm2, %v1660_v63  ;;  %v2367_v0 = vpop.permute.xlu0 %2366 }
 0x5f3   :  { %5202 = vmatpush3.bf16.msra.mxu0 %v2066_v7 }
 0x5f4   :  { %5221 = vmatprep.subr.bf16.mxu0 %v5751_v37 }
 0x5f5   :  { %5198 = vmatmul.mubr.msk.bf16.vlgmr.msra.gmra.mxu1 %vm296_vm2, %v1661_v12 }
 0x5f6   :  { %5213 = vmatprep.mubr.msk.bf16.mxu1 %vm296_vm2, %v1154_v62  ;;  %5212 = vmatpush3.bf16.msra.mxu1 %v2149_v49  ;;  %v2374_v62 = vsel %vm296_vm2, %v2369_v48, 0  ;;  %v2469_v6 = vpop.permute.xlu0 %2468 }
 0x5f7   :  { %5227 = vmatprep.subr.bf16.mxu1 %v5751_v37 }
 0x5fa   :  { %v2467_v13 = vpop.permute.xlu0 %2466 }
 0x5fd   :  { %5214 = vmatmul.mubr.msk.bf16.vlgmr.msra.gmra.mxu1 %vm296_vm2, %v1155_v15  ;;  %v2474_v15 = vsel %vm296_vm2, %v2469_v6, 0  ;;  %v2317_v6 = vpop.permute.xlu1 %2316 }
 0x5fe   :  { %5228 = vmatpush3.bf16.xpose.msra.mxu1 %v2274_v1  ;;  %5217 = vmatprep.mubr.msk.bf16.mxu1 %vm296_vm2, %v1156_v38  ;;  %v2569_v28 = vpop.permute.xlu0 %2568 }
 0x5ff   :  { %5239 = vmatprep.subr.bf16.mxu1 %v5751_v37  ;;  %v2574_v36 = vsel %vm296_vm2, %v2569_v28, 0 }
 0x602   :  { %v2567_v38 = vpop.permute.xlu0 %2566 }
 0x605   :  { %5218 = vmatmul.mubr.msk.bf16.gmra.mxu1 %vm296_vm2, %v1157_v47 }
 0x606   :  { %5229 = vmatprep.mubr.msk.bf16.mxu1 %vm5752_vm1, %v5751_v37 }
 0x60d   :  { %5230 = vmatmul.mubr.msk.bf16.vlgmr.msra.gmra.mxu1 %vm296_vm2, %v2267_v40 }
 0x60e   :  { %5240 = vmatpush3.bf16.xpose.msra.mxu1 %v2374_v62  ;;  %5241 = vmatprep.mubr.msk.bf16.mxu1 %vm5752_vm1, %v5751_v37 }
 0x60f   :  { %5251 = vmatprep.subr.bf16.mxu1 %v5751_v37 }
 0x615   :  { %5242 = vmatmul.mubr.msk.bf16.vlgmr.msra.gmra.mxu1 %vm296_vm2, %v2367_v0 }
 0x616   :  { %5252 = vmatpush3.bf16.xpose.msra.mxu1 %v2474_v15  ;;  %5253 = vmatprep.mubr.msk.bf16.mxu1 %vm5752_vm1, %v5751_v37 }
 0x617   :  { %5263 = vmatprep.subr.bf16.mxu1 %v5751_v37 }
 0x61d   :  { %5254 = vmatmul.mubr.msk.bf16.vlgmr.msra.gmra.mxu1 %vm296_vm2, %v2467_v13 }
 0x61e   :  { %5264 = vmatpush3.bf16.xpose.msra.mxu1 %v2574_v36  ;;  %5265 = vmatprep.mubr.msk.bf16.mxu1 %vm5752_vm1, %v5751_v37  ;;  %v2324_v36 = vsel %vm296_vm2, %v2319_v21, 0 }
 0x61f   :  { %5275 = vmatprep.subr.bf16.mxu1 %v5751_v37 }
 0x625   :  { %5266 = vmatmul.mubr.msk.bf16.vlgmr.msra.gmra.mxu1 %vm296_vm2, %v2567_v38  ;;  %v2419_v38 = vpop.permute.xlu1 %2418 }
 0x626   :  { %5277 = vmatprep.mubr.msk.bf16.mxu1 %vm5752_vm1, %v5751_v37 }
 0x66c   :  { %v1704_v44 = vpop.f32.mrf.mxu0 }
 0x66e   :  { %v5157_v46 = vpop.f32.mrf.mxu0 }
 0x670   :  { %v1707_v47 = vpop.f32.mrf.mxu0  ;;  %v1752_v25 = vpop.f32.mrf.mxu1 }
 0x671   :  { %v2046_v42 = vpack.c.bf16 %v1752_v25, %v1704_v44  ;;  %v2417_v25 = vpop.permute.xlu1 %2416 }
 0x672   :  { %v5158_v34 = vpop.f32.mrf.mxu0  ;;  %v5163_v5 = vpop.f32.mrf.mxu1 }
 0x673   :  { %5203 = vmatprep.mubr.msk.bf16.mxu0 %vm296_vm2, %v2046_v42  ;;  %v2424_v34 = vsel %vm296_vm2, %v2419_v38, 0 }
 0x674   :  { %v1755_v10 = vpop.f32.mrf.mxu1  ;;  %v1800_v18 = vpop.f32.mrf.mxu0 }
 0x676   :  { %v5164_v22 = vpop.f32.mrf.mxu1  ;;  %v5169_v32 = vpop.f32.mrf.mxu0 }
 0x678   :  { %v1803_v23 = vpop.f32.mrf.mxu0 }
 0x67a   :  { %v5170_v54 = vpop.f32.mrf.mxu0 }
 0x6a5   :  { %v1848_v55 = vpop.f32.mrf.mxu1 }
 0x6a6   :  { %v2047_v27 = vpack.c.bf16 %v1848_v55, %v1800_v18  ;;  %v2519_v18 = vpop.permute.xlu1 %2518 }
 0x6a7   :  { %v5175_v30 = vpop.f32.mrf.mxu1  ;;  %v2524_v54 = vsel %vm296_vm2, %v2519_v18, 0 }
 0x6a8   :  { %5204 = vmatmul.mubr.msk.bf16.vlgmr.msra.gmra.mxu0 %vm296_vm2, %v2047_v27 }
 0x6a9   :  { %5222 = vmatpush3.bf16.xpose.msra.mxu0 %v2224_v45  ;;  %v1851_v51 = vpop.f32.mrf.mxu1 }
 0x6aa   :  { %v1896_v3 = vpop.f32.mrf.mxu0  ;;  %5233 = vmatprep.subr.bf16.mxu0 %v5751_v37  ;;  %v2517_v30 = vpop.permute.xlu1 %2516 }
 0x6ab   :  { %v5176_v52 = vpop.f32.mrf.mxu1 }
 0x6ac   :  { %v5181_v56 = vpop.f32.mrf.mxu0 }
 0x6ad   :  { %v1944_v57 = vpop.f32.mrf.mxu1 }
 0x6ae   :  { %v1899_v58 = vpop.f32.mrf.mxu0  ;;  %v2048_v9 = vpack.c.bf16 %v1944_v57, %v1896_v3 }
 0x6af   :  { %v5187_v41 = vpop.f32.mrf.mxu1 }
 0x6b0   :  { %v5182_v43 = vpop.f32.mrf.mxu0  ;;  %5207 = vmatprep.mubr.msk.bf16.mxu0 %vm296_vm2, %v2048_v9 }
 0x6b1   :  { %v1947_v35 = vpop.f32.mrf.mxu1 }
 0x6b2   :  { %v1992_v63 = vpop.f32.mrf.mxu0 }
 0x6b3   :  { %v5188_v12 = vpop.f32.mrf.mxu1 }
 0x6b4   :  { %v5193_v49 = vpop.f32.mrf.mxu0 }
 0x6b5   :  { %v2040_v7 = vpop.f32.mrf.mxu1 }
 0x6b6   :  { %v1995_v40 = vpop.f32.mrf.mxu0  ;;  %v2049_v1 = vpack.c.bf16 %v2040_v7, %v1992_v63 }
 0x6b7   :  { %v5199_v48 = vpop.f32.mrf.mxu1 }
 0x6b8   :  { %v5194_v0 = vpop.f32.mrf.mxu0  ;;  %5208 = vmatmul.mubr.msk.bf16.gmra.mxu0 %vm296_vm2, %v2049_v1 }
 0x6b9   :  { %v2043_v62 = vpop.f32.mrf.mxu1  ;;  %5223 = vmatprep.mubr.msk.bf16.mxu0 %vm5752_vm1, %v5751_v37 }
 0x6bb   :  { %v5200_v13 = vpop.f32.mrf.mxu1 }
 0x6bd   :  { %v6346_v15 = vpop.f32.mrf.mxu1 }
 0x6bf   :  { %v6348_v28 = vpop.f32.mrf.mxu1 }
 0x6c0   :  { %5224 = vmatmul.mubr.msk.bf16.vlgmr.msra.gmra.mxu0 %vm296_vm2, %v2217_v59 }
 0x6c1   :  { %5234 = vmatpush3.bf16.xpose.msra.mxu0 %v2324_v36  ;;  %v6352_v44 = vpop.f32.mrf.mxu1  ;;  %5235 = vmatprep.mubr.msk.bf16.mxu0 %vm5752_vm1, %v5751_v37 }
 0x6c2   :  { %5245 = vmatprep.subr.bf16.mxu0 %v5751_v37 }
 0x6c3   :  { %v6357_v46 = vpop.f32.mrf.mxu1 }
 0x6c5   :  { %v6359_v47 = vpop.f32.mrf.mxu1 }
 0x6c7   :  { %v6361_v42 = vpop.f32.mrf.mxu1 }
 0x6c8   :  { %5236 = vmatmul.mubr.msk.bf16.vlgmr.msra.gmra.mxu0 %vm296_vm2, %v2317_v6 }
 0x6c9   :  { %5246 = vmatpush3.bf16.xpose.msra.mxu0 %v2424_v34  ;;  %v6365_v5 = vpop.f32.mrf.mxu1  ;;  %5247 = vmatprep.mubr.msk.bf16.mxu0 %vm5752_vm1, %v5751_v37 }
 0x6ca   :  { %5257 = vmatprep.subr.bf16.mxu0 %v5751_v37 }
 0x6cb   :  { %v6370_v10 = vpop.f32.mrf.mxu1 }
 0x6cd   :  { %v2310_v22 = vpop.f32.mrf.mxu1 }
 0x6ce   :  { %v2619_v32 = vsel %vm296_vm2, %v2310_v22, -inf }
 0x6cf   :  { %2620 = vmax.xlane.f32.xlu0 %v2619_v32  ;;  %v5231_v23 = vpop.f32.mrf.mxu1 }
 0x6d0   :  { %5248 = vmatmul.mubr.msk.bf16.vlgmr.msra.gmra.mxu0 %vm296_vm2, %v2417_v25 }
 0x6d1   :  { %5258 = vmatpush3.bf16.xpose.msra.mxu0 %v2524_v54  ;;  %v2313_v39 = vpop.f32.mrf.mxu1  ;;  %5259 = vmatprep.mubr.msk.bf16.mxu0 %vm5752_vm1, %v5751_v37 }
 0x6d2   :  { %5269 = vmatprep.subr.bf16.mxu0 %v5751_v37 }
 0x6d3   :  { %v5232_v55 = vpop.f32.mrf.mxu1 }
 0x6d5   :  { %v6378_v27 = vpop.f32.mrf.mxu1 }
 0x6d6   :  { %v2625_v18 = vsel %vm296_vm2, %v6378_v27, -inf }
 0x6d7   :  { %v5243_v45 = vpop.f32.mrf.mxu1 }
 0x6d8   :  { %5260 = vmatmul.mubr.msk.bf16.vlgmr.msra.gmra.mxu0 %vm296_vm2, %v2517_v30 }
 0x6d9   :  { %v2413_v51 = vpop.f32.mrf.mxu1  ;;  %5271 = vmatprep.mubr.msk.bf16.mxu0 %vm5752_vm1, %v5751_v37 }
 0x6db   :  { %v5244_v3 = vpop.f32.mrf.mxu1 }
 0x6dd   :  { %v6383_v52 = vpop.f32.mrf.mxu1 }
 0x6de   :  { %v2631_v23 = vsel %vm296_vm2, %v6383_v52, -inf }
 0x6df   :  { %v5255_v56 = vpop.f32.mrf.mxu1 }
 0x6e1   :  { %v2513_v57 = vpop.f32.mrf.mxu1 }
 0x6e3   :  { %v5256_v58 = vpop.f32.mrf.mxu1 }
 0x6e5   :  { %2712 = vrot.lane.b32.xlu0 %v5868_v53, %s5757_s8  ;;  %v6387_v9 = vpop.f32.mrf.mxu1 }
 0x6e6   :  { %v2637_v30 = vsel %vm296_vm2, %v6387_v9, -inf }
 0x6e7   :  { %v5267_v59 = vpop.f32.mrf.mxu1 }
 0x6e9   :  { %v2613_v41 = vpop.f32.mrf.mxu1 }
 0x6eb   :  { %v5268_v43 = vpop.f32.mrf.mxu1 }
 0x758   :  { %v2621_v35 = vpop.xlane.xlu0 %2620 }
 0x759   :  { %v2641_v48 = vsub.f32 %v2310_v22, %v2621_v35 }
 0x75b   :  { %v2650_v6 = vmul.f32 1.442695, %v2641_v48 }
 0x75c   :  { %v2713_v63 = vpop.permute.xlu0 %2712 }
 0x75d   :  { %v2718_v12 = vsel %vm767_vm3, %v2713_v63, 0  ;;  %5568 = vpow2.f32 %v2650_v6 }
 0x75e   :  { %5270 = vmatpush3.bf16.msra.mxu0 %v2718_v12 }
 0x75f   :  { %5281 = vmatprep.subr.bf16.mxu0 %v5751_v37 }
 0x768   :  { %v6391_v49 = vpop.f32.mrf.mxu0 }
 0x76a   :  { %v6393_v21 = vpop.f32.mrf.mxu0  ;;  %v6415_v45 = vpop.eup %5568 }
 0x76b   :  { %v2667_v56 = vsel %vm296_vm2, %v6415_v45, 0.0 }
 0x76c   :  { %v6395_v7 = vpop.f32.mrf.mxu0 }
 0x76e   :  { %v6397_v40 = vpop.f32.mrf.mxu0 }
 0x778   :  { %v6399_v1 = vpop.f32.mrf.mxu0 }
 0x77a   :  { %v6401_v0 = vpop.f32.mrf.mxu0 }
 0x77c   :  { %v6403_v62 = vpop.f32.mrf.mxu0 }
 0x77e   :  { %v6405_v13 = vpop.f32.mrf.mxu0 }
 0x780   :  { %v2260_v36 = vpop.f32.mrf.mxu0 }
 0x781   :  { %v2616_v38 = vsel %vm296_vm2, %v2260_v36, -inf }
 0x782   :  { %2617 = vmax.xlane.f32.xlu1 %v2616_v38  ;;  %v5225_v25 = vpop.f32.mrf.mxu0 }
 0x784   :  { %v2263_v34 = vpop.f32.mrf.mxu0 }
 0x786   :  { %2626 = vmax.xlane.f32.xlu1 %v2625_v18  ;;  %v5226_v32 = vpop.f32.mrf.mxu0 }
 0x788   :  { %v2360_v22 = vpop.f32.mrf.mxu0 }
 0x789   :  { %v2622_v54 = vsel %vm296_vm2, %v2360_v22, -inf }
 0x78a   :  { %2632 = vmax.xlane.f32.xlu1 %v2631_v23  ;;  %2623 = vmax.xlane.f32.xlu0 %v2622_v54  ;;  %v5237_v39 = vpop.f32.mrf.mxu0 }
 0x78c   :  { %v2363_v55 = vpop.f32.mrf.mxu0 }
 0x78e   :  { %2638 = vmax.xlane.f32.xlu1 %v2637_v30  ;;  %v5238_v51 = vpop.f32.mrf.mxu0 }
 0x790   :  { %v2460_v3 = vpop.f32.mrf.mxu0 }
 0x791   :  { %v2628_v57 = vsel %vm296_vm2, %v2460_v3, -inf }
 0x792   :  { %2668 = vadd.xlane.f32.xlu1 %v2667_v56  ;;  %2629 = vmax.xlane.f32.xlu0 %v2628_v57  ;;  %v5249_v58 = vpop.f32.mrf.mxu0 }
 0x794   :  { %v2463_v59 = vpop.f32.mrf.mxu0 }
 0x796   :  { %v5250_v41 = vpop.f32.mrf.mxu0 }
 0x798   :  { %v2560_v43 = vpop.f32.mrf.mxu0 }
 0x799   :  { %v2634_v35 = vsel %vm296_vm2, %v2560_v43, -inf }
 0x79a   :  { %2635 = vmax.xlane.f32.xlu0 %v2634_v35  ;;  %v5261_v63 = vpop.f32.mrf.mxu0 }
 0x79c   :  { %v2563_v12 = vpop.f32.mrf.mxu0 }
 0x79e   :  { %v5262_v48 = vpop.f32.mrf.mxu0 }
 0x7b0   :  { %2856 = vrot.lane.b32.xlu0 %v5877_v60, %s5757_s8 }
 0x80b   :  { %v2618_v6 = vpop.xlane.xlu1 %2617 }
 0x80c   :  { %v2640_v38 = vsub.f32 %v2260_v36, %v2618_v6 }
 0x80e   :  { %v2648_v25 = vmul.f32 1.442695, %v2640_v38 }
 0x80f   :  { %v2627_v34 = vpop.xlane.xlu1 %2626 }
 0x810   :  { %5570 = vpow2.f32 %v2648_v25  ;;  %v2643_v18 = vsub.f32 %v6378_v27, %v2627_v34 }
 0x812   :  { %v2654_v32 = vmul.f32 1.442695, %v2643_v18 }
 0x813   :  { %v2633_v23 = vpop.xlane.xlu1 %2632  ;;  %v2624_v54 = vpop.xlane.xlu0 %2623 }
 0x814   :  { %5572 = vpow2.f32 %v2654_v32  ;;  %v2645_v39 = vsub.f32 %v6383_v52, %v2633_v23  ;;  %v2642_v55 = vsub.f32 %v2360_v22, %v2624_v54 }
 0x816   :  { %v2658_v30 = vmul.f32 1.442695, %v2645_v39  ;;  %v2652_v51 = vmul.f32 1.442695, %v2642_v55 }
 0x817   :  { %v2639_v35 = vpop.xlane.xlu1 %2638 }
 0x818   :  { %5574 = vpow2.f32 %v2658_v30  ;;  %v2647_v48 = vsub.f32 %v6387_v9, %v2639_v35 }
 0x819   :  { %5576 = vpow2.f32 %v2652_v51 }
 0x81a   :  { %v2662_v25 = vmul.f32 1.442695, %v2647_v48 }
 0x81b   :  { %v2630_v41 = vpop.xlane.xlu0 %2629 }
 0x81c   :  { %v2644_v63 = vsub.f32 %v2460_v3, %v2630_v41 }
 0x81d   :  { %v6425_v56 = vpop.eup %5570 }
 0x81e   :  { %v2664_v36 = vsel %vm296_vm2, %v6425_v56, 0.0  ;;  %v2656_v6 = vmul.f32 1.442695, %v2644_v63 }
 0x81f   :  { %2665 = vadd.xlane.f32.xlu0 %v2664_v36 }
 0x820   :  { %5578 = vpow2.f32 %v2656_v6 }
 0x821   :  { %v6429_v57 = vpop.eup %5572  ;;  %5580 = vpow2.f32 %v2662_v25 }
 0x822   :  { %v2673_v27 = vsel %vm296_vm2, %v6429_v57, 0.0 }
 0x823   :  { %2674 = vadd.xlane.f32.xlu1 %v2673_v27  ;;  %v2636_v12 = vpop.xlane.xlu0 %2635 }
 0x824   :  { %v2646_v38 = vsub.f32 %v2560_v43, %v2636_v12  ;;  %v5666_v43 = vld [vmem:[#allocation5 + $0x10] sm:$0xff] }
 0x825   :  { %v6433_v58 = vpop.eup %5574  ;;  %v4767_v39 = vcombine.low %v5666_v43, %v5666_v43 }
 0x826   :  { %v6435_v52 = vpop.eup %5576  ;;  %v2679_v22 = vsel %vm296_vm2, %v6433_v58, 0.0  ;;  %v2660_v34 = vmul.f32 1.442695, %v2646_v38 }
 0x827   :  { %2680 = vadd.xlane.f32.xlu1 %v2679_v22  ;;  %v2670_v59 = vsel %vm296_vm2, %v6435_v52, 0.0 }
 0x828   :  { %2671 = vadd.xlane.f32.xlu0 %v2670_v59  ;;  %5582 = vpow2.f32 %v2660_v34 }
 0x82d   :  { %v6448_v18 = vpop.eup %5578 }
 0x82e   :  { %v6450_v32 = vpop.eup %5580  ;;  %v2676_v23 = vsel %vm296_vm2, %v6448_v18, 0.0 }
 0x82f   :  { %v2685_v9 = vsel %vm296_vm2, %v6450_v32, 0.0 }
 0x835   :  { %v6454_v54 = vpop.eup %5582 }
 0x836   :  { %v2682_v3 = vsel %vm296_vm2, %v6454_v54, 0.0 }
 0x838   :  { %2760 = vrot.lane.b32.xlu1 %v5879_v61, %s5757_s8 }
 0x83c   :  { %2808 = vrot.lane.b32.xlu1 %v5866_v50, %s5757_s8 }
 0x83e   :  { %2952 = vrot.lane.b32.xlu0 %v5916_v14, %s5757_s8 }
 0x85d   :  { %2677 = vadd.xlane.f32.xlu0 %v2676_v23 }
 0x860   :  { %2686 = vadd.xlane.f32.xlu1 %v2685_v9 }
 0x861   :  { %2683 = vadd.xlane.f32.xlu0 %v2682_v3 }
 0x871   :  { %2904 = vrot.lane.b32.xlu1 %v5891_v4, %s5757_s8 }
 0x875   :  { %3000 = vrot.lane.b32.xlu1 %v5928_v19, %s5757_s8 }
 0x877   :  { %3048 = vrot.lane.b32.xlu0 %v5941_v26, %s5757_s8 }
 0x879   :  { %3193 = vrot.lane.b32.xlu1 %v5868_v53, %s5758_s1 }
 0x87b   :  { %3101 = vrot.lane.b32.xlu0 %v4767_v39, %s5755_s30 }
 0x87d   :  { %3191 = vrot.lane.b32.xlu1 %v5888_v2, %s5758_s1  ;;  %v2669_v2 = vpop.xlane.xlu1 %2668 }
 0x87e   :  { %5584 = vrcp.f32 %v2669_v2 }
 0x87f   :  { %3243 = vrot.lane.b32.xlu0 %v5879_v61, %s5758_s1 }
 0x881   :  { %3241 = vrot.lane.b32.xlu1 %v5903_v8, %s5758_s1  ;;  %v2857_v8 = vpop.permute.xlu0 %2856 }
 0x882   :  { %v2862_v59 = vsel %vm767_vm3, %v2857_v8, 0 }
 0x883   :  { %3293 = vrot.lane.b32.xlu0 %v5866_v50, %s5758_s1 }
 0x885   :  { %3343 = vrot.lane.b32.xlu1 %v5877_v60, %s5758_s1 }
 0x887   :  { %3291 = vrot.lane.b32.xlu0 %v5912_v11, %s5758_s1 }
 0x889   :  { %3341 = vrot.lane.b32.xlu1 %v5924_v16, %s5758_s1 }
 0x88b   :  { %3393 = vrot.lane.b32.xlu0 %v5891_v4, %s5758_s1  ;;  %v5585_v55 = vpop.eup %5584 }
 0x88d   :  { %3443 = vrot.lane.b32.xlu1 %v5916_v14, %s5758_s1 }
 0x88f   :  { %3391 = vrot.lane.b32.xlu0 %v5936_v24, %s5758_s1 }
 0x891   :  { %3441 = vrot.lane.b32.xlu1 %v5951_v29, %s5758_s1  ;;  %v2697_v29 = vmul.f32 %v5585_v55, %v6415_v45 }
 0x893   :  { %3493 = vrot.lane.b32.xlu0 %v5928_v19, %s5758_s1 }
 0x895   :  { %3543 = vrot.lane.b32.xlu1 %v5941_v26, %s5758_s1 }
 0x897   :  { %3491 = vrot.lane.b32.xlu0 %v5960_v31, %s5758_s1 }
 0x899   :  { %3541 = vrot.lane.b32.xlu1 %v5969_v33, %s5758_s1  ;;  %v2705_v33 = vpack.c.bf16 %v2697_v29, %v2697_v29 }
 0x8a8   :  { %v2666_v11 = vpop.xlane.xlu0 %2665 }
 0x8a9   :  { %5586 = vrcp.f32 %v2666_v11 }
 0x8ac   :  { %v2675_v16 = vpop.xlane.xlu1 %2674 }
 0x8ad   :  { %5588 = vrcp.f32 %v2675_v16 }
 0x8b0   :  { %v2681_v30 = vpop.xlane.xlu1 %2680 }
 0x8b1   :  { %v2672_v24 = vpop.xlane.xlu0 %2671 }
 0x8b2   :  { %5590 = vrcp.f32 %v2672_v24 }
 0x8b3   :  { %5592 = vrcp.f32 %v2681_v30 }
 0x8b4   :  { %v2761_v51 = vpop.permute.xlu1 %2760 }
 0x8b5   :  { %v2766_v36 = vsel %vm767_vm3, %v2761_v51, 0 }
 0x8b6   :  { %v5587_v31 = vpop.eup %5586  ;;  %5276 = vmatpush3.bf16.msra.mxu1 %v2766_v36 }
 0x8b7   :  { %5287 = vmatprep.subr.bf16.mxu1 %v5751_v37  ;;  %v2696_v27 = vmul.f32 %v5587_v31, %v6425_v56  ;;  %v2953_v56 = vpop.permute.xlu0 %2952 }
 0x8b8   :  { %v2809_v22 = vpop.permute.xlu1 %2808  ;;  %v2958_v25 = vsel %vm767_vm3, %v2953_v56, 0 }
 0x8b9   :  { %v2814_v41 = vsel %vm767_vm3, %v2809_v22, 0  ;;  %5278 = vmatmul.mubr.msk.bf16.vlgmr.msra.gmra.mxu1 %vm296_vm2, %v2705_v33  ;;  %v2704_v35 = vpack.c.bf16 %v2696_v27, %v2696_v27 }
 0x8ba   :  { %v5589_v63 = vpop.eup %5588  ;;  %5288 = vmatpush3.bf16.msra.mxu1 %v2862_v59  ;;  %5289 = vmatprep.mubr.msk.bf16.mxu1 %vm5752_vm1, %v5751_v37 }
 0x8bb   :  { %5272 = vmatmul.mubr.msk.bf16.vlgmr.msra.gmra.mxu0 %vm296_vm2, %v2704_v35  ;;  %5299 = vmatprep.subr.bf16.mxu1 %v5751_v37  ;;  %v2699_v45 = vmul.f32 %v5589_v63, %v6429_v57 }
 0x8bc   :  { %5282 = vmatpush3.bf16.msra.mxu0 %v2814_v41  ;;  %5283 = vmatprep.mubr.msk.bf16.mxu0 %vm5752_vm1, %v5751_v37 }
 0x8bd   :  { %5293 = vmatprep.subr.bf16.mxu0 %v5751_v37  ;;  %v2707_v48 = vpack.c.bf16 %v2699_v45, %v2699_v45 }
 0x8bf   :  { %v5591_v12 = vpop.eup %5590 }
 0x8c0   :  { %v5593_v6 = vpop.eup %5592  ;;  %v2698_v38 = vmul.f32 %v5591_v12, %v6435_v52 }
 0x8c1   :  { %5290 = vmatmul.mubr.msk.bf16.vlgmr.msra.gmra.mxu1 %vm296_vm2, %v2707_v48  ;;  %v2701_v57 = vmul.f32 %v5593_v6, %v6433_v58 }
 0x8c2   :  { %5300 = vmatpush3.bf16.msra.mxu1 %v2958_v25  ;;  %v2706_v34 = vpack.c.bf16 %v2698_v38, %v2698_v38  ;;  %5301 = vmatprep.mubr.msk.bf16.mxu1 %vm5752_vm1, %v5751_v37 }
 0x8c3   :  { %5311 = vmatprep.subr.bf16.mxu1 %v5751_v37  ;;  %v2709_v23 = vpack.c.bf16 %v2701_v57, %v2701_v57 }
 0x8c4   :  { %5284 = vmatmul.mubr.msk.bf16.vlgmr.msra.gmra.mxu0 %vm296_vm2, %v2706_v34 }
 0x8c5   :  { %5295 = vmatprep.mubr.msk.bf16.mxu0 %vm5752_vm1, %v5751_v37 }
 0x8c9   :  { %5302 = vmatmul.mubr.msk.bf16.vlgmr.msra.gmra.mxu1 %vm296_vm2, %v2709_v23 }
 0x8ca   :  { %5313 = vmatprep.mubr.msk.bf16.mxu1 %vm5752_vm1, %v5751_v37 }
 0x8e6   :  { %v2678_v52 = vpop.xlane.xlu0 %2677 }
 0x8e7   :  { %5594 = vrcp.f32 %v2678_v52 }
 0x8e9   :  { %v2687_v9 = vpop.xlane.xlu1 %2686 }
 0x8ea   :  { %5596 = vrcp.f32 %v2687_v9  ;;  %v2684_v3 = vpop.xlane.xlu0 %2683 }
 0x8eb   :  { %5598 = vrcp.f32 %v2684_v3 }
 0x8ed   :  { %v2905_v58 = vpop.permute.xlu1 %2904 }
 0x8ee   :  { %v2910_v43 = vsel %vm767_vm3, %v2905_v58, 0  ;;  %v3049_v39 = vpop.permute.xlu0 %3048 }
 0x8ef   :  { %v3054_v2 = vsel %vm767_vm3, %v3049_v39, 0  ;;  %5294 = vmatpush3.bf16.msra.mxu0 %v2910_v43 }
 0x8f0   :  { %5312 = vmatpush3.bf16.msra.mxu1 %v3054_v2  ;;  %5305 = vmatprep.subr.bf16.mxu0 %v5751_v37 }
 0x8f1   :  { %v3001_v8 = vpop.permute.xlu1 %3000  ;;  %5327 = vmatprep.subr.bf16.mxu1 %v5751_v37 }
 0x8f2   :  { %v3006_v36 = vsel %vm767_vm3, %v3001_v8, 0  ;;  %v3102_v27 = vpop.permute.xlu0 %3101 }
 0x8f3   :  { %v3116_v59 = vsel %vm767_vm3, %v3102_v27, 0 }
 0x8f4   :  { %v5595_v11 = vpop.eup %5594 }
 0x8f5   :  { %v3194_v16 = vpop.permute.xlu1 %3193  ;;  %v2700_v55 = vmul.f32 %v5595_v11, %v6448_v18 }
 0x8f6   :  { %v3199_v18 = vsel %vm296_vm2, %v3194_v16, 0  ;;  %v3244_v35 = vpop.permute.xlu0 %3243 }
 0x8f7   :  { %v5597_v30 = vpop.eup %5596  ;;  %v2708_v24 = vpack.c.bf16 %v2700_v55, %v2700_v55  ;;  %v3249_v63 = vsel %vm296_vm2, %v3244_v35, 0 }
 0x8f8   :  { %v5599_v29 = vpop.eup %5598  ;;  %v2703_v51 = vmul.f32 %v5597_v30, %v6450_v32 }
 0x8f9   :  { %5296 = vmatmul.mubr.msk.bf16.vlgmr.msra.gmra.mxu0 %vm296_vm2, %v2708_v24  ;;  %v3192_v31 = vpop.permute.xlu1 %3191  ;;  %v2702_v22 = vmul.f32 %v5599_v29, %v6454_v54 }
 0x8fa   :  { %v2711_v33 = vpack.c.bf16 %v2703_v51, %v2703_v51  ;;  %5306 = vmatpush3.bf16.msra.mxu0 %v3006_v36  ;;  %5307 = vmatprep.mubr.msk.bf16.mxu0 %vm5752_vm1, %v5751_v37  ;;  %v3294_v16 = vpop.permute.xlu0 %3293 }
 0x8fb   :  { %5471 = vmatprep.subr.msk.bf16.mxu0 %vm767_vm3, %v3102_v27  ;;  %v2710_v41 = vpack.c.bf16 %v2702_v22, %v2702_v22  ;;  %v3299_v51 = vsel %vm296_vm2, %v3294_v16, 0 }
 0x8fc   :  { %5314 = vmatmul.mubr.msk.bf16.vlgmr.msra.gmra.mxu1 %vm296_vm2, %v2711_v33 }
 0x8fd   :  { %5328 = vmatpush3.bf16.xpose.msra.mxu1 %v3199_v18  ;;  %v3242_v32 = vpop.permute.xlu1 %3241  ;;  %5329 = vmatprep.mubr.msk.bf16.mxu1 %vm5752_vm1, %v5751_v37 }
 0x8fe   :  { %5333 = vmatprep.subr.bf16.mxu1 %v5751_v37 }
 0x901   :  { %5308 = vmatmul.mubr.msk.bf16.vlgmr.msra.gmra.mxu0 %vm296_vm2, %v2710_v41  ;;  %v3344_v54 = vpop.permute.xlu1 %3343 }
 0x902   :  { %5318 = vmatpush3.bf16.msra.mxu0 %v3116_v59  ;;  %v3349_v56 = vsel %vm296_vm2, %v3344_v54, 0 }
 0x903   :  { %5339 = vmatprep.subr.bf16.mxu0 %v5751_v37 }
 0x904   :  { %5330 = vmatmul.mubr.msk.bf16.vlgmr.msra.gmra.mxu1 %vm296_vm2, %v3192_v31 }
 0x905   :  { %5334 = vmatpush3.bf16.xpose.msra.mxu1 %v3249_v63  ;;  %5335 = vmatprep.mubr.msk.bf16.mxu1 %vm5752_vm1, %v5751_v37  ;;  %v3342_v45 = vpop.permute.xlu1 %3341 }
 0x906   :  { %5345 = vmatprep.subr.bf16.mxu1 %v5751_v37 }
 0x909   :  { %v3444_v12 = vpop.permute.xlu1 %3443 }
 0x90a   :  { %v3449_v6 = vsel %vm296_vm2, %v3444_v12, 0 }
 0x90c   :  { %5336 = vmatmul.mubr.msk.bf16.vlgmr.msra.gmra.mxu1 %vm296_vm2, %v3242_v32 }
 0x90d   :  { %5346 = vmatpush3.bf16.xpose.msra.mxu1 %v3349_v56  ;;  %5347 = vmatprep.mubr.msk.bf16.mxu1 %vm5752_vm1, %v5751_v37  ;;  %v3442_v48 = vpop.permute.xlu1 %3441  ;;  %v3292_v56 = vpop.permute.xlu0 %3291 }
 0x90e   :  { %5357 = vmatprep.subr.bf16.mxu1 %v5751_v37 }
 0x911   :  { %v3544_v38 = vpop.permute.xlu1 %3543 }
 0x912   :  { %v3549_v25 = vsel %vm296_vm2, %v3544_v38, 0 }
 0x914   :  { %5348 = vmatmul.mubr.msk.bf16.vlgmr.msra.gmra.mxu1 %vm296_vm2, %v3342_v45 }
 0x915   :  { %5358 = vmatpush3.bf16.xpose.msra.mxu1 %v3449_v6  ;;  %5359 = vmatprep.mubr.msk.bf16.mxu1 %vm5752_vm1, %v5751_v37  ;;  %v3542_v34 = vpop.permute.xlu1 %3541 }
 0x916   :  { %5369 = vmatprep.subr.bf16.mxu1 %v5751_v37 }
 0x91c   :  { %5360 = vmatmul.mubr.msk.bf16.vlgmr.msra.gmra.mxu1 %vm296_vm2, %v3442_v48 }
 0x91d   :  { %5370 = vmatpush3.bf16.xpose.msra.mxu1 %v3549_v25  ;;  %5371 = vmatprep.mubr.msk.bf16.mxu1 %vm5752_vm1, %v5751_v37 }
 0x91e   :  { %5381 = vmatprep.subr.bf16.mxu1 %v5751_v37 }
 0x924   :  { %5372 = vmatmul.mubr.msk.bf16.vlgmr.msra.gmra.mxu1 %vm296_vm2, %v3542_v34 }
 0x925   :  { %5383 = vmatprep.mubr.msk.bf16.mxu1 %vm5752_vm1, %v5751_v37 }
 0x979   :  { %v2802_v57 = vpop.f32.mrf.mxu1 }
 0x97b   :  { %v2754_v23 = vpop.f32.mrf.mxu0  ;;  %v5279_v52 = vpop.f32.mrf.mxu1 }
 0x97c   :  { %v3096_v9 = vpack.c.bf16 %v2802_v57, %v2754_v23  ;;  %v3394_v23 = vpop.permute.xlu0 %3393 }
 0x97d   :  { %v5273_v3 = vpop.f32.mrf.mxu0  ;;  %v2805_v58 = vpop.f32.mrf.mxu1 }
 0x97e   :  { %5319 = vmatprep.mubr.msk.bf16.mxu0 %vm296_vm2, %v3096_v9 }
 0x97f   :  { %v2757_v43 = vpop.f32.mrf.mxu0  ;;  %v5280_v39 = vpop.f32.mrf.mxu1 }
 0x981   :  { %v5274_v2 = vpop.f32.mrf.mxu0  ;;  %v2898_v8 = vpop.f32.mrf.mxu1 }
 0x982   :  { %v3392_v2 = vpop.permute.xlu0 %3391 }
 0x983   :  { %v5291_v11 = vpop.f32.mrf.mxu1 }
 0x984   :  { %v2850_v55 = vpop.f32.mrf.mxu0 }
 0x985   :  { %v3097_v30 = vpack.c.bf16 %v2898_v8, %v2850_v55  ;;  %v2901_v24 = vpop.f32.mrf.mxu1  ;;  %v3399_v8 = vsel %vm296_vm2, %v3394_v23, 0 }
 0x986   :  { %v5285_v29 = vpop.f32.mrf.mxu0  ;;  %v3494_v24 = vpop.permute.xlu0 %3493 }
 0x987   :  { %5320 = vmatmul.mubr.msk.bf16.vlgmr.msra.gmra.mxu0 %vm296_vm2, %v3097_v30  ;;  %v5292_v36 = vpop.f32.mrf.mxu1 }
 0x988   :  { %5340 = vmatpush3.bf16.xpose.msra.mxu0 %v3299_v51  ;;  %v2853_v31 = vpop.f32.mrf.mxu0  ;;  %v3499_v51 = vsel %vm296_vm2, %v3494_v24, 0 }
 0x989   :  { %v2994_v33 = vpop.f32.mrf.mxu1  ;;  %5351 = vmatprep.subr.bf16.mxu0 %v5751_v37 }
 0x98a   :  { %v5286_v27 = vpop.f32.mrf.mxu0 }
 0x98b   :  { %v5303_v22 = vpop.f32.mrf.mxu1 }
 0x98c   :  { %v3492_v22 = vpop.permute.xlu0 %3491 }
 0x98d   :  { %v2997_v18 = vpop.f32.mrf.mxu1 }
 0x98f   :  { %v5304_v32 = vpop.f32.mrf.mxu1 }
 0x9b9   :  { %v2946_v59 = vpop.f32.mrf.mxu0 }
 0x9ba   :  { %v3098_v41 = vpack.c.bf16 %v2994_v33, %v2946_v59 }
 0x9bb   :  { %v5297_v35 = vpop.f32.mrf.mxu0 }
 0x9bc   :  { %5323 = vmatprep.mubr.msk.bf16.mxu0 %vm296_vm2, %v3098_v41  ;;  %v3090_v54 = vpop.f32.mrf.mxu1 }
 0x9bd   :  { %v2949_v63 = vpop.f32.mrf.mxu0 }
 0x9be   :  { %v5315_v45 = vpop.f32.mrf.mxu1 }
 0x9bf   :  { %v5298_v12 = vpop.f32.mrf.mxu0 }
 0x9c0   :  { %v3093_v48 = vpop.f32.mrf.mxu1 }
 0x9c1   :  { %v3042_v6 = vpop.f32.mrf.mxu0  ;;  %v2186_v48 = vadd.f32 %v6348_v28, %v6393_v21  ;;  %v2210_v28 = vadd.f32 %v6359_v47, %v6399_v1 }
 0x9c2   :  { %v3099_v38 = vpack.c.bf16 %v3090_v54, %v3042_v6  ;;  %v5316_v25 = vpop.f32.mrf.mxu1 }
 0x9c3   :  { %v5309_v34 = vpop.f32.mrf.mxu0  ;;  %v2197_v25 = vadd.f32 %v6352_v44, %v6395_v7 }
 0x9c4   :  { %5324 = vmatmul.mubr.msk.bf16.gmra.mxu0 %vm296_vm2, %v3099_v38  ;;  %v6560_v57 = vpop.f32.mrf.mxu1 }
 0x9c5   :  { %v3045_v52 = vpop.f32.mrf.mxu0  ;;  %v3591_v9 = vsel %vm296_vm2, %v6560_v57, -inf  ;;  %5341 = vmatprep.mubr.msk.bf16.mxu0 %vm5752_vm1, %v5751_v37 }
 0x9c6   :  { %3592 = vmax.xlane.f32.xlu0 %v3591_v9  ;;  %v5331_v3 = vpop.f32.mrf.mxu1  ;;  %v2189_v52 = vadd.f32 %v6357_v46, %v6397_v40  ;;  %v2213_v46 = vadd.f32 %v6365_v5, %v6403_v62 }
 0x9c7   :  { %v5310_v58 = vpop.f32.mrf.mxu0 }
 0x9c8   :  { %v3238_v43 = vpop.f32.mrf.mxu1  ;;  %v2202_v58 = vadd.f32 %v6361_v42, %v6401_v0 }
 0x9ca   :  { %v5332_v39 = vpop.f32.mrf.mxu1 }
 0x9cc   :  { %5342 = vmatmul.mubr.msk.bf16.vlgmr.msra.gmra.mxu0 %vm296_vm2, %v3292_v56  ;;  %v3285_v11 = vpop.f32.mrf.mxu1  ;;  %v2194_v56 = vadd.f32 %v6346_v15, %v6391_v49 }
 0x9cd   :  { %5352 = vmatpush3.bf16.xpose.msra.mxu0 %v3399_v8  ;;  %v3594_v16 = vsel %vm296_vm2, %v3285_v11, -inf  ;;  %5353 = vmatprep.mubr.msk.bf16.mxu0 %vm5752_vm1, %v5751_v37  ;;  %v2205_v8 = vadd.f32 %v6370_v10, %v6405_v13 }
 0x9ce   :  { %3595 = vmax.xlane.f32.xlu1 %v3594_v16  ;;  %v5337_v55 = vpop.f32.mrf.mxu1  ;;  %5363 = vmatprep.subr.bf16.mxu0 %v5751_v37 }
 0x9d0   :  { %v3288_v30 = vpop.f32.mrf.mxu1 }
 0x9d2   :  { %v5338_v29 = vpop.f32.mrf.mxu1 }
 0x9d4   :  { %5354 = vmatmul.mubr.msk.bf16.vlgmr.msra.gmra.mxu0 %vm296_vm2, %v3392_v2  ;;  %v6574_v36 = vpop.f32.mrf.mxu1 }
 0x9d5   :  { %5364 = vmatpush3.bf16.xpose.msra.mxu0 %v3499_v51  ;;  %5365 = vmatprep.mubr.msk.bf16.mxu0 %vm5752_vm1, %v5751_v37  ;;  %v3600_v10 = vsel %vm296_vm2, %v6574_v36, -inf }
 0x9d6   :  { %v5349_v31 = vpop.f32.mrf.mxu1  ;;  %5375 = vmatprep.subr.bf16.mxu0 %v5751_v37 }
 0x9d8   :  { %v3388_v33 = vpop.f32.mrf.mxu1 }
 0x9da   :  { %v5350_v27 = vpop.f32.mrf.mxu1 }
 0x9dc   :  { %5366 = vmatmul.mubr.msk.bf16.vlgmr.msra.gmra.mxu0 %vm296_vm2, %v3492_v22  ;;  %v6580_v18 = vpop.f32.mrf.mxu1 }
 0x9dd   :  { %5377 = vmatprep.mubr.msk.bf16.mxu0 %vm5752_vm1, %v5751_v37  ;;  %v3606_v24 = vsel %vm296_vm2, %v6580_v18, -inf }
 0x9de   :  { %v5361_v32 = vpop.f32.mrf.mxu1 }
 0x9e0   :  { %v3488_v59 = vpop.f32.mrf.mxu1 }
 0x9e2   :  { %v5362_v41 = vpop.f32.mrf.mxu1 }
 0x9e4   :  { %v6584_v35 = vpop.f32.mrf.mxu1 }
 0x9e5   :  { %v3612_v33 = vsel %vm296_vm2, %v6584_v35, -inf }
 0x9e6   :  { %v5373_v54 = vpop.f32.mrf.mxu1 }
 0x9e8   :  { %v3588_v63 = vpop.f32.mrf.mxu1 }
 0x9ea   :  { %v5374_v45 = vpop.f32.mrf.mxu1 }
 0xa47   :  { %v5321_v12 = vpop.f32.mrf.mxu0 }
 0xa48   :  { %v6590_v6 = vadd.f32 %v5321_v12, %v2194_v56 }
 0xa49   :  { %v3152_v38 = vpop.f32.mrf.mxu0 }
 0xa4a   :  { %v6594_v34 = vadd.f32 %v3152_v38, %v2186_v48 }
 0xa4b   :  { %v5322_v23 = vpop.f32.mrf.mxu0 }
 0xa4c   :  { %v6598_v9 = vadd.f32 %v5322_v23, %v2197_v25 }
 0xa4d   :  { %v3155_v3 = vpop.f32.mrf.mxu0 }
 0xa4e   :  { %v6600_v15 = vadd.f32 %v3155_v3, %v2189_v52 }
 0xa4f   :  { %v3593_v43 = vpop.xlane.xlu0 %3592 }
 0xa50   :  { %v3615_v47 = vsub.f32 %v6560_v57, %v3593_v43 }
 0xa52   :  { %v3623_v55 = vmul.f32 1.442695, %v3615_v47 }
 0xa57   :  { %v3596_v49 = vpop.xlane.xlu1 %3595 }
 0xa58   :  { %v3616_v44 = vsub.f32 %v3285_v11, %v3596_v49 }
 0xa5a   :  { %v3625_v1 = vmul.f32 1.442695, %v3616_v44 }
 0xa5c   :  { %5600 = vpow2.f32 %v3625_v1 }
 0xa5d   :  { %5602 = vpow2.f32 %v3623_v55 }
 0xa69   :  { %v6627_v27 = vpop.eup %5600 }
 0xa6a   :  { %v3642_v59 = vsel %vm296_vm2, %v6627_v27, 0.0  ;;  %v5603_v54 = vpop.eup %5602 }
 0xa6b   :  { %v3639_v56 = vsel %vm296_vm2, %v5603_v54, 0.0 }
 0xa84   :  { %v5325_v21 = vpop.f32.mrf.mxu0 }
 0xa85   :  { %v6606_v7 = vadd.f32 %v5325_v21, %v2210_v28 }
 0xa86   :  { %v3168_v39 = vpop.f32.mrf.mxu0 }
 0xa87   :  { %v6610_v40 = vadd.f32 %v3168_v39, %v2202_v58 }
 0xa88   :  { %v5326_v2 = vpop.f32.mrf.mxu0 }
 0xa89   :  { %v6615_v16 = vadd.f32 %v5326_v2, %v2213_v46 }
 0xa8a   :  { %v3171_v42 = vpop.f32.mrf.mxu0 }
 0xa8b   :  { %v6617_v0 = vadd.f32 %v3171_v42, %v2205_v8 }
 0xa8c   :  { %v3335_v11 = vpop.f32.mrf.mxu0 }
 0xa8d   :  { %v3597_v30 = vsel %vm296_vm2, %v3335_v11, -inf }
 0xa8e   :  { %3598 = vmax.xlane.f32.xlu0 %v3597_v30  ;;  %v5343_v5 = vpop.f32.mrf.mxu0 }
 0xa90   :  { %v3338_v62 = vpop.f32.mrf.mxu0 }
 0xa92   :  { %3601 = vmax.xlane.f32.xlu0 %v3600_v10  ;;  %v5344_v13 = vpop.f32.mrf.mxu0 }
 0xa94   :  { %v3435_v57 = vpop.f32.mrf.mxu0 }
 0xa95   :  { %v3603_v29 = vsel %vm296_vm2, %v3435_v57, -inf }
 0xa96   :  { %3607 = vmax.xlane.f32.xlu0 %v3606_v24  ;;  %3604 = vmax.xlane.f32.xlu1 %v3603_v29  ;;  %v5355_v51 = vpop.f32.mrf.mxu0 }
 0xa98   :  { %v3438_v31 = vpop.f32.mrf.mxu0 }
 0xa9a   :  { %3613 = vmax.xlane.f32.xlu0 %v3612_v33  ;;  %v5356_v22 = vpop.f32.mrf.mxu0  ;;  %v6680_v33 = vld [vmem:[#allocation5 + $0x18] sm:$0xff] }
 0xa9b   :  { %v4788_v22 = vcombine.low %v6680_v33, %v6680_v33 }
 0xa9c   :  { %v3535_v32 = vpop.f32.mrf.mxu0 }
 0xa9d   :  { %v3609_v41 = vsel %vm296_vm2, %v3535_v32, -inf }
 0xa9e   :  { %3643 = vadd.xlane.f32.xlu0 %v3642_v59  ;;  %3610 = vmax.xlane.f32.xlu1 %v3609_v41  ;;  %v5367_v63 = vpop.f32.mrf.mxu0 }
 0xaa0   :  { %v3538_v45 = vpop.f32.mrf.mxu0 }
 0xaa2   :  { %3640 = vadd.xlane.f32.xlu1 %v3639_v56  ;;  %v5368_v12 = vpop.f32.mrf.mxu0 }
 0xab3   :  { %3687 = vrot.lane.b32.xlu1 %v5868_v53, %s5759_s9 }
 0xab7   :  { %3783 = vrot.lane.b32.xlu1 %v5866_v50, %s5759_s9 }
 0xabb   :  { %3831 = vrot.lane.b32.xlu1 %v5877_v60, %s5759_s9 }
 0xabf   :  { %3927 = vrot.lane.b32.xlu1 %v5916_v14, %s5759_s9 }
 0xb17   :  { %v3599_v48 = vpop.xlane.xlu0 %3598 }
 0xb18   :  { %v3617_v38 = vsub.f32 %v3335_v11, %v3599_v48 }
 0xb1a   :  { %v3627_v25 = vmul.f32 1.442695, %v3617_v38 }
 0xb1b   :  { %v3602_v23 = vpop.xlane.xlu0 %3601 }
 0xb1c   :  { %5604 = vpow2.f32 %v3627_v25  ;;  %v3618_v52 = vsub.f32 %v6574_v36, %v3602_v23 }
 0xb1e   :  { %v3629_v3 = vmul.f32 1.442695, %v3618_v52 }
 0xb1f   :  { %v3608_v49 = vpop.xlane.xlu0 %3607  ;;  %v3605_v28 = vpop.xlane.xlu1 %3604 }
 0xb20   :  { %5606 = vpow2.f32 %v3629_v3  ;;  %v3620_v53 = vsub.f32 %v6580_v18, %v3608_v49  ;;  %v3619_v50 = vsub.f32 %v3435_v57, %v3605_v28 }
 0xb22   :  { %v3633_v21 = vmul.f32 1.442695, %v3620_v53  ;;  %v3631_v58 = vmul.f32 1.442695, %v3619_v50 }
 0xb23   :  { %v3614_v60 = vpop.xlane.xlu0 %3613 }
 0xb24   :  { %5608 = vpow2.f32 %v3633_v21  ;;  %v3622_v14 = vsub.f32 %v6584_v35, %v3614_v60 }
 0xb25   :  { %5610 = vpow2.f32 %v3631_v58 }
 0xb26   :  { %v3637_v44 = vmul.f32 1.442695, %v3622_v14 }
 0xb27   :  { %v3611_v43 = vpop.xlane.xlu1 %3610  ;;  %v3644_v59 = vpop.xlane.xlu0 %3643 }
 0xb28   :  { %5612 = vpow2.f32 %v3637_v44  ;;  %v3621_v39 = vsub.f32 %v3535_v32, %v3611_v43 }
 0xb29   :  { %v5605_v46 = vpop.eup %5604 }
 0xb2a   :  { %v3635_v36 = vmul.f32 1.442695, %v3621_v39  ;;  %v3645_v2 = vsel %vm296_vm2, %v5605_v46, 0.0 }
 0xb2b   :  { %3646 = vadd.xlane.f32.xlu1 %v3645_v2  ;;  %v3641_v8 = vpop.xlane.xlu1 %3640 }
 0xb2c   :  { %5614 = vpow2.f32 %v3635_v36 }
 0xb2d   :  { %v6645_v18 = vpop.eup %5606  ;;  %5616 = vrcp.f32 %v3641_v8 }
 0xb2e   :  { %v3648_v47 = vsel %vm296_vm2, %v6645_v18, 0.0  ;;  %5618 = vrcp.f32 %v3644_v59 }
 0xb2f   :  { %3649 = vadd.xlane.f32.xlu0 %v3648_v47  ;;  %v3688_v35 = vpop.permute.xlu1 %3687 }
 0xb30   :  { %v3693_v1 = vsel %vm767_vm3, %v3688_v35, 0 }
 0xb31   :  { %v6650_v42 = vpop.eup %5608  ;;  %5376 = vmatpush3.bf16.msra.mxu0 %v3693_v1 }
 0xb32   :  { %v6652_v11 = vpop.eup %5610  ;;  %v3654_v55 = vsel %vm296_vm2, %v6650_v42, 0.0  ;;  %5387 = vmatprep.subr.bf16.mxu0 %v5751_v37 }
 0xb33   :  { %3655 = vadd.xlane.f32.xlu0 %v3654_v55  ;;  %v3651_v30 = vsel %vm296_vm2, %v6652_v11, 0.0  ;;  %v3784_v29 = vpop.permute.xlu1 %3783 }
 0xb34   :  { %3652 = vadd.xlane.f32.xlu1 %v3651_v30  ;;  %v3789_v31 = vsel %vm767_vm3, %v3784_v29, 0 }
 0xb35   :  { %v6659_v5 = vpop.eup %5612 }
 0xb36   :  { %v3660_v62 = vsel %vm296_vm2, %v6659_v5, 0.0 }
 0xb37   :  { %3661 = vadd.xlane.f32.xlu0 %v3660_v62  ;;  %v3832_v32 = vpop.permute.xlu1 %3831 }
 0xb39   :  { %v6663_v10 = vpop.eup %5614 }
 0xb3a   :  { %v5617_v13 = vpop.eup %5616  ;;  %v3657_v57 = vsel %vm296_vm2, %v6663_v10, 0.0 }
 0xb3b   :  { %v3671_v24 = vmul.f32 %v5617_v13, %v5603_v54  ;;  %3658 = vadd.xlane.f32.xlu1 %v3657_v57  ;;  %v3928_v41 = vpop.permute.xlu1 %3927  ;;  %v5619_v63 = vpop.eup %5618 }
 0xb3c   :  { %v3672_v56 = vmul.f32 %v5619_v63, %v6627_v27  ;;  %v3837_v27 = vsel %vm767_vm3, %v3832_v32, 0  ;;  %v3933_v39 = vsel %vm767_vm3, %v3928_v41, 0 }
 0xb3d   :  { %v3679_v51 = vpack.c.bf16 %v3671_v24, %v3671_v24 }
 0xb3e   :  { %v3680_v52 = vpack.c.bf16 %v3672_v56, %v3672_v56 }
 0xb3f   :  { %5378 = vmatmul.mubr.msk.bf16.vlgmr.msra.gmra.mxu0 %vm296_vm2, %v3679_v51 }
 0xb40   :  { %5388 = vmatpush3.bf16.msra.mxu0 %v3789_v31  ;;  %5389 = vmatprep.mubr.msk.bf16.mxu0 %vm5752_vm1, %v5751_v37 }
 0xb41   :  { %5399 = vmatprep.subr.bf16.mxu0 %v5751_v37 }
 0xb4c   :  { %4023 = vrot.lane.b32.xlu1 %v5941_v26, %s5759_s9 }
 0xb4d   :  { %3735 = vrot.lane.b32.xlu0 %v5879_v61, %s5759_s9 }
 0xb51   :  { %3879 = vrot.lane.b32.xlu0 %v5891_v4, %s5759_s9 }
 0xb55   :  { %3975 = vrot.lane.b32.xlu0 %v5928_v19, %s5759_s9 }
 0xb59   :  { %4076 = vrot.lane.b32.xlu0 %v4788_v22, %s5755_s30 }
 0xbb4   :  { %v3647_v26 = vpop.xlane.xlu1 %3646 }
 0xbb5   :  { %5620 = vrcp.f32 %v3647_v26 }
 0xbb8   :  { %v3650_v61 = vpop.xlane.xlu0 %3649 }
 0xbb9   :  { %5622 = vrcp.f32 %v3650_v61 }
 0xbbc   :  { %v3656_v54 = vpop.xlane.xlu0 %3655 }
 0xbbd   :  { %v3653_v4 = vpop.xlane.xlu1 %3652 }
 0xbbe   :  { %5624 = vrcp.f32 %v3653_v4 }
 0xbbf   :  { %5626 = vrcp.f32 %v3656_v54 }
 0xbc0   :  { %v3662_v19 = vpop.xlane.xlu0 %3661 }
 0xbc2   :  { %v5621_v45 = vpop.eup %5620 }
 0xbc3   :  { %v3673_v12 = vmul.f32 %v5621_v45, %v5605_v46 }
 0xbc4   :  { %v3736_v48 = vpop.permute.xlu0 %3735  ;;  %v3659_v38 = vpop.xlane.xlu1 %3658 }
 0xbc5   :  { %v3681_v25 = vpack.c.bf16 %v3673_v12, %v3673_v12  ;;  %v3741_v23 = vsel %vm767_vm3, %v3736_v48, 0  ;;  %5628 = vrcp.f32 %v3659_v38 }
 0xbc6   :  { %5382 = vmatpush3.bf16.msra.mxu1 %v3741_v23  ;;  %v5623_v3 = vpop.eup %5622  ;;  %5630 = vrcp.f32 %v3662_v19 }
 0xbc7   :  { %5390 = vmatmul.mubr.msk.bf16.vlgmr.msra.gmra.mxu0 %vm296_vm2, %v3681_v25  ;;  %5393 = vmatprep.subr.bf16.mxu1 %v5751_v37  ;;  %v3674_v50 = vmul.f32 %v5623_v3, %v6645_v18 }
 0xbc8   :  { %v3880_v49 = vpop.permute.xlu0 %3879  ;;  %5401 = vmatprep.mubr.msk.bf16.mxu0 %vm5752_vm1, %v5751_v37  ;;  %v4024_v18 = vpop.permute.xlu1 %4023 }
 0xbc9   :  { %v3885_v28 = vsel %vm767_vm3, %v3880_v49, 0  ;;  %5384 = vmatmul.mubr.msk.bf16.vlgmr.msra.gmra.mxu1 %vm296_vm2, %v3680_v52  ;;  %v3682_v44 = vpack.c.bf16 %v3674_v50, %v3674_v50  ;;  %v4029_v1 = vsel %vm767_vm3, %v4024_v18, 0 }
 0xbca   :  { %5394 = vmatpush3.bf16.msra.mxu1 %v3837_v27  ;;  %5400 = vmatpush3.bf16.msra.mxu0 %v3885_v28 }
 0xbcb   :  { %v5625_v53 = vpop.eup %5624  ;;  %5411 = vmatprep.subr.bf16.mxu0 %v5751_v37  ;;  %5395 = vmatprep.mubr.msk.bf16.mxu1 %vm5752_vm1, %v5751_v37 }
 0xbcc   :  { %v3675_v21 = vmul.f32 %v5625_v53, %v6652_v11  ;;  %v3976_v58 = vpop.permute.xlu0 %3975  ;;  %5405 = vmatprep.subr.bf16.mxu1 %v5751_v37  ;;  %v5627_v43 = vpop.eup %5626 }
 0xbcd   :  { %v3981_v14 = vsel %vm767_vm3, %v3976_v58, 0  ;;  %v3676_v36 = vmul.f32 %v5627_v43, %v6650_v42 }
 0xbce   :  { %v3683_v60 = vpack.c.bf16 %v3675_v21, %v3675_v21 }
 0xbcf   :  { %v3684_v47 = vpack.c.bf16 %v3676_v36, %v3676_v36 }
 0xbd0   :  { %5402 = vmatmul.mubr.msk.bf16.vlgmr.msra.gmra.mxu0 %vm296_vm2, %v3683_v60  ;;  %v4077_v13 = vpop.permute.xlu0 %4076  ;;  %v6727_v60 = vld [vmem:[%s6969_s5] sm:$0xff] }
 0xbd1   :  { %5412 = vmatpush3.bf16.msra.mxu0 %v3981_v14  ;;  %5396 = vmatmul.mubr.msk.bf16.vlgmr.msra.gmra.mxu1 %vm296_vm2, %v3682_v44  ;;  %v4091_v57 = vsel %vm767_vm3, %v4077_v13, 0  ;;  %v4169_v43 = vrot.slane %v6727_v60, %v97_v20 }
 0xbd2   :  { %v5629_v46 = vpop.eup %5628  ;;  %5406 = vmatpush3.bf16.msra.mxu1 %v3933_v39  ;;  %5413 = vmatprep.mubr.msk.bf16.mxu0 %vm5752_vm1, %v5751_v37 }
 0xbd3   :  { %v3677_v2 = vmul.f32 %v5629_v46, %v6663_v10  ;;  %5407 = vmatprep.mubr.msk.bf16.mxu1 %vm5752_vm1, %v5751_v37  ;;  %5417 = vmatprep.subr.bf16.mxu1 %v5751_v37  ;;  %v5631_v35 = vpop.eup %5630 }
 0xbd4   :  { %v3678_v42 = vmul.f32 %v5631_v35, %v6659_v5  ;;  %5472 = vmatprep.subr.msk.bf16.mxu0 %vm767_vm3, %v4077_v13 }
 0xbd5   :  { %v3685_v8 = vpack.c.bf16 %v3677_v2, %v3677_v2 }
 0xbd6   :  { %v3686_v11 = vpack.c.bf16 %v3678_v42, %v3678_v42 }
 0xbd8   :  { %5414 = vmatmul.mubr.msk.bf16.vlgmr.msra.gmra.mxu0 %vm296_vm2, %v3685_v8 }
 0xbd9   :  { %5408 = vmatmul.mubr.msk.bf16.vlgmr.msra.gmra.mxu1 %vm296_vm2, %v3684_v47  ;;  %5424 = vmatpush3.bf16.msra.mxu0 %v4091_v57 }
 0xbda   :  { %5418 = vmatpush3.bf16.msra.mxu1 %v4029_v1  ;;  %5419 = vmatprep.mubr.msk.bf16.mxu1 %vm5752_vm1, %v5751_v37  ;;  %v5668_v1 = vld [vmem:[%s6964_s0] sm:$0xff] }
 0xbe1   :  { %5420 = vmatmul.mubr.msk.bf16.vlgmr.msra.gmra.mxu1 %vm296_vm2, %v3686_v11 }
 0xbff   :  { %v3729_v55 = vpop.f32.mrf.mxu0 }
 0xc01   :  { %v5379_v30 = vpop.f32.mrf.mxu0 }
 0xc03   :  { %v3732_v62 = vpop.f32.mrf.mxu0 }
 0xc05   :  { %v5380_v10 = vpop.f32.mrf.mxu0 }
 0xc06   :  { %v5671_v10 = vld [vmem:[%s6964_s0 + $0x10] sm:$0xff] }
 0xc87   :  { %v3825_v24 = vpop.f32.mrf.mxu0 }
 0xc89   :  { %v3777_v29 = vpop.f32.mrf.mxu1  ;;  %v5391_v51 = vpop.f32.mrf.mxu0 }
 0xc8a   :  { %v4071_v31 = vpack.c.bf16 %v3777_v29, %v3729_v55 }
 0xc8b   :  { %v5385_v37 = vpop.f32.mrf.mxu1  ;;  %v3828_v22 = vpop.f32.mrf.mxu0 }
 0xc8c   :  { %5425 = vmatprep.mubr.msk.bf16.mxu0 %vm296_vm2, %v4071_v31 }
 0xc8d   :  { %v3780_v5 = vpop.f32.mrf.mxu1  ;;  %v5392_v32 = vpop.f32.mrf.mxu0 }
 0xc8f   :  { %v5386_v59 = vpop.f32.mrf.mxu1 }
 0xc90   :  { %v3921_v41 = vpop.f32.mrf.mxu0 }
 0xc91   :  { %v3873_v26 = vpop.f32.mrf.mxu1 }
 0xc92   :  { %v4072_v61 = vpack.c.bf16 %v3873_v26, %v3825_v24  ;;  %v5403_v54 = vpop.f32.mrf.mxu0  ;;  %v5672_v26 = vld [vmem:[%s6964_s0 + $0x20] sm:$0xff] }
 0xc93   :  { %v5397_v4 = vpop.f32.mrf.mxu1 }
 0xc94   :  { %v3924_v63 = vpop.f32.mrf.mxu0  ;;  %5426 = vmatmul.mubr.msk.bf16.vlgmr.msra.gmra.mxu0 %vm296_vm2, %v4072_v61 }
 0xc95   :  { %v3876_v19 = vpop.f32.mrf.mxu1 }
 0xc96   :  { %v5404_v45 = vpop.f32.mrf.mxu0 }
 0xc97   :  { %v5398_v56 = vpop.f32.mrf.mxu1 }
 0xc98   :  { %v4017_v12 = vpop.f32.mrf.mxu0  ;;  %v5675_v56 = vld [vmem:[%s6964_s0 + $0x38] sm:$0xff] }
 0xc99   :  { %v3969_v48 = vpop.f32.mrf.mxu1 }
 0xc9a   :  { %v4073_v38 = vpack.c.bf16 %v3969_v48, %v3921_v41  ;;  %v5415_v25 = vpop.f32.mrf.mxu0 }
 0xc9b   :  { %v5409_v23 = vpop.f32.mrf.mxu1 }
 0xc9c   :  { %v4020_v52 = vpop.f32.mrf.mxu0  ;;  %5429 = vmatprep.mubr.msk.bf16.mxu0 %vm296_vm2, %v4073_v38 }
 0xc9d   :  { %v3972_v3 = vpop.f32.mrf.mxu1 }
 0xc9e   :  { %v5416_v49 = vpop.f32.mrf.mxu0 }
 0xc9f   :  { %v5410_v27 = vpop.f32.mrf.mxu1 }
 0xca1   :  { %v4065_v28 = vpop.f32.mrf.mxu1 }
 0xca2   :  { %v4074_v53 = vpack.c.bf16 %v4065_v28, %v4017_v12 }
 0xca3   :  { %v5421_v50 = vpop.f32.mrf.mxu1 }
 0xca4   :  { %5430 = vmatmul.mubr.msk.bf16.gmra.mxu0 %vm296_vm2, %v4074_v53 }
 0xca5   :  { %v4068_v21 = vpop.f32.mrf.mxu1 }
 0xca7   :  { %v5422_v58 = vpop.f32.mrf.mxu1 }
 0xd54   :  { %v5427_v14 = vpop.f32.mrf.mxu0 }
 0xd55   :  { %v4160_v36 = vadd.f32 %v5427_v14, %v6590_v6  ;;  %v5669_v6 = vld [vmem:[%s6964_s0 + $0x18] sm:$0xff] }
 0xd56   :  { %v4127_v44 = vpop.f32.mrf.mxu0 }
 0xd57   :  { %v4158_v39 = vadd.f32 %v4127_v44, %v6594_v34  ;;  %v4172_v11 = vadd.f32 %v4169_v43, %v4160_v36 }
 0xd58   :  { %v5428_v46 = vpop.f32.mrf.mxu0 }
 0xd59   :  { %v4170_v2 = vadd.f32 %v4169_v43, %v4158_v39  ;;  %v4161_v8 = vadd.f32 %v5428_v46, %v6598_v9  ;;  %v5670_v9 = vld [vmem:[%s6964_s0 + $0x8] sm:$0xff]  ;;  %v4180_v13 = vadd.f32 %v5671_v10, %v4172_v11 }
 0xd5a   :  { %v4130_v18 = vpop.f32.mrf.mxu0 }
 0xd5b   :  { %v4173_v47 = vadd.f32 %v4169_v43, %v4161_v8  ;;  %v4159_v35 = vadd.f32 %v4130_v18, %v6600_v15  ;;  %v4178_v42 = vadd.f32 %v5668_v1, %v4170_v2  ;;  %v4192_v29 = vsel %vm111_vm0, %v4180_v13, 0.0 }
 0xd5d   :  { %v4171_v55 = vadd.f32 %v4169_v43, %v4159_v35  ;;  %v4186_v20 = vsel %vm111_vm0, %v4178_v42, 0.0  ;;  %v4181_v34 = vadd.f32 %v5669_v6, %v4173_v47 }
 0xd5e   :  { %4187 = vadd.xlane.f32.xlu1 %v4186_v20 }
 0xd5f   :  { %v4179_v15 = vadd.f32 %v5670_v9, %v4171_v55  ;;  %v4195_v30 = vsel %vm111_vm0, %v4181_v34, 0.0 }
 0xd61   :  { %v4189_v62 = vsel %vm111_vm0, %v4179_v15, 0.0 }
 0xd62   :  { %4196 = vadd.xlane.f32.xlu1 %v4195_v30  ;;  %4190 = vadd.xlane.f32.xlu0 %v4189_v62 }
 0xd64   :  { %v5431_v57 = vpop.f32.mrf.mxu0 }
 0xd65   :  { %v4164_v24 = vadd.f32 %v5431_v57, %v6606_v7 }
 0xd66   :  { %4193 = vadd.xlane.f32.xlu0 %v4192_v29  ;;  %v4143_v51 = vpop.f32.mrf.mxu0 }
 0xd67   :  { %v4162_v31 = vadd.f32 %v4143_v51, %v6610_v40  ;;  %v4176_v22 = vadd.f32 %v4169_v43, %v4164_v24  ;;  %v5673_v40 = vld [vmem:[%s6964_s0 + $0x30] sm:$0xff] }
 0xd68   :  { %v5432_v37 = vpop.f32.mrf.mxu0 }
 0xd69   :  { %v4174_v5 = vadd.f32 %v4169_v43, %v4162_v31  ;;  %v4165_v32 = vadd.f32 %v5432_v37, %v6615_v16  ;;  %v4184_v63 = vadd.f32 %v5673_v40, %v4176_v22  ;;  %v5674_v16 = vld [vmem:[%s6964_s0 + $0x28] sm:$0xff]  ;;  %v5676_v31 = vld [vmem:[#allocation5 + $0x10] sm:$0xff]  ;;  %v5677_v22 = vld [vmem:[#allocation5] sm:$0xff] }
 0xd6a   :  { %v4146_v59 = vpop.f32.mrf.mxu0  ;;  %v4794_v37 = vcombine.high %v5676_v31, %v6680_v33  ;;  %v5498_v33 = vld [vmem:[%s6967_s3 + $0x28] sm:$0xff]  }
 0xd6b   :  { %v4163_v41 = vadd.f32 %v4146_v59, %v6617_v0  ;;  %v4182_v61 = vadd.f32 %v5672_v26, %v4174_v5  ;;  %v4177_v7 = vadd.f32 %v4169_v43, %v4165_v32  ;;  %v4204_v19 = vsel %vm111_vm0, %v4184_v63, 0.0  ;;  %v5678_v5 = vld [vmem:[#allocation5 + $0x8] sm:$0xff]  ;;  %v5496_v59 = vld [vmem:[%s6967_s3 + $0x38] sm:$0xff]   ;;  %v5499_v26 = vld [vmem:[%s6967_s3 + $0x20] sm:$0xff]  }
 0xd6c   :  { %5433 = vmatprep.subr.bf16.mxu1 %v4794_v37  ;;  %v4793_v32 = vcombine.high %v5677_v22, %v5678_v5  ;;  %5445 = vmatprep.subr.bf16.mxu0 %v5496_v59 }
 0xd6d   :  { %v4175_v54 = vadd.f32 %v4169_v43, %v4163_v41  ;;  %v4198_v4 = vsel %vm111_vm0, %v4182_v61, 0.0  ;;  %v4185_v12 = vadd.f32 %v5675_v56, %v4177_v7  ;;  %5434 = vmatpush3.bf16.msra.mxu1 %v4794_v37  ;;  %v5497_v41 = vld [vmem:[%s6967_s3 + $0x30] sm:$0xff]   ;;  %5446 = vmatpush3.bf16.msra.mxu0 %v5496_v59 }
 0xd6e   :  { %4199 = vadd.xlane.f32.xlu0 %v4198_v4  ;;  %5435 = vmatprep.subr.bf16.mxu1 %v4793_v32 }
 0xd6f   :  { %v4183_v0 = vadd.f32 %v5674_v16, %v4175_v54  ;;  %v4207_v48 = vsel %vm111_vm0, %v4185_v12, 0.0  ;;  %5447 = vmatprep.subr.bf16.mxu0 %v5497_v41 }
 0xd71   :  { %v4201_v45 = vsel %vm111_vm0, %v4183_v0, 0.0  ;;  %5436 = vmatpush3.bf16.msra.mxu1 %v4793_v32  ;;  %5448 = vmatpush3.bf16.msra.mxu0 %v5497_v41 }
 0xd72   :  { %4205 = vadd.xlane.f32.xlu0 %v4204_v19  ;;  %4202 = vadd.xlane.f32.xlu1 %v4201_v45 }
 0xd73   :  { %5449 = vmatprep.subr.bf16.mxu0 %v5498_v33 }
 0xd75   :  { %5450 = vmatpush3.bf16.msra.mxu0 %v5498_v33 }
 0xd76   :  { %4208 = vadd.xlane.f32.xlu1 %v4207_v48  ;;  %5451 = vmatprep.subr.bf16.mxu0 %v5499_v26 }
 0xd79   :  { %5452 = vmatpush3.bf16.msra.mxu0 %v5499_v26 }
 0xde7   :  { %v4188_v38 = vpop.xlane.xlu1 %4187 }
 0xde8   :  { %v4211_v25 = vmul.f32 0.03125, %v4188_v38  ;;  %v4293_v38 = vsub.s32 2, %v5832_v17 }
 0xdea   :  { %v6772_v23 = vsub.f32 %v4178_v42, %v4211_v25 }
 0xdeb   :  { %v4197_v52 = vpop.xlane.xlu1 %4196  ;;  %v4191_v3 = vpop.xlane.xlu0 %4190 }
 0xdec   :  { %v4214_v49 = vmul.f32 0.03125, %v4197_v52  ;;  %v4212_v27 = vmul.f32 0.03125, %v4191_v3  ;;  %v4227_v28 = vmul.f32 %v6772_v23, %v6772_v23 }
 0xdee   :  { %v6776_v53 = vsub.f32 %v4181_v34, %v4214_v49  ;;  %v6778_v50 = vsub.f32 %v4179_v15, %v4212_v27  ;;  %v4235_v21 = vsel %vm111_vm0, %v4227_v28, 0.0  ;;  %v4305_v49 = vsub.s32 3, %v5832_v17 }
 0xdef   :  { %v4194_v58 = vpop.xlane.xlu0 %4193  ;;  %4236 = vadd.xlane.f32.xlu0 %v4235_v21  ;;  %v4294_v27 = vrot.slane %v6727_v60, %v4293_v38 }
 0xdf0   :  { %v4213_v14 = vmul.f32 0.03125, %v4194_v58  ;;  %v4228_v44 = vmul.f32 %v6778_v50, %v6778_v50  ;;  %v4230_v46 = vmul.f32 %v6776_v53, %v6776_v53 }
 0xdf2   :  { %v6783_v43 = vsub.f32 %v4180_v13, %v4213_v14  ;;  %v4238_v39 = vsel %vm111_vm0, %v4228_v44, 0.0  ;;  %v4244_v8 = vsel %vm111_vm0, %v4230_v46, 0.0 }
 0xdf3   :  { %4239 = vadd.xlane.f32.xlu1 %v4238_v39 }
 0xdf4   :  { %v4229_v36 = vmul.f32 %v6783_v43, %v6783_v43 }
 0xdf6   :  { %v4241_v2 = vsel %vm111_vm0, %v4229_v36, 0.0  ;;  %v4306_v36 = vrot.slane %v6727_v60, %v4305_v49 }
 0xdf7   :  { %4242 = vadd.xlane.f32.xlu0 %v4241_v2  ;;  %v4200_v18 = vpop.xlane.xlu0 %4199  ;;  %4245 = vadd.xlane.f32.xlu1 %v4244_v8 }
 0xdf8   :  { %v4215_v47 = vmul.f32 0.03125, %v4200_v18 }
 0xdfa   :  { %v6792_v35 = vsub.f32 %v4182_v61, %v4215_v47  ;;  %v5500_v61 = vld [vmem:[%s6967_s3 + $0x18] sm:$0xff]  }
 0xdfb   :  { %v4206_v1 = vpop.xlane.xlu0 %4205  ;;  %v4203_v42 = vpop.xlane.xlu1 %4202  ;;  %5453 = vmatprep.subr.bf16.mxu0 %v5500_v61 }
 0xdfc   :  { %v4217_v11 = vmul.f32 0.03125, %v4206_v1  ;;  %v4216_v55 = vmul.f32 0.03125, %v4203_v42  ;;  %v4231_v20 = vmul.f32 %v6792_v35, %v6792_v35  ;;  %5454 = vmatpush3.bf16.msra.mxu0 %v5500_v61 }
 0xdfe   :  { %v6796_v6 = vsub.f32 %v4184_v63, %v4217_v11  ;;  %v6798_v34 = vsub.f32 %v4183_v0, %v4216_v55  ;;  %v4247_v9 = vsel %vm111_vm0, %v4231_v20, 0.0 }
 0xdff   :  { %4248 = vadd.xlane.f32.xlu0 %v4247_v9  ;;  %v4209_v15 = vpop.xlane.xlu1 %4208 }
 0xe00   :  { %v4218_v30 = vmul.f32 0.03125, %v4209_v15  ;;  %v4233_v62 = vmul.f32 %v6796_v6, %v6796_v6  ;;  %v4232_v10 = vmul.f32 %v6798_v34, %v6798_v34 }
 0xe02   :  { %v6805_v13 = vsub.f32 %v4185_v12, %v4218_v30  ;;  %v4253_v57 = vsel %vm111_vm0, %v4233_v62, 0.0  ;;  %v4250_v24 = vsel %vm111_vm0, %v4232_v10, 0.0 }
 0xe03   :  { %4254 = vadd.xlane.f32.xlu0 %v4253_v57  ;;  %4251 = vadd.xlane.f32.xlu1 %v4250_v24 }
 0xe04   :  { %v4234_v29 = vmul.f32 %v6805_v13, %v6805_v13 }
 0xe06   :  { %v4256_v51 = vsel %vm111_vm0, %v4234_v29, 0.0 }
 0xe07   :  { %4257 = vadd.xlane.f32.xlu1 %v4256_v51 }
 0xe78   :  { %v4237_v7 = vpop.xlane.xlu0 %4236 }
 0xe79   :  { %v4259_v54 = vmul.f32 0.03125, %v4237_v7 }
 0xe7b   :  { %v4267_v4 = vadd.f32 1e-05, %v4259_v54 }
 0xe7c   :  { %v4240_v40 = vpop.xlane.xlu1 %4239 }
 0xe7d   :  { %5632 = vrsqrt.f32 %v4267_v4  ;;  %v4260_v63 = vmul.f32 0.03125, %v4240_v40 }
 0xe7f   :  { %v4268_v16 = vadd.f32 1e-05, %v4260_v63  ;;  %v5503_v63 = vld [vmem:[%s6967_s3] sm:$0xff]  }
 0xe80   :  { %v4243_v0 = vpop.xlane.xlu0 %4242  ;;  %v4246_v19 = vpop.xlane.xlu1 %4245 }
 0xe81   :  { %5634 = vrsqrt.f32 %v4268_v16  ;;  %v4261_v45 = vmul.f32 0.03125, %v4243_v0  ;;  %v4262_v56 = vmul.f32 0.03125, %v4246_v19  ;;  %v4321_v16 = vsub.s32 1, %v5832_v17  ;;  %v5679_v19 = vld [vmem:[%s6968_s4] sm:$0x3] }
 0xe83   :  { %v4269_v12 = vadd.f32 1e-05, %v4261_v45  ;;  %v4270_v48 = vadd.f32 1e-05, %v4262_v56  ;;  %v4322_v45 = vrot.slane %v5679_v19, %v4321_v16 }
 0xe85   :  { %5636 = vrsqrt.f32 %v4269_v12 }
 0xe86   :  { %5638 = vrsqrt.f32 %v4270_v48 }
 0xe88   :  { %v4249_v25 = vpop.xlane.xlu0 %4248 }
 0xe89   :  { %v4263_v52 = vmul.f32 0.03125, %v4249_v25 }
 0xe8a   :  { %v5633_v3 = vpop.eup %5632 }
 0xe8b   :  { %v4271_v28 = vadd.f32 1e-05, %v4263_v52  ;;  %v4283_v21 = vmul.f32 %v5633_v3, %v6772_v23 }
 0xe8c   :  { %v4255_v58 = vpop.xlane.xlu0 %4254  ;;  %v4252_v14 = vpop.xlane.xlu1 %4251 }
 0xe8d   :  { %5640 = vrsqrt.f32 %v4271_v28  ;;  %v4265_v44 = vmul.f32 0.03125, %v4255_v58  ;;  %v4264_v39 = vmul.f32 0.03125, %v4252_v14  ;;  %v4295_v47 = vmul.f32 %v4294_v27, %v4283_v21 }
 0xe8e   :  { %v5635_v46 = vpop.eup %5634 }
 0xe8f   :  { %v4273_v2 = vadd.f32 1e-05, %v4265_v44  ;;  %v4272_v8 = vadd.f32 1e-05, %v4264_v39  ;;  %v4284_v18 = vmul.f32 %v5635_v46, %v6778_v50  ;;  %v6835_v15 = vadd.f32 %v4306_v36, %v4295_v47 }
 0xe90   :  { %v4258_v1 = vpop.xlane.xlu1 %4257 }
 0xe91   :  { %5642 = vrsqrt.f32 %v4273_v2  ;;  %v4266_v42 = vmul.f32 0.03125, %v4258_v1  ;;  %v4296_v11 = vmul.f32 %v4294_v27, %v4284_v18 }
 0xe92   :  { %v5637_v55 = vpop.eup %5636  ;;  %5644 = vrsqrt.f32 %v4272_v8 }
 0xe93   :  { %v5639_v23 = vpop.eup %5638  ;;  %v4285_v20 = vmul.f32 %v5637_v55, %v6783_v43  ;;  %v4274_v9 = vadd.f32 1e-05, %v4266_v42  ;;  %v6837_v30 = vadd.f32 %v4306_v36, %v4296_v11 }
 0xe94   :  { %v4286_v62 = vmul.f32 %v5639_v23, %v6776_v53 }
 0xe95   :  { %v4297_v10 = vmul.f32 %v4294_v27, %v4285_v20  ;;  %5646 = vrsqrt.f32 %v4274_v9  ;;  %v4315_v50 = vpack.c.bf16 %v6837_v30, %v6835_v15  ;;  %v4423_v9 = vrot.slane %v6727_v60, %v4321_v16 }
 0xe96   :  { %v4298_v57 = vmul.f32 %v4294_v27, %v4286_v62 }
 0xe97   :  { %5437 = vmatprep.mubr.msk.bf16.mxu1 %vm111_vm0, %v4315_v50  ;;  %v6843_v24 = vadd.f32 %v4306_v36, %v4297_v10 }
 0xe98   :  { %v6845_v29 = vadd.f32 %v4306_v36, %v4298_v57 }
 0xe9a   :  { %v5641_v43 = vpop.eup %5640  ;;  %v4316_v51 = vpack.c.bf16 %v6845_v29, %v6843_v24 }
 0xe9b   :  { %v4287_v53 = vmul.f32 %v5641_v43, %v6792_v35 }
 0xe9c   :  { %5438 = vmatmul.mubr.msk.bf16.vlgmr.msra.gmra.mxu1 %vm111_vm0, %v4316_v51 }
 0xe9d   :  { %v4299_v32 = vmul.f32 %v4294_v27, %v4287_v53 }
 0xe9e   :  { %v5643_v31 = vpop.eup %5642 }
 0xe9f   :  { %v5645_v37 = vpop.eup %5644  ;;  %v4289_v22 = vmul.f32 %v5643_v31, %v6796_v6  ;;  %v6854_v61 = vadd.f32 %v4306_v36, %v4299_v32 }
 0xea0   :  { %v4288_v5 = vmul.f32 %v5645_v37, %v6798_v34  ;;  %v5501_v34 = vld [vmem:[%s6967_s3 + $0x10] sm:$0xff]  }
 0xea1   :  { %v4301_v26 = vmul.f32 %v4294_v27, %v4289_v22  ;;  %5455 = vmatprep.subr.bf16.mxu0 %v5501_v34 }
 0xea2   :  { %v5647_v59 = vpop.eup %5646  ;;  %v4300_v41 = vmul.f32 %v4294_v27, %v4288_v5  ;;  %5456 = vmatpush3.bf16.msra.mxu0 %v5501_v34 }
 0xea3   :  { %v4290_v33 = vmul.f32 %v5647_v59, %v6805_v13  ;;  %v6860_v4 = vadd.f32 %v4306_v36, %v4301_v26  ;;  %v5502_v13 = vld [vmem:[%s6967_s3 + $0x8] sm:$0xff]   ;;  %s5760_s3 = smov [#allocation7]  }
 0xea4   :  { %v6856_v7 = vadd.f32 %v4306_v36, %v4300_v41  ;;  %5457 = vmatprep.subr.bf16.mxu0 %v5502_v13  ;;  %s4686_s4 = sshll.u32 %s5760_s3, 4  ;;  %s4687_s4 = int_to_ptr.vmem [resolvable:$true] %s4686_s4 }
 0xea5   :  { %v4302_v54 = vmul.f32 %v4294_v27, %v4290_v33  ;;  %s5720_s18 = scalar_lea.vmem %s4687_s4, 1024  ;;  %p5725_p11 = scmp.lt.s32.totalorder %s4687_s4, %s4687_s4 }
 0xea6   :  { %v4317_v35 = vpack.c.bf16 %v6856_v7, %v6854_v61  ;;  %5458 = vmatpush3.bf16.msra.mxu0 %v5502_v13  ;;  %p5721_p10 = scmp.ne.s32.totalorder %s4687_s4, %s5720_s18  ;;  %p5726_p12 = scmp.lt.s32.totalorder %s5720_s18, %s5720_s18 }
 0xea7   :  { %v6862_v40 = vadd.f32 %v4306_v36, %v4302_v54  ;;  %5459 = vmatprep.subr.bf16.mxu0 %v5503_v63 }
 0xea8   :  { %5441 = vmatprep.mubr.msk.bf16.mxu1 %vm111_vm0, %v4317_v35  ;;  %p5727_p13 = por %p5726_p12, %p5725_p11 }
 0xea9   :  { %v4318_v6 = vpack.c.bf16 %v6862_v40, %v6860_v4 }
 0xeaa   :  { %5460 = vmatpush3.bf16.msra.mxu0 %v5503_v63  ;;  %p5728_p0 = pnand %p5727_p13, %p5721_p10 }
 0xeab   :  { %5442 = vmatmul.mubr.msk.bf16.gmra.mxu1 %vm111_vm0, %v4318_v6 }
 0xf5c   :  { %v5439_v0 = vpop.f32.mrf.mxu1 }
 0xf5d   :  { %v4386_v25 = vadd.f32 %v5439_v0, %v4322_v45 }
 0xf5e   :  { %v4377_v56 = vpop.f32.mrf.mxu1 }
 0xf5f   :  { %v4378_v48 = vadd.f32 %v4377_v56, %v4322_v45  ;;  %v4410_v21 = vmax.f32 %v4386_v25, 0.0 }
 0xf60   :  { %v5440_v12 = vpop.f32.mrf.mxu1 }
 0xf61   :  { %v4389_v38 = vadd.f32 %v5440_v12, %v4322_v45  ;;  %v4408_v27 = vmax.f32 %v4378_v48, 0.0 }
 0xf62   :  { %v4380_v52 = vpop.f32.mrf.mxu1 }
 0xf63   :  { %v4381_v3 = vadd.f32 %v4380_v52, %v4322_v45  ;;  %v4411_v49 = vmax.f32 %v4389_v38, 0.0 }
 0xf65   :  { %v4409_v28 = vmax.f32 %v4381_v3, 0.0  ;;  %v4417_v14 = vpack.c.bf16 %v4411_v49, %v4410_v21 }
 0xf67   :  { %v4416_v58 = vpack.c.bf16 %v4409_v28, %v4408_v27 }
 0xf69   :  { %5461 = vmatprep.mubr.bf16.mxu0 %v4416_v58 }
 0xf6a   :  { %5462 = vmatmul.mubr.bf16.vlgmr.msra.gmra.mxu0 %v4417_v14 }
 0xf6b   :  { %v5443_v44 = vpop.f32.mrf.mxu1 }
 0xf6c   :  { %v4402_v8 = vadd.f32 %v5443_v44, %v4322_v45 }
 0xf6d   :  { %v4393_v39 = vpop.f32.mrf.mxu1 }
 0xf6e   :  { %v4394_v36 = vadd.f32 %v4393_v39, %v4322_v45  ;;  %v4414_v55 = vmax.f32 %v4402_v8, 0.0 }
 0xf6f   :  { %v5444_v46 = vpop.f32.mrf.mxu1 }
 0xf70   :  { %v4405_v2 = vadd.f32 %v5444_v46, %v4322_v45  ;;  %v4412_v42 = vmax.f32 %v4394_v36, 0.0 }
 0xf71   :  { %v4396_v18 = vpop.f32.mrf.mxu1 }
 0xf72   :  { %v4397_v47 = vadd.f32 %v4396_v18, %v4322_v45  ;;  %v4415_v1 = vmax.f32 %v4405_v2, 0.0 }
 0xf74   :  { %v4413_v11 = vmax.f32 %v4397_v47, 0.0  ;;  %v4419_v20 = vpack.c.bf16 %v4415_v1, %v4414_v55 }
 0xf76   :  { %v4418_v23 = vpack.c.bf16 %v4413_v11, %v4412_v42 }
 0xf78   :  { %5465 = vmatprep.mubr.bf16.mxu0 %v4418_v23 }
 0xf79   :  { %5466 = vmatmul.mubr.bf16.gmra.mxu0 %v4419_v20 }
0x102a   :  { %v5463_v62 = vpop.f32.mrf.mxu0 }
0x102b   :  { %v4515_v10 = vadd.f32 %v5463_v62, %v4423_v9 }
0x102c   :  { %v4506_v50 = vpop.f32.mrf.mxu0 }
0x102d   :  { %v4539_v57 = vadd.f32 %v4515_v10, %v6843_v24  ;;  %v4507_v43 = vadd.f32 %v4506_v50, %v4423_v9 }
0x102e   :  { %v5464_v51 = vpop.f32.mrf.mxu0 }
0x102f   :  { %v4537_v53 = vadd.f32 %v4507_v43, %v6835_v15  ;;  %v4518_v31 = vadd.f32 %v5464_v51, %v4423_v9  ;;  %v4551_v37 = vsel %vm111_vm0, %v4539_v57, 0.0 }
0x1030   :  { %4552 = vadd.xlane.f32.xlu0 %v4551_v37  ;;  %v4509_v22 = vpop.f32.mrf.mxu0 }
0x1031   :  { %v4540_v5 = vadd.f32 %v4518_v31, %v6845_v29  ;;  %v4510_v32 = vadd.f32 %v4509_v22, %v4423_v9  ;;  %v4545_v33 = vsel %vm111_vm0, %v4537_v53, 0.0 }
0x1033   :  { %v4538_v59 = vadd.f32 %v4510_v32, %v6837_v30  ;;  %v4554_v41 = vsel %vm111_vm0, %v4540_v5, 0.0 }
0x1034   :  { %4555 = vadd.xlane.f32.xlu1 %v4554_v41  ;;  %4546 = vadd.xlane.f32.xlu0 %v4545_v33 }
0x1035   :  { %v4548_v24 = vsel %vm111_vm0, %v4538_v59, 0.0 }
0x1038   :  { %4549 = vadd.xlane.f32.xlu1 %v4548_v24 }
0x1039   :  { %v5467_v15 = vpop.f32.mrf.mxu0 }
0x103a   :  { %v4531_v54 = vadd.f32 %v5467_v15, %v4423_v9 }
0x103b   :  { %v4522_v26 = vpop.f32.mrf.mxu0 }
0x103c   :  { %v4523_v35 = vadd.f32 %v4522_v26, %v4423_v9  ;;  %v4543_v13 = vadd.f32 %v4531_v54, %v6860_v4 }
0x103d   :  { %v5468_v6 = vpop.f32.mrf.mxu0 }
0x103e   :  { %v4541_v34 = vadd.f32 %v4523_v35, %v6854_v61  ;;  %v4534_v30 = vadd.f32 %v5468_v6, %v4423_v9  ;;  %v4563_v56 = vsel %vm111_vm0, %v4543_v13, 0.0 }
0x103f   :  { %v4525_v29 = vpop.f32.mrf.mxu0 }
0x1040   :  { %v4526_v63 = vadd.f32 %v4525_v29, %v4423_v9  ;;  %v4557_v16 = vsel %vm111_vm0, %v4541_v34, 0.0  ;;  %v4544_v19 = vadd.f32 %v4534_v30, %v6862_v40  ;;  %v4651_v29 = vsub.s32 4, %v5832_v17 }
0x1041   :  { %4558 = vadd.xlane.f32.xlu0 %v4557_v16 }
0x1042   :  { %v4542_v0 = vadd.f32 %v4526_v63, %v6856_v7  ;;  %v4566_v61 = vsel %vm111_vm0, %v4544_v19, 0.0  ;;  %v4652_v30 = vrot.slane %v6727_v60, %v4651_v29 }
0x1044   :  { %v4560_v45 = vsel %vm111_vm0, %v4542_v0, 0.0 }
0x1045   :  { %4561 = vadd.xlane.f32.xlu1 %v4560_v45  ;;  %4564 = vadd.xlane.f32.xlu0 %v4563_v56 }
0x1049   :  { %4567 = vadd.xlane.f32.xlu1 %v4566_v61 }
0x10b9   :  { %v4553_v12 = vpop.xlane.xlu0 %4552 }
0x10ba   :  { %v4571_v4 = vmul.f32 0.03125, %v4553_v12 }
0x10bc   :  { %v6898_v48 = vsub.f32 %v4539_v57, %v4571_v4 }
0x10bd   :  { %v4547_v38 = vpop.xlane.xlu0 %4546  ;;  %v4556_v25 = vpop.xlane.xlu1 %4555 }
0x10be   :  { %v4569_v52 = vmul.f32 0.03125, %v4547_v38  ;;  %v4572_v3 = vmul.f32 0.03125, %v4556_v25  ;;  %v4587_v7 = vmul.f32 %v6898_v48, %v6898_v48 }
0x10c0   :  { %v6902_v40 = vsub.f32 %v4537_v53, %v4569_v52  ;;  %v6904_v49 = vsub.f32 %v4540_v5, %v4572_v3  ;;  %v4599_v27 = vsel %vm111_vm0, %v4587_v7, 0.0 }
0x10c1   :  { %4600 = vadd.xlane.f32.xlu0 %v4599_v27  ;;  %v4550_v28 = vpop.xlane.xlu1 %4549 }
0x10c2   :  { %v4570_v21 = vmul.f32 0.03125, %v4550_v28  ;;  %v4585_v58 = vmul.f32 %v6902_v40, %v6902_v40  ;;  %v4588_v14 = vmul.f32 %v6904_v49, %v6904_v49 }
0x10c4   :  { %v6911_v44 = vsub.f32 %v4538_v59, %v4570_v21  ;;  %v4593_v39 = vsel %vm111_vm0, %v4585_v58, 0.0  ;;  %v4602_v46 = vsel %vm111_vm0, %v4588_v14, 0.0 }
0x10c5   :  { %4594 = vadd.xlane.f32.xlu0 %v4593_v39  ;;  %4603 = vadd.xlane.f32.xlu1 %v4602_v46 }
0x10c6   :  { %v4586_v36 = vmul.f32 %v6911_v44, %v6911_v44 }
0x10c8   :  { %v4596_v2 = vsel %vm111_vm0, %v4586_v36, 0.0 }
0x10c9   :  { %4597 = vadd.xlane.f32.xlu1 %v4596_v2 }
0x10ca   :  { %v4559_v8 = vpop.xlane.xlu0 %4558 }
0x10cb   :  { %v4573_v18 = vmul.f32 0.03125, %v4559_v8 }
0x10cd   :  { %v6918_v47 = vsub.f32 %v4541_v34, %v4573_v18 }
0x10ce   :  { %v4565_v1 = vpop.xlane.xlu0 %4564  ;;  %v4562_v42 = vpop.xlane.xlu1 %4561 }
0x10cf   :  { %v4575_v11 = vmul.f32 0.03125, %v4565_v1  ;;  %v4574_v55 = vmul.f32 0.03125, %v4562_v42  ;;  %v4589_v23 = vmul.f32 %v6918_v47, %v6918_v47 }
0x10d1   :  { %v6922_v20 = vsub.f32 %v4543_v13, %v4575_v11  ;;  %v6924_v9 = vsub.f32 %v4542_v0, %v4574_v55  ;;  %v4605_v62 = vsel %vm111_vm0, %v4589_v23, 0.0  ;;  %v4663_v13 = vsub.s32 5, %v5832_v17 }
0x10d2   :  { %4606 = vadd.xlane.f32.xlu0 %v4605_v62  ;;  %v4568_v10 = vpop.xlane.xlu1 %4567 }
0x10d3   :  { %v4576_v50 = vmul.f32 0.03125, %v4568_v10  ;;  %v4591_v57 = vmul.f32 %v6922_v20, %v6922_v20  ;;  %v4590_v43 = vmul.f32 %v6924_v9, %v6924_v9 }
0x10d5   :  { %v6931_v51 = vsub.f32 %v4544_v19, %v4576_v50  ;;  %v4611_v53 = vsel %vm111_vm0, %v4591_v57, 0.0  ;;  %v4608_v31 = vsel %vm111_vm0, %v4590_v43, 0.0  ;;  %v4664_v19 = vrot.slane %v6727_v60, %v4663_v13 }
0x10d6   :  { %4612 = vadd.xlane.f32.xlu0 %v4611_v53  ;;  %4609 = vadd.xlane.f32.xlu1 %v4608_v31 }
0x10d7   :  { %v4592_v37 = vmul.f32 %v6931_v51, %v6931_v51 }
0x10d9   :  { %v4614_v22 = vsel %vm111_vm0, %v4592_v37, 0.0 }
0x10da   :  { %4615 = vadd.xlane.f32.xlu1 %v4614_v22 }
0x114a   :  { %v4601_v5 = vpop.xlane.xlu0 %4600 }
0x114b   :  { %v4619_v32 = vmul.f32 0.03125, %v4601_v5 }
0x114d   :  { %v4627_v59 = vadd.f32 1e-05, %v4619_v32 }
0x114e   :  { %v4595_v41 = vpop.xlane.xlu0 %4594  ;;  %v4604_v33 = vpop.xlane.xlu1 %4603 }
0x114f   :  { %5648 = vrsqrt.f32 %v4627_v59  ;;  %v4617_v24 = vmul.f32 0.03125, %v4595_v41  ;;  %v4620_v15 = vmul.f32 0.03125, %v4604_v33 }
0x1151   :  { %v4625_v26 = vadd.f32 1e-05, %v4617_v24  ;;  %v4628_v54 = vadd.f32 1e-05, %v4620_v15 }
0x1152   :  { %v4598_v35 = vpop.xlane.xlu1 %4597 }
0x1153   :  { %5650 = vrsqrt.f32 %v4625_v26  ;;  %v4618_v6 = vmul.f32 0.03125, %v4598_v35 }
0x1154   :  { %5652 = vrsqrt.f32 %v4628_v54 }
0x1155   :  { %v4626_v34 = vadd.f32 1e-05, %v4618_v6 }
0x1157   :  { %5654 = vrsqrt.f32 %v4626_v34 }
0x115b   :  { %v4607_v63 = vpop.xlane.xlu0 %4606 }
0x115c   :  { %v5649_v16 = vpop.eup %5648  ;;  %v4621_v0 = vmul.f32 0.03125, %v4607_v63 }
0x115d   :  { %v4643_v45 = vmul.f32 %v5649_v16, %v6898_v48 }
0x115e   :  { %v4629_v56 = vadd.f32 1e-05, %v4621_v0 }
0x115f   :  { %v4655_v61 = vmul.f32 %v4652_v30, %v4643_v45  ;;  %v4613_v12 = vpop.xlane.xlu0 %4612  ;;  %v4610_v4 = vpop.xlane.xlu1 %4609 }
0x1160   :  { %v5651_v38 = vpop.eup %5650  ;;  %5656 = vrsqrt.f32 %v4629_v56  ;;  %v4623_v25 = vmul.f32 0.03125, %v4613_v12  ;;  %v4622_v52 = vmul.f32 0.03125, %v4610_v4 }
0x1161   :  { %v5653_v3 = vpop.eup %5652  ;;  %v4667_v7 = vadd.f32 %v4664_v19, %v4655_v61  ;;  %v4641_v17 = vmul.f32 %v5651_v38, %v6902_v40 }
0x1162   :  { %v4644_v27 = vmul.f32 %v5653_v3, %v6904_v49  ;;  %v4631_v28 = vadd.f32 1e-05, %v4623_v25  ;;  %v4630_v21 = vadd.f32 1e-05, %v4622_v52 }
0x1163   :  { %4675 = vst.msk [vmem:[#allocation7 + $0x10] sm:$0xff] %vm111_vm0, %v4667_v7  ;;  %v4653_v60 = vmul.f32 %v4652_v30, %v4641_v17  ;;  %v4616_v48 = vpop.xlane.xlu1 %4615 }
0x1164   :  { %v5655_v58 = vpop.eup %5654  ;;  %v4656_v14 = vmul.f32 %v4652_v30, %v4644_v27  ;;  %5658 = vrsqrt.f32 %v4631_v28  ;;  %v4624_v39 = vmul.f32 0.03125, %v4616_v48 }
0x1165   :  { %v4665_v46 = vadd.f32 %v4664_v19, %v4653_v60  ;;  %v4642_v36 = vmul.f32 %v5655_v58, %v6911_v44  ;;  %5660 = vrsqrt.f32 %v4630_v21 }
0x1166   :  { %v4668_v2 = vadd.f32 %v4664_v19, %v4656_v14  ;;  %v4632_v8 = vadd.f32 1e-05, %v4624_v39 }
0x1167   :  { %4673 = vst.msk [vmem:[#allocation7] sm:$0xff] %vm111_vm0, %v4665_v46  ;;  %v4654_v40 = vmul.f32 %v4652_v30, %v4642_v36 }
0x1168   :  { %4676 = vst.msk [vmem:[#allocation7 + $0x18] sm:$0xff] %vm111_vm0, %v4668_v2  ;;  %5662 = vrsqrt.f32 %v4632_v8 }
0x1169   :  { %v4666_v49 = vadd.f32 %v4664_v19, %v4654_v40 }
0x116b   :  { %4674 = vst.msk [vmem:[#allocation7 + $0x8] sm:$0xff] %vm111_vm0, %v4666_v49 }
0x116d   :  { %v5657_v18 = vpop.eup %5656 }
0x116e   :  { %v4645_v1 = vmul.f32 %v5657_v18, %v6918_v47 }
0x1170   :  { %v4657_v42 = vmul.f32 %v4652_v30, %v4645_v1 }
0x1171   :  { %v5659_v11 = vpop.eup %5658 }
0x1172   :  { %v5661_v55 = vpop.eup %5660  ;;  %v4669_v23 = vadd.f32 %v4664_v19, %v4657_v42  ;;  %v4647_v44 = vmul.f32 %v5659_v11, %v6922_v20 }
0x1173   :  { %v4646_v62 = vmul.f32 %v5661_v55, %v6924_v9 }
0x1174   :  { %4677 = vst.msk [vmem:[#allocation7 + $0x20] sm:$0xff] %vm111_vm0, %v4669_v23  ;;  %v4659_v10 = vmul.f32 %v4652_v30, %v4647_v44 }
0x1175   :  { %v5663_v50 = vpop.eup %5662  ;;  %v4658_v57 = vmul.f32 %v4652_v30, %v4646_v62 }
0x1176   :  { %v4671_v43 = vadd.f32 %v4664_v19, %v4659_v10  ;;  %v4648_v53 = vmul.f32 %v5663_v50, %v6931_v51 }
0x1177   :  { %v4670_v31 = vadd.f32 %v4664_v19, %v4658_v57 }
0x1178   :  { %4679 = vst.msk [vmem:[#allocation7 + $0x30] sm:$0xff] %vm111_vm0, %v4671_v43  ;;  %v4660_v47 = vmul.f32 %v4652_v30, %v4648_v53 }
0x1179   :  { %4678 = vst.msk [vmem:[#allocation7 + $0x28] sm:$0xff] %vm111_vm0, %v4670_v31 }
0x117a   :  { %v4672_v37 = vadd.f32 %v4664_v19, %v4660_v47 }
0x117c   :  { %4680 = vst.msk [vmem:[#allocation7 + $0x38] sm:$0xff] %vm111_vm0, %v4672_v37 }
0x117d   :  { %5731 = shalt.err (!%p5728_p0)
}
0x117e   :  { %4692 = dma.vmem_to_hbm [thread:$0]  %s4687_s4, 1024, %s6970_s6, [#allocation4], %s5747_s24, %s5747_s24, %s5748_s25  }
0x117f   :  { %5744 = dma.done.wait [#allocation4], 1024  }
0x1180   :  { %5745 = vsyncadd [#allocation4], 4294966272 }
0x1181   :  { %4696 = vsyncpa [#allocation3], 1 }
0x1182   :  { %4697 = vsyncpa [#allocation6], 1 }
0x1183   :  { %4698 = vsyncpa [#allocation4], 1 }

</bundles_post_ra>
